<compile_context>
chip_gen: v7x
topology: tpu7x:2x2x1
jax: 0.10.0
libtpu: 0.0.40
codegen_flags: <defaults>
</compile_context>

<pallas_src>
import jax
import jax.numpy as jnp
from jax import lax
from jax.experimental import pallas as pl
from jax.experimental.pallas import tpu as pltpu


# ----------------------------- config ----------------------------------------
class Cfg:
    CNN = [1, 8, 16]            # encoder channel progression (2 conv stages)
    CNN_KERNEL = 4
    CNN_STRIDE = 2
    CNN_PADDING = 1
    NUM_GENRES = 4
    GENRE_EMBED_DIM = 8
    LATENT_DIM = 8
    SPEC_ROWS = 16
    SPEC_COLS = 8
    LSTM_HIDDEN_SIZE = 32
    LSTM_NUM_LAYERS = 2
    KIND_OF_SPECTROGRAM = "STFT"   # != 'MEL' -> deconv reuses CNN kernel params


cfg = Cfg()

# ----------------------------- static geometry -------------------------------
B = 2                       # batch used by this script
C0, C1, C2 = cfg.CNN        # 1, 8, 16
K = cfg.CNN_KERNEL          # 4
S = cfg.CNN_STRIDE          # 2
P = cfg.CNN_PADDING         # 1
H0 = cfg.SPEC_ROWS          # 16
W = cfg.SPEC_COLS           # 8
E = cfg.GENRE_EMBED_DIM     # 8
L = cfg.LATENT_DIM          # 8
HH = cfg.LSTM_HIDDEN_SIZE   # 32
G4 = 4 * HH                 # 128


def _conv_out(h):
    return (h + 2 * P - K) // S + 1


H1 = _conv_out(H0)          # 8   (after encoder conv1)
H2 = _conv_out(H1)          # 4   (after encoder conv2)  -> latent h
T = W                       # 8   LSTM sequence length (= spectrogram cols)
R = W * B                   # 16  rows per h-block in (h, w, b) row layouts
HD1 = 2 * H2                # 8   deconv1 output height
HD2 = 4 * H2                # 16  deconv2 output height
HD3 = 8 * H2                # 32  deconv3 output height

# ----------------------------- packed-slab offsets ----------------------------
# activation slab (width 8)
RX_P1 = 0                           # (H1*W*B, K)   conv1 im2col patches
RX_GE = RX_P1 + H1 * W * B          # (H2*R, E)     encoder genre rows
RX_EPS = RX_GE + H2 * R             # (H2*R, L)     reparameterization noise
RX_GD = RX_EPS + H2 * R             # (T*B, E)      decoder genre rows
X_ROWS = RX_GD + T * B              # 272

# weight slab A (width 32)
RA_W1 = 0          # conv1 weight (K, C1), rows K:8 are zero
RA_BN1 = 8         # rows: b1, gamma1, beta1 (lanes :C1)
RA_W2 = 16         # merged conv2 weight (K*C1, C2)
RA_BN2 = 48        # rows: b2, gamma2, beta2 (lanes :C2)
RA_WLAT = 56       # merged 1x1 mu|logvar weight (C2+E, 2L)
RA_BLAT = 80       # (1, 2L)
RA_WFC = 88        # fc_out weight (HH, H2*L), lanes ordered (h2, l)
RA_BFC = 120       # (1, H2*L)
RA_WD3 = 128       # banded deconv3 weight (HD2*C1, HD3*C0) = (128, 32)
RA_BD3 = 256       # (1, HD3)
A_ROWS = 264

# weight slab B (width 128)
RB_WIN1 = 0        # merged LSTM layer-1 input weight (H2*L+E, 4HH) = (40, 128)
RB_WHH1 = 40       # (HH, 4HH)
RB_WL2 = 72        # merged [W_ih2; W_hh2] (2HH, 4HH)
RB_B1 = 136        # (1, 4HH) layer-1 bias (b_ih + b_hh)
RB_B2 = 137        # (1, 4HH) layer-2 bias
RB_WD1 = 144       # banded deconv1 weight (H2*L, HD1*C2)  = (32, 128)
RB_WD2 = 176       # banded deconv2 weight (HD1*C2, HD2*C1) = (128, 128)
RB_BD1 = 304       # (1, HD1*C2)
RB_BD2 = 305       # (1, HD2*C1)
B_ROWS = 312

VMEM_SPEC = pl.BlockSpec(memory_space=pltpu.MemorySpace.VMEM)


# ----------------------------- in-kernel helpers ------------------------------
def _dot(a, b):
    return jnp.dot(a, b, preferred_element_type=jnp.float32)


def _bn_relu(y, gamma, beta, eps=1e-5):
    # BatchNorm2d with per-call batch statistics (train-mode forward) + ReLU.
    mean = jnp.mean(y, axis=0, keepdims=True)
    var = jnp.maximum(jnp.mean(y * y, axis=0, keepdims=True) - mean * mean, 0.0)
    return jnp.maximum((y - mean) * lax.rsqrt(var + eps) * gamma + beta, 0.0)


def _leaky(y):                     # LeakyReLU(0.2)
    return jnp.maximum(y, 0.2 * y)


def _shift_prev(x, blk):
    """Per h-block: value of block m-1 (zeros for m == 0). blk is 8-aligned."""
    return jnp.concatenate(
        [jnp.zeros((blk, x.shape[1]), x.dtype), x[:-blk, :]], axis=0)


def _shift_next(x, blk):
    """Per h-block: value of block m+1 (zeros for the last block)."""
    return jnp.concatenate(
        [x[blk:, :], jnp.zeros((blk, x.shape[1]), x.dtype)], axis=0)


def _lstm_gates(g, c):
    # PyTorch gate order i, f, g, o.
    i = jax.nn.sigmoid(g[:, 0 * HH:1 * HH])
    f = jax.nn.sigmoid(g[:, 1 * HH:2 * HH])
    gg = jnp.tanh(g[:, 2 * HH:3 * HH])
    o = jax.nn.sigmoid(g[:, 3 * HH:4 * HH])
    c_new = f * c + i * gg
    return o * jnp.tanh(c_new), c_new


# ----------------------------- the fused kernel -------------------------------
def _vae_kernel(act_ref, wa_ref, wb_ref, lat_ref, rec_ref, lstm_ref):
    # ============================ encoder ====================================
    # conv1 (k=(4,1), s=(2,1), p=(1,0)) + BN + ReLU.  Patch rows are ordered
    # (parity, j, w, b) with h1 = 2*j + parity, so y1 splits into two aligned
    # halves feeding the stride-2 conv2 with block-aligned shifts only.
    p1 = act_ref[RX_P1:RX_P1 + H1 * W * B, :]                     # (128, 8), lanes K:8 zero
    w1 = wa_ref[RA_W1:RA_W1 + 8, :][:, :C1]                       # (8, C1), rows K:8 zero
    b1 = wa_ref[RA_BN1:RA_BN1 + 1, :][:, :C1]
    g1 = wa_ref[RA_BN1 + 1:RA_BN1 + 2, :][:, :C1]
    be1 = wa_ref[RA_BN1 + 2:RA_BN1 + 3, :][:, :C1]
    y1 = _bn_relu(_dot(p1, w1) + b1, g1, be1)                     # (128, C1)
    y1_even = y1[:H2 * R, :]                                      # rows (j, w, b), h1 = 2j
    y1_odd = y1[H2 * R:, :]                                       # rows (j, w, b), h1 = 2j+1

    # conv2: out[h2] = x[2h2-1]W0 + x[2h2]W1 + x[2h2+1]W2 + x[2h2+2]W3, merged
    # into ONE matmul via lane-concat of the four (shifted) phase planes.
    xc2 = jnp.concatenate(
        [_shift_prev(y1_odd, R), y1_even, y1_odd, _shift_next(y1_even, R)],
        axis=1)                                                   # (64, 4*C1)
    w2m = wa_ref[RA_W2:RA_W2 + K * C1, :][:, :C2]                 # (32, C2)
    b2 = wa_ref[RA_BN2:RA_BN2 + 1, :][:, :C2]
    g2 = wa_ref[RA_BN2 + 1:RA_BN2 + 2, :][:, :C2]
    be2 = wa_ref[RA_BN2 + 2:RA_BN2 + 3, :][:, :C2]
    y2 = _bn_relu(_dot(xc2, w2m) + b2, g2, be2)                   # (64, C2), rows (h2, w, b)

    # genre concat + 1x1 conv_mu / conv_logvar merged into ONE matmul that
    # emits [mu | logvar]; reparameterization fused right after.
    ge = act_ref[RX_GE:RX_GE + H2 * R, :]                         # (64, E)
    xlat = jnp.concatenate([y2, ge], axis=1)                      # (64, C2+E)
    wlat = wa_ref[RA_WLAT:RA_WLAT + C2 + E, :][:, :2 * L]
    blat = wa_ref[RA_BLAT:RA_BLAT + 1, :][:, :2 * L]
    mulv = _dot(xlat, wlat) + blat                                # (64, 2L) = [mu | logvar]
    lat_ref[...] = mulv
    eps = act_ref[RX_EPS:RX_EPS + H2 * R, :]
    z = mulv[:, :L] + eps * jnp.exp(0.5 * mulv[:, L:2 * L])       # (64, L), rows (h2, w, b)

    # ============================ decoder ====================================
    # LSTM layer-1 input projection hoisted out of the time loop and merged
    # into ONE matmul: rows (t=w, b), lanes = [z(h2=0..3) | genre] (40 feats).
    gd = act_ref[RX_GD:RX_GD + T * B, :]                          # (16, E)
    zin = jnp.concatenate(
        [z[0:R], z[R:2 * R], z[2 * R:3 * R], z[3 * R:4 * R], gd], axis=1)  # (16, 40)
    w_in1 = wb_ref[RB_WIN1:RB_WIN1 + H2 * L + E, :]               # (40, 4HH)
    b_l1 = wb_ref[RB_B1:RB_B1 + 1, :]
    gin = _dot(zin, w_in1) + b_l1                                 # (16, 4HH), kept in vregs

    whh1 = wb_ref[RB_WHH1:RB_WHH1 + HH, :]                        # (HH, 4HH)
    w_l2 = wb_ref[RB_WL2:RB_WL2 + 2 * HH, :]                      # (2HH, 4HH) = [Wih2; Whh2]
    b_l2 = wb_ref[RB_B2:RB_B2 + 1, :]

    # 2-layer LSTM, fully unrolled over T (states carried as values).
    h1_t = jnp.zeros((B, HH), jnp.float32)
    c1_t = jnp.zeros((B, HH), jnp.float32)
    h2_t = jnp.zeros((B, HH), jnp.float32)
    c2_t = jnp.zeros((B, HH), jnp.float32)
    # TODO(synk): nn.LSTM inter-layer dropout (p=0.3) is train-only; omitted.
    for t in range(T):
        g1t = gin[t * B:(t + 1) * B, :] + _dot(h1_t, whh1)
        h1_t, c1_t = _lstm_gates(g1t, c1_t)
        g2t = _dot(jnp.concatenate([h1_t, h2_t], axis=1), w_l2) + b_l2
        h2_t, c2_t = _lstm_gates(g2t, c2_t)
        lstm_ref[t * B:(t + 1) * B, :] = h2_t    # store is off the recurrence path
    lstm_out = lstm_ref[...]                                      # (16, HH), rows (t, b)

    # fc_out: ONE matmul; output lanes are ordered (h2, l) so the result is
    # already the deconv-stack input layout (rows = (w, b), lanes = (h, c)).
    wfc = wa_ref[RA_WFC:RA_WFC + HH, :]                           # (HH, H2*L)
    bfc = wa_ref[RA_BFC:RA_BFC + 1, :]
    vol = _dot(lstm_out, wfc) + bfc                               # (16, H2*L)

    # Three ConvTranspose2d (K=4, s=2, p=1) stages as banded matmuls in the
    # rows=(w,b), lanes=(h,c) layout: the stride/pad shift structure is baked
    # into precomputed banded weights, so there are no shifts/interleaves and
    # every intermediate is a lane-dense (16, 128) value.  LeakyReLU(0.2)
    # after stages 1 & 2; tanh at the end (matches torch.tanh(recon)).
    wd1 = wb_ref[RB_WD1:RB_WD1 + H2 * L, :]                       # (32, 128)
    bd1 = wb_ref[RB_BD1:RB_BD1 + 1, :]
    x1 = _leaky(_dot(vol, wd1) + bd1)                             # (16, HD1*C2) = (16, 128)
    wd2 = wb_ref[RB_WD2:RB_WD2 + HD1 * C2, :]                     # (128, 128)
    bd2 = wb_ref[RB_BD2:RB_BD2 + 1, :]
    x2 = _leaky(_dot(x1, wd2) + bd2)                              # (16, HD2*C1) = (16, 128)
    wd3 = wa_ref[RA_WD3:RA_WD3 + HD2 * C1, :]                     # (128, 32)
    bd3 = wa_ref[RA_BD3:RA_BD3 + 1, :]
    rec_ref[...] = jnp.tanh(_dot(x2, wd3) + bd3)                  # (16, HD3), lanes = out h


def _fused_vae_call(act, slab_a, slab_b):
    out_shape = (
        jax.ShapeDtypeStruct((H2 * R, 2 * L), jnp.float32),   # [mu | logvar] rows (h2, w, b)
        jax.ShapeDtypeStruct((T * B, HD3), jnp.float32),      # recon, rows (w, b), lanes h
    )
    return pl.pallas_call(
        _vae_kernel,
        out_shape=out_shape,
        in_specs=[VMEM_SPEC, VMEM_SPEC, VMEM_SPEC],
        out_specs=(VMEM_SPEC, VMEM_SPEC),
        scratch_shapes=[pltpu.VMEM((T * B, HH), jnp.float32)],   # LSTM layer-2 outputs
    )(act, slab_a, slab_b)


# ----------------------------- parameters -------------------------------------
def _banded_deconv(w_t, h_in):
    """ConvTranspose2d(K=(4,1), stride=(2,1), pad=(1,0)) along H as a dense
    banded matrix in the rows=(w,b), lanes=(h,c) layout.

    w_t: (Cin, Cout, K) taps.  Returns Wb with shape (h_in*Cin, 2*h_in*Cout):
      out[:, o*Cout+co] = sum_{i,ci} x[:, i*Cin+ci] * Wb[i*Cin+ci, o*Cout+co]
    where Wb[(i,ci),(o,co)] = w_t[ci, co, k] iff k = o - 2*i + 1 is in [0, K).
    """
    c_in, c_out, k = w_t.shape
    h_out = 2 * h_in
    i = jnp.arange(h_in)[:, None]
    o = jnp.arange(h_out)[None, :]
    tap = o - S * i + P                                           # kernel tap index
    valid = ((tap >= 0) & (tap < k)).astype(w_t.dtype)
    w_k = jnp.moveaxis(w_t, -1, 0)                                # (K, Cin, Cout)
    wg = w_k[jnp.clip(tap, 0, k - 1)] * valid[:, :, None, None]   # (h_in, h_out, Cin, Cout)
    return wg.transpose(0, 2, 1, 3).reshape(h_in * c_in, h_out * c_out)


def _put(slab, r0, arr):
    return slab.at[r0:r0 + arr.shape[0], :arr.shape[1]].set(arr)


def init_params(key):
    keys = iter(jax.random.split(key, 24))
    nrm = lambda shape, s=0.1: s * jax.random.normal(next(keys), shape, jnp.float32)
    unif = lambda shape: jax.random.uniform(next(keys), shape, jnp.float32, -0.1, 0.1)
    zeros = lambda shape: jnp.zeros(shape, jnp.float32)
    ones = lambda shape: jnp.ones(shape, jnp.float32)

    # ---- raw parameters (equivalent, self-consistent layouts) ----
    w1 = nrm((K, C1))                    # conv1: torch (C1, 1, K, 1) -> (K, C1)
    b1 = zeros((1, C1)); g1 = ones((1, C1)); be1 = zeros((1, C1))
    w2 = nrm((K, C1, C2))                # conv2 taps
    b2 = zeros((1, C2)); g2 = ones((1, C2)); be2 = zeros((1, C2))
    emb_enc = unif((cfg.NUM_GENRES, E))
    wmu_c = nrm((C2, L)); wmu_g = nrm((E, L)); bmu = zeros((1, L))
    wlv_c = nrm((C2, L)); wlv_g = nrm((E, L)); blv = zeros((1, L))

    emb_dec = unif((cfg.NUM_GENRES, E))
    w_in1 = nrm((H2 * L + E, G4))        # LSTM layer-1 input weight (z blocks + genre)
    b_lstm1 = zeros((1, G4))             # b_ih0 + b_hh0
    whh1 = nrm((HH, G4))
    w_l2 = nrm((2 * HH, G4))             # [W_ih1; W_hh1] merged
    b_lstm2 = zeros((1, G4))             # b_ih1 + b_hh1
    wfc = nrm((HH, H2 * L))              # fc_out, output lanes ordered (h2, l)
    bfc = zeros((1, H2 * L))
    dw1 = nrm((L, C2, K)); db1 = zeros((1, C2))    # ConvTranspose taps (Cin, Cout, K)
    dw2 = nrm((C2, C1, K)); db2 = zeros((1, C1))
    dw3 = nrm((C1, C0, K)); db3 = zeros((1, C0))

    # ---- merged / banded weights (built once, outside the per-call jit) ----
    w2m = w2.reshape(K * C1, C2)                                  # rows ordered (k, c1)
    wlat = jnp.concatenate([jnp.concatenate([wmu_c, wlv_c], axis=1),
                            jnp.concatenate([wmu_g, wlv_g], axis=1)], axis=0)
    blat = jnp.concatenate([bmu, blv], axis=1)
    wd1 = _banded_deconv(dw1, H2)                                 # (32, 128)
    wd2 = _banded_deconv(dw2, HD1)                                # (128, 128)
    wd3 = _banded_deconv(dw3, HD2)                                # (128, 32)
    bd1 = jnp.tile(db1, (1, HD1))                                 # (1, 128)
    bd2 = jnp.tile(db2, (1, HD2))                                 # (1, 128)
    bd3 = jnp.tile(db3, (1, HD3))                                 # (1, 32)

    # ---- pack into the two weight slabs ----
    slab_a = jnp.zeros((A_ROWS, 32), jnp.float32)
    slab_a = _put(slab_a, RA_W1, w1)
    slab_a = _put(slab_a, RA_BN1 + 0, b1)
    slab_a = _put(slab_a, RA_BN1 + 1, g1)
    slab_a = _put(slab_a, RA_BN1 + 2, be1)
    slab_a = _put(slab_a, RA_W2, w2m)
    slab_a = _put(slab_a, RA_BN2 + 0, b2)
    slab_a = _put(slab_a, RA_BN2 + 1, g2)
    slab_a = _put(slab_a, RA_BN2 + 2, be2)
    slab_a = _put(slab_a, RA_WLAT, wlat)
    slab_a = _put(slab_a, RA_BLAT, blat)
    slab_a = _put(slab_a, RA_WFC, wfc)
    slab_a = _put(slab_a, RA_BFC, bfc)
    slab_a = _put(slab_a, RA_WD3, wd3)
    slab_a = _put(slab_a, RA_BD3, bd3)

    slab_b = jnp.zeros((B_ROWS, 128), jnp.float32)
    slab_b = _put(slab_b, RB_WIN1, w_in1)
    slab_b = _put(slab_b, RB_WHH1, whh1)
    slab_b = _put(slab_b, RB_WL2, w_l2)
    slab_b = _put(slab_b, RB_B1, b_lstm1)
    slab_b = _put(slab_b, RB_B2, b_lstm2)
    slab_b = _put(slab_b, RB_WD1, wd1)
    slab_b = _put(slab_b, RB_WD2, wd2)
    slab_b = _put(slab_b, RB_BD1, bd1)
    slab_b = _put(slab_b, RB_BD2, bd2)

    return {"slab_a": slab_a, "slab_b": slab_b,
            "emb_enc": emb_enc, "emb_dec": emb_dec}


# ----------------------------- forward ----------------------------------------
@jax.jit
def vae_forward(params, x, genre, eps_key):
    """x: (B, C0, H0, W) NCHW, genre: (B,) int32 -> (recon, mu, logvar)."""
    # ---- one-time host-side activation prep (tiny), packed into ONE slab ----
    # conv1 im2col patches with rows ordered (parity, j, w, b)
    xp = jnp.pad(x[:, 0, :, :], ((0, 0), (P, P), (0, 0)))             # (B, H0+2P, W)
    h1_order = jnp.arange(H1).reshape(H1 // 2, 2).T.reshape(-1)       # [0,2,..,1,3,..]
    gidx = h1_order[:, None] * S + jnp.arange(K)[None, :]             # (H1, K)
    patches = xp[:, gidx, :]                                          # (B, H1, K, W)
    p1 = patches.transpose(1, 3, 0, 2).reshape(H1 * W * B, K)         # rows (p, j, w, b)
    p1 = jnp.pad(p1, ((0, 0), (0, 8 - K)))                            # lane-pad to slab width

    ge = params["emb_enc"][genre]                                     # (B, E)
    ge_rows = jnp.broadcast_to(ge[None, None, :, :],
                               (H2, W, B, E)).reshape(H2 * R, E)
    gd = params["emb_dec"][genre]
    gd_rows = jnp.broadcast_to(gd[None, :, :], (T, B, E)).reshape(T * B, E)
    eps = jax.random.normal(eps_key, (H2 * R, L), jnp.float32)
    act = jnp.concatenate([p1, ge_rows, eps, gd_rows], axis=0)        # (272, 8)

    lat, rec = _fused_vae_call(act, params["slab_a"], params["slab_b"])

    # ---- host-side output re-layout back to NCHW (free plumbing) ----
    latr = lat.reshape(H2, W, B, 2, L)
    mu = latr[:, :, :, 0, :].transpose(2, 3, 0, 1)                    # (B, L, H2, W)
    logvar = latr[:, :, :, 1, :].transpose(2, 3, 0, 1)
    recon = rec.reshape(W, B, HD3).transpose(1, 2, 0)[:, None, :, :]  # (B, C0, 32, W)
    return recon, mu, logvar


# ----------------------------- main --------------------------------------------
if __name__ == "__main__":
    key = jax.random.PRNGKey(0)
    kp, kx, kg, ke = jax.random.split(key, 4)
    params = init_params(kp)

    x = jax.random.normal(kx, (B, C0, H0, W), jnp.float32)
    genre = jax.random.randint(kg, (B,), 0, cfg.NUM_GENRES)

    recon, mu, logvar = vae_forward(params, x, genre, ke)
    jax.block_until_ready((recon, mu, logvar))

    assert mu.shape == (B, L, H2, W), mu.shape
    assert logvar.shape == mu.shape
    assert recon.shape == (B, C0, 8 * H2, W), recon.shape
    assert bool(jnp.all(jnp.isfinite(mu))) and bool(jnp.all(jnp.isfinite(logvar)))
    assert bool(jnp.all(jnp.isfinite(recon)))
    assert bool(jnp.all(jnp.abs(recon) <= 1.0))
    print("KERNEL_OK")
</pallas_src>

<mosaic_0001>
module attributes {stable_mosaic.version = 11 : i64} {
  func.func @_vae_kernel(%arg0: memref<272x8xf32, #tpu.memory_space<vmem>>, %arg1: memref<264x32xf32, #tpu.memory_space<vmem>>, %arg2: memref<312x128xf32, #tpu.memory_space<vmem>>, %arg3: memref<64x16xf32, #tpu.memory_space<vmem>>, %arg4: memref<16x32xf32, #tpu.memory_space<vmem>>, %arg5: memref<16x32xf32, #tpu.memory_space<vmem>>) attributes {dimension_semantics = [], scalar_prefetch = 0 : i64, scratch_operands = 1 : i64, tpu.core_type = #tpu.core_type<tc>} {
    %c0 = arith.constant 0 : index
    %c0_0 = arith.constant 0 : index
    %0 = vector.load %arg0[%c0, %c0_0] : memref<272x8xf32, #tpu.memory_space<vmem>>, vector<128x8xf32>
    %c0_1 = arith.constant 0 : index
    %c0_2 = arith.constant 0 : index
    %1 = vector.load %arg1[%c0_1, %c0_2] : memref<264x32xf32, #tpu.memory_space<vmem>>, vector<8x32xf32>
    %2 = vector.extract_strided_slice %1 {offsets = [0, 0], sizes = [8, 8], strides = [1, 1]} : vector<8x32xf32> to vector<8x8xf32>
    %c8 = arith.constant 8 : index
    %c0_3 = arith.constant 0 : index
    %3 = vector.load %arg1[%c8, %c0_3] : memref<264x32xf32, #tpu.memory_space<vmem>>, vector<1x32xf32>
    %4 = vector.extract_strided_slice %3 {offsets = [0, 0], sizes = [1, 8], strides = [1, 1]} : vector<1x32xf32> to vector<1x8xf32>
    %c9 = arith.constant 9 : index
    %c0_4 = arith.constant 0 : index
    %5 = vector.load %arg1[%c9, %c0_4] : memref<264x32xf32, #tpu.memory_space<vmem>>, vector<1x32xf32>
    %6 = vector.extract_strided_slice %5 {offsets = [0, 0], sizes = [1, 8], strides = [1, 1]} : vector<1x32xf32> to vector<1x8xf32>
    %c10 = arith.constant 10 : index
    %c0_5 = arith.constant 0 : index
    %7 = vector.load %arg1[%c10, %c0_5] : memref<264x32xf32, #tpu.memory_space<vmem>>, vector<1x32xf32>
    %8 = vector.extract_strided_slice %7 {offsets = [0, 0], sizes = [1, 8], strides = [1, 1]} : vector<1x32xf32> to vector<1x8xf32>
    %cst = arith.constant dense<0.000000e+00> : vector<128x8xf32>
    %9 = tpu.matmul %0, %2, %cst {dimension_numbers = #tpu.dot_dimension_numbers<[1], [0], [0], [1], [0, 0, 1, 1], [], []>} : vector<128x8xf32>, vector<8x8xf32>, vector<128x8xf32> -> vector<128x8xf32>
    %10 = vector.broadcast %4 : vector<1x8xf32> to vector<128x8xf32>
    %11 = arith.addf %9, %10 : vector<128x8xf32>
    %cst_6 = arith.constant dense<0.000000e+00> : vector<8xf32>
    %12 = vector.multi_reduction <add>, %11, %cst_6 [0] : vector<128x8xf32> to vector<8xf32>
    %13 = vector.shape_cast %12 : vector<8xf32> to vector<1x8xf32>
    %cst_7 = arith.constant 1.280000e+02 : f32
    %14 = vector.broadcast %cst_7 : f32 to vector<1x8xf32>
    %15 = arith.divf %13, %14 : vector<1x8xf32>
    %16 = arith.mulf %11, %11 : vector<128x8xf32>
    %cst_8 = arith.constant dense<0.000000e+00> : vector<8xf32>
    %17 = vector.multi_reduction <add>, %16, %cst_8 [0] : vector<128x8xf32> to vector<8xf32>
    %18 = vector.shape_cast %17 : vector<8xf32> to vector<1x8xf32>
    %cst_9 = arith.constant 1.280000e+02 : f32
    %19 = vector.broadcast %cst_9 : f32 to vector<1x8xf32>
    %20 = arith.divf %18, %19 : vector<1x8xf32>
    %21 = arith.mulf %15, %15 : vector<1x8xf32>
    %22 = arith.subf %20, %21 : vector<1x8xf32>
    %cst_10 = arith.constant 0.000000e+00 : f32
    %23 = vector.broadcast %cst_10 : f32 to vector<1x8xf32>
    %24 = arith.maximumf %22, %23 : vector<1x8xf32>
    %25 = vector.broadcast %15 : vector<1x8xf32> to vector<128x8xf32>
    %26 = arith.subf %11, %25 : vector<128x8xf32>
    %cst_11 = arith.constant 9.99999974E-6 : f32
    %27 = vector.broadcast %cst_11 : f32 to vector<1x8xf32>
    %28 = arith.addf %24, %27 : vector<1x8xf32>
    %29 = math.rsqrt %28 : vector<1x8xf32>
    %30 = vector.broadcast %29 : vector<1x8xf32> to vector<128x8xf32>
    %31 = arith.mulf %26, %30 : vector<128x8xf32>
    %32 = vector.broadcast %6 : vector<1x8xf32> to vector<128x8xf32>
    %33 = arith.mulf %31, %32 : vector<128x8xf32>
    %34 = vector.broadcast %8 : vector<1x8xf32> to vector<128x8xf32>
    %35 = arith.addf %33, %34 : vector<128x8xf32>
    %cst_12 = arith.constant 0.000000e+00 : f32
    %36 = vector.broadcast %cst_12 : f32 to vector<128x8xf32>
    %37 = arith.maximumf %35, %36 : vector<128x8xf32>
    %38 = vector.extract_strided_slice %37 {offsets = [0, 0], sizes = [64, 8], strides = [1, 1]} : vector<128x8xf32> to vector<64x8xf32>
    %39 = vector.extract_strided_slice %37 {offsets = [64, 0], sizes = [64, 8], strides = [1, 1]} : vector<128x8xf32> to vector<64x8xf32>
    %cst_13 = arith.constant 0.000000e+00 : f32
    %40 = vector.broadcast %cst_13 : f32 to vector<16x8xf32>
    %41 = vector.extract_strided_slice %39 {offsets = [0, 0], sizes = [48, 8], strides = [1, 1]} : vector<64x8xf32> to vector<48x8xf32>
    %42 = tpu.concatenate %40, %41 in 0 : vector<16x8xf32>, vector<48x8xf32> -> vector<64x8xf32>
    %43 = vector.extract_strided_slice %38 {offsets = [16, 0], sizes = [48, 8], strides = [1, 1]} : vector<64x8xf32> to vector<48x8xf32>
    %cst_14 = arith.constant 0.000000e+00 : f32
    %44 = vector.broadcast %cst_14 : f32 to vector<16x8xf32>
    %45 = tpu.concatenate %43, %44 in 0 : vector<48x8xf32>, vector<16x8xf32> -> vector<64x8xf32>
    %46 = tpu.concatenate %42, %38, %39, %45 in 1 : vector<64x8xf32>, vector<64x8xf32>, vector<64x8xf32>, vector<64x8xf32> -> vector<64x32xf32>
    %c16 = arith.constant 16 : index
    %c0_15 = arith.constant 0 : index
    %47 = vector.load %arg1[%c16, %c0_15] : memref<264x32xf32, #tpu.memory_space<vmem>>, vector<32x32xf32>
    %48 = vector.extract_strided_slice %47 {offsets = [0, 0], sizes = [32, 16], strides = [1, 1]} : vector<32x32xf32> to vector<32x16xf32>
    %c48 = arith.constant 48 : index
    %c0_16 = arith.constant 0 : index
    %49 = vector.load %arg1[%c48, %c0_16] : memref<264x32xf32, #tpu.memory_space<vmem>>, vector<1x32xf32>
    %50 = vector.extract_strided_slice %49 {offsets = [0, 0], sizes = [1, 16], strides = [1, 1]} : vector<1x32xf32> to vector<1x16xf32>
    %c49 = arith.constant 49 : index
    %c0_17 = arith.constant 0 : index
    %51 = vector.load %arg1[%c49, %c0_17] : memref<264x32xf32, #tpu.memory_space<vmem>>, vector<1x32xf32>
    %52 = vector.extract_strided_slice %51 {offsets = [0, 0], sizes = [1, 16], strides = [1, 1]} : vector<1x32xf32> to vector<1x16xf32>
    %c50 = arith.constant 50 : index
    %c0_18 = arith.constant 0 : index
    %53 = vector.load %arg1[%c50, %c0_18] : memref<264x32xf32, #tpu.memory_space<vmem>>, vector<1x32xf32>
    %54 = vector.extract_strided_slice %53 {offsets = [0, 0], sizes = [1, 16], strides = [1, 1]} : vector<1x32xf32> to vector<1x16xf32>
    %cst_19 = arith.constant dense<0.000000e+00> : vector<64x16xf32>
    %55 = tpu.matmul %46, %48, %cst_19 {dimension_numbers = #tpu.dot_dimension_numbers<[1], [0], [0], [1], [0, 0, 1, 1], [], []>} : vector<64x32xf32>, vector<32x16xf32>, vector<64x16xf32> -> vector<64x16xf32>
    %56 = vector.broadcast %50 : vector<1x16xf32> to vector<64x16xf32>
    %57 = arith.addf %55, %56 : vector<64x16xf32>
    %cst_20 = arith.constant dense<0.000000e+00> : vector<16xf32>
    %58 = vector.multi_reduction <add>, %57, %cst_20 [0] : vector<64x16xf32> to vector<16xf32>
    %59 = vector.shape_cast %58 : vector<16xf32> to vector<1x16xf32>
    %cst_21 = arith.constant 6.400000e+01 : f32
    %60 = vector.broadcast %cst_21 : f32 to vector<1x16xf32>
    %61 = arith.divf %59, %60 : vector<1x16xf32>
    %62 = arith.mulf %57, %57 : vector<64x16xf32>
    %cst_22 = arith.constant dense<0.000000e+00> : vector<16xf32>
    %63 = vector.multi_reduction <add>, %62, %cst_22 [0] : vector<64x16xf32> to vector<16xf32>
    %64 = vector.shape_cast %63 : vector<16xf32> to vector<1x16xf32>
    %cst_23 = arith.constant 6.400000e+01 : f32
    %65 = vector.broadcast %cst_23 : f32 to vector<1x16xf32>
    %66 = arith.divf %64, %65 : vector<1x16xf32>
    %67 = arith.mulf %61, %61 : vector<1x16xf32>
    %68 = arith.subf %66, %67 : vector<1x16xf32>
    %cst_24 = arith.constant 0.000000e+00 : f32
    %69 = vector.broadcast %cst_24 : f32 to vector<1x16xf32>
    %70 = arith.maximumf %68, %69 : vector<1x16xf32>
    %71 = vector.broadcast %61 : vector<1x16xf32> to vector<64x16xf32>
    %72 = arith.subf %57, %71 : vector<64x16xf32>
    %cst_25 = arith.constant 9.99999974E-6 : f32
    %73 = vector.broadcast %cst_25 : f32 to vector<1x16xf32>
    %74 = arith.addf %70, %73 : vector<1x16xf32>
    %75 = math.rsqrt %74 : vector<1x16xf32>
    %76 = vector.broadcast %75 : vector<1x16xf32> to vector<64x16xf32>
    %77 = arith.mulf %72, %76 : vector<64x16xf32>
    %78 = vector.broadcast %52 : vector<1x16xf32> to vector<64x16xf32>
    %79 = arith.mulf %77, %78 : vector<64x16xf32>
    %80 = vector.broadcast %54 : vector<1x16xf32> to vector<64x16xf32>
    %81 = arith.addf %79, %80 : vector<64x16xf32>
    %cst_26 = arith.constant 0.000000e+00 : f32
    %82 = vector.broadcast %cst_26 : f32 to vector<64x16xf32>
    %83 = arith.maximumf %81, %82 : vector<64x16xf32>
    %c128 = arith.constant 128 : index
    %c0_27 = arith.constant 0 : index
    %84 = vector.load %arg0[%c128, %c0_27] : memref<272x8xf32, #tpu.memory_space<vmem>>, vector<64x8xf32>
    %85 = tpu.concatenate %83, %84 in 1 : vector<64x16xf32>, vector<64x8xf32> -> vector<64x24xf32>
    %c56 = arith.constant 56 : index
    %c0_28 = arith.constant 0 : index
    %86 = vector.load %arg1[%c56, %c0_28] : memref<264x32xf32, #tpu.memory_space<vmem>>, vector<24x32xf32>
    %87 = vector.extract_strided_slice %86 {offsets = [0, 0], sizes = [24, 16], strides = [1, 1]} : vector<24x32xf32> to vector<24x16xf32>
    %c80 = arith.constant 80 : index
    %c0_29 = arith.constant 0 : index
    %88 = vector.load %arg1[%c80, %c0_29] : memref<264x32xf32, #tpu.memory_space<vmem>>, vector<1x32xf32>
    %89 = vector.extract_strided_slice %88 {offsets = [0, 0], sizes = [1, 16], strides = [1, 1]} : vector<1x32xf32> to vector<1x16xf32>
    %cst_30 = arith.constant dense<0.000000e+00> : vector<64x16xf32>
    %90 = tpu.matmul %85, %87, %cst_30 {dimension_numbers = #tpu.dot_dimension_numbers<[1], [0], [0], [1], [0, 0, 1, 1], [], []>} : vector<64x24xf32>, vector<24x16xf32>, vector<64x16xf32> -> vector<64x16xf32>
    %91 = vector.broadcast %89 : vector<1x16xf32> to vector<64x16xf32>
    %92 = arith.addf %90, %91 : vector<64x16xf32>
    %c0_31 = arith.constant 0 : index
    %c0_32 = arith.constant 0 : index
    %93 = vector.load %arg3[%c0_31, %c0_32] : memref<64x16xf32, #tpu.memory_space<vmem>>, vector<64x16xf32>
    tpu.vector_store %arg3[%c0_31, %c0_32], %92 {strides = array<i32>} : memref<64x16xf32, #tpu.memory_space<vmem>>, vector<64x16xf32>,
    %c192 = arith.constant 192 : index
    %c0_33 = arith.constant 0 : index
    %94 = vector.load %arg0[%c192, %c0_33] : memref<272x8xf32, #tpu.memory_space<vmem>>, vector<64x8xf32>
    %95 = vector.extract_strided_slice %92 {offsets = [0, 0], sizes = [64, 8], strides = [1, 1]} : vector<64x16xf32> to vector<64x8xf32>
    %96 = vector.extract_strided_slice %92 {offsets = [0, 8], sizes = [64, 8], strides = [1, 1]} : vector<64x16xf32> to vector<64x8xf32>
    %cst_34 = arith.constant 5.000000e-01 : f32
    %97 = vector.broadcast %cst_34 : f32 to vector<64x8xf32>
    %98 = arith.mulf %97, %96 : vector<64x8xf32>
    %99 = math.exp %98 : vector<64x8xf32>
    %100 = arith.mulf %94, %99 : vector<64x8xf32>
    %101 = arith.addf %95, %100 : vector<64x8xf32>
    %c256 = arith.constant 256 : index
    %c0_35 = arith.constant 0 : index
    %102 = vector.load %arg0[%c256, %c0_35] : memref<272x8xf32, #tpu.memory_space<vmem>>, vector<16x8xf32>
    %103 = vector.extract_strided_slice %101 {offsets = [0, 0], sizes = [16, 8], strides = [1, 1]} : vector<64x8xf32> to vector<16x8xf32>
    %104 = vector.extract_strided_slice %101 {offsets = [16, 0], sizes = [16, 8], strides = [1, 1]} : vector<64x8xf32> to vector<16x8xf32>
    %105 = vector.extract_strided_slice %101 {offsets = [32, 0], sizes = [16, 8], strides = [1, 1]} : vector<64x8xf32> to vector<16x8xf32>
    %106 = vector.extract_strided_slice %101 {offsets = [48, 0], sizes = [16, 8], strides = [1, 1]} : vector<64x8xf32> to vector<16x8xf32>
    %107 = tpu.concatenate %103, %104, %105, %106, %102 in 1 : vector<16x8xf32>, vector<16x8xf32>, vector<16x8xf32>, vector<16x8xf32>, vector<16x8xf32> -> vector<16x40xf32>
    %c0_36 = arith.constant 0 : index
    %c0_37 = arith.constant 0 : index
    %108 = vector.load %arg2[%c0_36, %c0_37] : memref<312x128xf32, #tpu.memory_space<vmem>>, vector<40x128xf32>
    %c136 = arith.constant 136 : index
    %c0_38 = arith.constant 0 : index
    %109 = vector.load %arg2[%c136, %c0_38] : memref<312x128xf32, #tpu.memory_space<vmem>>, vector<1x128xf32>
    %cst_39 = arith.constant dense<0.000000e+00> : vector<16x128xf32>
    %110 = tpu.matmul %107, %108, %cst_39 {dimension_numbers = #tpu.dot_dimension_numbers<[1], [0], [0], [1], [0, 0, 1, 1], [], []>} : vector<16x40xf32>, vector<40x128xf32>, vector<16x128xf32> -> vector<16x128xf32>
    %111 = vector.broadcast %109 : vector<1x128xf32> to vector<16x128xf32>
    %112 = arith.addf %110, %111 : vector<16x128xf32>
    %c40 = arith.constant 40 : index
    %c0_40 = arith.constant 0 : index
    %113 = vector.load %arg2[%c40, %c0_40] : memref<312x128xf32, #tpu.memory_space<vmem>>, vector<32x128xf32>
    %c72 = arith.constant 72 : index
    %c0_41 = arith.constant 0 : index
    %114 = vector.load %arg2[%c72, %c0_41] : memref<312x128xf32, #tpu.memory_space<vmem>>, vector<64x128xf32>
    %c137 = arith.constant 137 : index
    %c0_42 = arith.constant 0 : index
    %115 = vector.load %arg2[%c137, %c0_42] : memref<312x128xf32, #tpu.memory_space<vmem>>, vector<1x128xf32>
    %cst_43 = arith.constant 0.000000e+00 : f32
    %116 = vector.broadcast %cst_43 : f32 to vector<2x32xf32>
    %cst_44 = arith.constant 0.000000e+00 : f32
    %117 = vector.broadcast %cst_44 : f32 to vector<2x32xf32>
    %cst_45 = arith.constant 0.000000e+00 : f32
    %118 = vector.broadcast %cst_45 : f32 to vector<2x32xf32>
    %cst_46 = arith.constant 0.000000e+00 : f32
    %119 = vector.broadcast %cst_46 : f32 to vector<2x32xf32>
    %120 = vector.extract_strided_slice %112 {offsets = [0, 0], sizes = [2, 128], strides = [1, 1]} : vector<16x128xf32> to vector<2x128xf32>
    %cst_47 = arith.constant dense<0.000000e+00> : vector<2x128xf32>
    %121 = tpu.matmul %116, %113, %cst_47 {dimension_numbers = #tpu.dot_dimension_numbers<[1], [0], [0], [1], [0, 0, 1, 1], [], []>} : vector<2x32xf32>, vector<32x128xf32>, vector<2x128xf32> -> vector<2x128xf32>
    %122 = arith.addf %120, %121 : vector<2x128xf32>
    %123 = vector.extract_strided_slice %122 {offsets = [0, 0], sizes = [2, 32], strides = [1, 1]} : vector<2x128xf32> to vector<2x32xf32>
    %124 = arith.negf %123 : vector<2x32xf32>
    %125 = math.exp %124 : vector<2x32xf32>
    %cst_48 = arith.constant 1.000000e+00 : f32
    %126 = vector.broadcast %cst_48 : f32 to vector<2x32xf32>
    %127 = arith.addf %126, %125 : vector<2x32xf32>
    %128 = arith.divf %126, %127 : vector<2x32xf32>
    %129 = vector.extract_strided_slice %122 {offsets = [0, 32], sizes = [2, 32], strides = [1, 1]} : vector<2x128xf32> to vector<2x32xf32>
    %130 = arith.negf %129 : vector<2x32xf32>
    %131 = math.exp %130 : vector<2x32xf32>
    %cst_49 = arith.constant 1.000000e+00 : f32
    %132 = vector.broadcast %cst_49 : f32 to vector<2x32xf32>
    %133 = arith.addf %132, %131 : vector<2x32xf32>
    %134 = arith.divf %132, %133 : vector<2x32xf32>
    %135 = vector.extract_strided_slice %122 {offsets = [0, 64], sizes = [2, 32], strides = [1, 1]} : vector<2x128xf32> to vector<2x32xf32>
    %136 = math.tanh %135 : vector<2x32xf32>
    %137 = vector.extract_strided_slice %122 {offsets = [0, 96], sizes = [2, 32], strides = [1, 1]} : vector<2x128xf32> to vector<2x32xf32>
    %138 = arith.negf %137 : vector<2x32xf32>
    %139 = math.exp %138 : vector<2x32xf32>
    %cst_50 = arith.constant 1.000000e+00 : f32
    %140 = vector.broadcast %cst_50 : f32 to vector<2x32xf32>
    %141 = arith.addf %140, %139 : vector<2x32xf32>
    %142 = arith.divf %140, %141 : vector<2x32xf32>
    %143 = arith.mulf %134, %117 : vector<2x32xf32>
    %144 = arith.mulf %128, %136 : vector<2x32xf32>
    %145 = arith.addf %143, %144 : vector<2x32xf32>
    %146 = math.tanh %145 : vector<2x32xf32>
    %147 = arith.mulf %142, %146 : vector<2x32xf32>
    %148 = tpu.concatenate %147, %118 in 1 : vector<2x32xf32>, vector<2x32xf32> -> vector<2x64xf32>
    %cst_51 = arith.constant dense<0.000000e+00> : vector<2x128xf32>
    %149 = tpu.matmul %148, %114, %cst_51 {dimension_numbers = #tpu.dot_dimension_numbers<[1], [0], [0], [1], [0, 0, 1, 1], [], []>} : vector<2x64xf32>, vector<64x128xf32>, vector<2x128xf32> -> vector<2x128xf32>
    %150 = vector.broadcast %115 : vector<1x128xf32> to vector<2x128xf32>
    %151 = arith.addf %149, %150 : vector<2x128xf32>
    %152 = vector.extract_strided_slice %151 {offsets = [0, 0], sizes = [2, 32], strides = [1, 1]} : vector<2x128xf32> to vector<2x32xf32>
    %153 = arith.negf %152 : vector<2x32xf32>
    %154 = math.exp %153 : vector<2x32xf32>
    %cst_52 = arith.constant 1.000000e+00 : f32
    %155 = vector.broadcast %cst_52 : f32 to vector<2x32xf32>
    %156 = arith.addf %155, %154 : vector<2x32xf32>
    %157 = arith.divf %155, %156 : vector<2x32xf32>
    %158 = vector.extract_strided_slice %151 {offsets = [0, 32], sizes = [2, 32], strides = [1, 1]} : vector<2x128xf32> to vector<2x32xf32>
    %159 = arith.negf %158 : vector<2x32xf32>
    %160 = math.exp %159 : vector<2x32xf32>
    %cst_53 = arith.constant 1.000000e+00 : f32
    %161 = vector.broadcast %cst_53 : f32 to vector<2x32xf32>
    %162 = arith.addf %161, %160 : vector<2x32xf32>
    %163 = arith.divf %161, %162 : vector<2x32xf32>
    %164 = vector.extract_strided_slice %151 {offsets = [0, 64], sizes = [2, 32], strides = [1, 1]} : vector<2x128xf32> to vector<2x32xf32>
    %165 = math.tanh %164 : vector<2x32xf32>
    %166 = vector.extract_strided_slice %151 {offsets = [0, 96], sizes = [2, 32], strides = [1, 1]} : vector<2x128xf32> to vector<2x32xf32>
    %167 = arith.negf %166 : vector<2x32xf32>
    %168 = math.exp %167 : vector<2x32xf32>
    %cst_54 = arith.constant 1.000000e+00 : f32
    %169 = vector.broadcast %cst_54 : f32 to vector<2x32xf32>
    %170 = arith.addf %169, %168 : vector<2x32xf32>
    %171 = arith.divf %169, %170 : vector<2x32xf32>
    %172 = arith.mulf %163, %119 : vector<2x32xf32>
    %173 = arith.mulf %157, %165 : vector<2x32xf32>
    %174 = arith.addf %172, %173 : vector<2x32xf32>
    %175 = math.tanh %174 : vector<2x32xf32>
    %176 = arith.mulf %171, %175 : vector<2x32xf32>
    %c0_55 = arith.constant 0 : index
    %c0_56 = arith.constant 0 : index
    %177 = vector.load %arg5[%c0_55, %c0_56] : memref<16x32xf32, #tpu.memory_space<vmem>>, vector<2x32xf32>
    tpu.vector_store %arg5[%c0_55, %c0_56], %176 {strides = array<i32>} : memref<16x32xf32, #tpu.memory_space<vmem>>, vector<2x32xf32>,
    %178 = vector.extract_strided_slice %112 {offsets = [2, 0], sizes = [2, 128], strides = [1, 1]} : vector<16x128xf32> to vector<2x128xf32>
    %cst_57 = arith.constant dense<0.000000e+00> : vector<2x128xf32>
    %179 = tpu.matmul %147, %113, %cst_57 {dimension_numbers = #tpu.dot_dimension_numbers<[1], [0], [0], [1], [0, 0, 1, 1], [], []>} : vector<2x32xf32>, vector<32x128xf32>, vector<2x128xf32> -> vector<2x128xf32>
    %180 = arith.addf %178, %179 : vector<2x128xf32>
    %181 = vector.extract_strided_slice %180 {offsets = [0, 0], sizes = [2, 32], strides = [1, 1]} : vector<2x128xf32> to vector<2x32xf32>
    %182 = arith.negf %181 : vector<2x32xf32>
    %183 = math.exp %182 : vector<2x32xf32>
    %cst_58 = arith.constant 1.000000e+00 : f32
    %184 = vector.broadcast %cst_58 : f32 to vector<2x32xf32>
    %185 = arith.addf %184, %183 : vector<2x32xf32>
    %186 = arith.divf %184, %185 : vector<2x32xf32>
    %187 = vector.extract_strided_slice %180 {offsets = [0, 32], sizes = [2, 32], strides = [1, 1]} : vector<2x128xf32> to vector<2x32xf32>
    %188 = arith.negf %187 : vector<2x32xf32>
    %189 = math.exp %188 : vector<2x32xf32>
    %cst_59 = arith.constant 1.000000e+00 : f32
    %190 = vector.broadcast %cst_59 : f32 to vector<2x32xf32>
    %191 = arith.addf %190, %189 : vector<2x32xf32>
    %192 = arith.divf %190, %191 : vector<2x32xf32>
    %193 = vector.extract_strided_slice %180 {offsets = [0, 64], sizes = [2, 32], strides = [1, 1]} : vector<2x128xf32> to vector<2x32xf32>
    %194 = math.tanh %193 : vector<2x32xf32>
    %195 = vector.extract_strided_slice %180 {offsets = [0, 96], sizes = [2, 32], strides = [1, 1]} : vector<2x128xf32> to vector<2x32xf32>
    %196 = arith.negf %195 : vector<2x32xf32>
    %197 = math.exp %196 : vector<2x32xf32>
    %cst_60 = arith.constant 1.000000e+00 : f32
    %198 = vector.broadcast %cst_60 : f32 to vector<2x32xf32>
    %199 = arith.addf %198, %197 : vector<2x32xf32>
    %200 = arith.divf %198, %199 : vector<2x32xf32>
    %201 = arith.mulf %192, %145 : vector<2x32xf32>
    %202 = arith.mulf %186, %194 : vector<2x32xf32>
    %203 = arith.addf %201, %202 : vector<2x32xf32>
    %204 = math.tanh %203 : vector<2x32xf32>
    %205 = arith.mulf %200, %204 : vector<2x32xf32>
    %206 = tpu.concatenate %205, %176 in 1 : vector<2x32xf32>, vector<2x32xf32> -> vector<2x64xf32>
    %cst_61 = arith.constant dense<0.000000e+00> : vector<2x128xf32>
    %207 = tpu.matmul %206, %114, %cst_61 {dimension_numbers = #tpu.dot_dimension_numbers<[1], [0], [0], [1], [0, 0, 1, 1], [], []>} : vector<2x64xf32>, vector<64x128xf32>, vector<2x128xf32> -> vector<2x128xf32>
    %208 = vector.broadcast %115 : vector<1x128xf32> to vector<2x128xf32>
    %209 = arith.addf %207, %208 : vector<2x128xf32>
    %210 = vector.extract_strided_slice %209 {offsets = [0, 0], sizes = [2, 32], strides = [1, 1]} : vector<2x128xf32> to vector<2x32xf32>
    %211 = arith.negf %210 : vector<2x32xf32>
    %212 = math.exp %211 : vector<2x32xf32>
    %cst_62 = arith.constant 1.000000e+00 : f32
    %213 = vector.broadcast %cst_62 : f32 to vector<2x32xf32>
    %214 = arith.addf %213, %212 : vector<2x32xf32>
    %215 = arith.divf %213, %214 : vector<2x32xf32>
    %216 = vector.extract_strided_slice %209 {offsets = [0, 32], sizes = [2, 32], strides = [1, 1]} : vector<2x128xf32> to vector<2x32xf32>
    %217 = arith.negf %216 : vector<2x32xf32>
    %218 = math.exp %217 : vector<2x32xf32>
    %cst_63 = arith.constant 1.000000e+00 : f32
    %219 = vector.broadcast %cst_63 : f32 to vector<2x32xf32>
    %220 = arith.addf %219, %218 : vector<2x32xf32>
    %221 = arith.divf %219, %220 : vector<2x32xf32>
    %222 = vector.extract_strided_slice %209 {offsets = [0, 64], sizes = [2, 32], strides = [1, 1]} : vector<2x128xf32> to vector<2x32xf32>
    %223 = math.tanh %222 : vector<2x32xf32>
    %224 = vector.extract_strided_slice %209 {offsets = [0, 96], sizes = [2, 32], strides = [1, 1]} : vector<2x128xf32> to vector<2x32xf32>
    %225 = arith.negf %224 : vector<2x32xf32>
    %226 = math.exp %225 : vector<2x32xf32>
    %cst_64 = arith.constant 1.000000e+00 : f32
    %227 = vector.broadcast %cst_64 : f32 to vector<2x32xf32>
    %228 = arith.addf %227, %226 : vector<2x32xf32>
    %229 = arith.divf %227, %228 : vector<2x32xf32>
    %230 = arith.mulf %221, %174 : vector<2x32xf32>
    %231 = arith.mulf %215, %223 : vector<2x32xf32>
    %232 = arith.addf %230, %231 : vector<2x32xf32>
    %233 = math.tanh %232 : vector<2x32xf32>
    %234 = arith.mulf %229, %233 : vector<2x32xf32>
    %c2 = arith.constant 2 : index
    %c0_65 = arith.constant 0 : index
    %235 = vector.load %arg5[%c2, %c0_65] : memref<16x32xf32, #tpu.memory_space<vmem>>, vector<2x32xf32>
    tpu.vector_store %arg5[%c2, %c0_65], %234 {strides = array<i32>} : memref<16x32xf32, #tpu.memory_space<vmem>>, vector<2x32xf32>,
    %236 = vector.extract_strided_slice %112 {offsets = [4, 0], sizes = [2, 128], strides = [1, 1]} : vector<16x128xf32> to vector<2x128xf32>
    %cst_66 = arith.constant dense<0.000000e+00> : vector<2x128xf32>
    %237 = tpu.matmul %205, %113, %cst_66 {dimension_numbers = #tpu.dot_dimension_numbers<[1], [0], [0], [1], [0, 0, 1, 1], [], []>} : vector<2x32xf32>, vector<32x128xf32>, vector<2x128xf32> -> vector<2x128xf32>
    %238 = arith.addf %236, %237 : vector<2x128xf32>
    %239 = vector.extract_strided_slice %238 {offsets = [0, 0], sizes = [2, 32], strides = [1, 1]} : vector<2x128xf32> to vector<2x32xf32>
    %240 = arith.negf %239 : vector<2x32xf32>
    %241 = math.exp %240 : vector<2x32xf32>
    %cst_67 = arith.constant 1.000000e+00 : f32
    %242 = vector.broadcast %cst_67 : f32 to vector<2x32xf32>
    %243 = arith.addf %242, %241 : vector<2x32xf32>
    %244 = arith.divf %242, %243 : vector<2x32xf32>
    %245 = vector.extract_strided_slice %238 {offsets = [0, 32], sizes = [2, 32], strides = [1, 1]} : vector<2x128xf32> to vector<2x32xf32>
    %246 = arith.negf %245 : vector<2x32xf32>
    %247 = math.exp %246 : vector<2x32xf32>
    %cst_68 = arith.constant 1.000000e+00 : f32
    %248 = vector.broadcast %cst_68 : f32 to vector<2x32xf32>
    %249 = arith.addf %248, %247 : vector<2x32xf32>
    %250 = arith.divf %248, %249 : vector<2x32xf32>
    %251 = vector.extract_strided_slice %238 {offsets = [0, 64], sizes = [2, 32], strides = [1, 1]} : vector<2x128xf32> to vector<2x32xf32>
    %252 = math.tanh %251 : vector<2x32xf32>
    %253 = vector.extract_strided_slice %238 {offsets = [0, 96], sizes = [2, 32], strides = [1, 1]} : vector<2x128xf32> to vector<2x32xf32>
    %254 = arith.negf %253 : vector<2x32xf32>
    %255 = math.exp %254 : vector<2x32xf32>
    %cst_69 = arith.constant 1.000000e+00 : f32
    %256 = vector.broadcast %cst_69 : f32 to vector<2x32xf32>
    %257 = arith.addf %256, %255 : vector<2x32xf32>
    %258 = arith.divf %256, %257 : vector<2x32xf32>
    %259 = arith.mulf %250, %203 : vector<2x32xf32>
    %260 = arith.mulf %244, %252 : vector<2x32xf32>
    %261 = arith.addf %259, %260 : vector<2x32xf32>
    %262 = math.tanh %261 : vector<2x32xf32>
    %263 = arith.mulf %258, %262 : vector<2x32xf32>
    %264 = tpu.concatenate %263, %234 in 1 : vector<2x32xf32>, vector<2x32xf32> -> vector<2x64xf32>
    %cst_70 = arith.constant dense<0.000000e+00> : vector<2x128xf32>
    %265 = tpu.matmul %264, %114, %cst_70 {dimension_numbers = #tpu.dot_dimension_numbers<[1], [0], [0], [1], [0, 0, 1, 1], [], []>} : vector<2x64xf32>, vector<64x128xf32>, vector<2x128xf32> -> vector<2x128xf32>
    %266 = vector.broadcast %115 : vector<1x128xf32> to vector<2x128xf32>
    %267 = arith.addf %265, %266 : vector<2x128xf32>
    %268 = vector.extract_strided_slice %267 {offsets = [0, 0], sizes = [2, 32], strides = [1, 1]} : vector<2x128xf32> to vector<2x32xf32>
    %269 = arith.negf %268 : vector<2x32xf32>
    %270 = math.exp %269 : vector<2x32xf32>
    %cst_71 = arith.constant 1.000000e+00 : f32
    %271 = vector.broadcast %cst_71 : f32 to vector<2x32xf32>
    %272 = arith.addf %271, %270 : vector<2x32xf32>
    %273 = arith.divf %271, %272 : vector<2x32xf32>
    %274 = vector.extract_strided_slice %267 {offsets = [0, 32], sizes = [2, 32], strides = [1, 1]} : vector<2x128xf32> to vector<2x32xf32>
    %275 = arith.negf %274 : vector<2x32xf32>
    %276 = math.exp %275 : vector<2x32xf32>
    %cst_72 = arith.constant 1.000000e+00 : f32
    %277 = vector.broadcast %cst_72 : f32 to vector<2x32xf32>
    %278 = arith.addf %277, %276 : vector<2x32xf32>
    %279 = arith.divf %277, %278 : vector<2x32xf32>
    %280 = vector.extract_strided_slice %267 {offsets = [0, 64], sizes = [2, 32], strides = [1, 1]} : vector<2x128xf32> to vector<2x32xf32>
    %281 = math.tanh %280 : vector<2x32xf32>
    %282 = vector.extract_strided_slice %267 {offsets = [0, 96], sizes = [2, 32], strides = [1, 1]} : vector<2x128xf32> to vector<2x32xf32>
    %283 = arith.negf %282 : vector<2x32xf32>
    %284 = math.exp %283 : vector<2x32xf32>
    %cst_73 = arith.constant 1.000000e+00 : f32
    %285 = vector.broadcast %cst_73 : f32 to vector<2x32xf32>
    %286 = arith.addf %285, %284 : vector<2x32xf32>
    %287 = arith.divf %285, %286 : vector<2x32xf32>
    %288 = arith.mulf %279, %232 : vector<2x32xf32>
    %289 = arith.mulf %273, %281 : vector<2x32xf32>
    %290 = arith.addf %288, %289 : vector<2x32xf32>
    %291 = math.tanh %290 : vector<2x32xf32>
    %292 = arith.mulf %287, %291 : vector<2x32xf32>
    %c4 = arith.constant 4 : index
    %c0_74 = arith.constant 0 : index
    %293 = vector.load %arg5[%c4, %c0_74] : memref<16x32xf32, #tpu.memory_space<vmem>>, vector<2x32xf32>
    tpu.vector_store %arg5[%c4, %c0_74], %292 {strides = array<i32>} : memref<16x32xf32, #tpu.memory_space<vmem>>, vector<2x32xf32>,
    %294 = vector.extract_strided_slice %112 {offsets = [6, 0], sizes = [2, 128], strides = [1, 1]} : vector<16x128xf32> to vector<2x128xf32>
    %cst_75 = arith.constant dense<0.000000e+00> : vector<2x128xf32>
    %295 = tpu.matmul %263, %113, %cst_75 {dimension_numbers = #tpu.dot_dimension_numbers<[1], [0], [0], [1], [0, 0, 1, 1], [], []>} : vector<2x32xf32>, vector<32x128xf32>, vector<2x128xf32> -> vector<2x128xf32>
    %296 = arith.addf %294, %295 : vector<2x128xf32>
    %297 = vector.extract_strided_slice %296 {offsets = [0, 0], sizes = [2, 32], strides = [1, 1]} : vector<2x128xf32> to vector<2x32xf32>
    %298 = arith.negf %297 : vector<2x32xf32>
    %299 = math.exp %298 : vector<2x32xf32>
    %cst_76 = arith.constant 1.000000e+00 : f32
    %300 = vector.broadcast %cst_76 : f32 to vector<2x32xf32>
    %301 = arith.addf %300, %299 : vector<2x32xf32>
    %302 = arith.divf %300, %301 : vector<2x32xf32>
    %303 = vector.extract_strided_slice %296 {offsets = [0, 32], sizes = [2, 32], strides = [1, 1]} : vector<2x128xf32> to vector<2x32xf32>
    %304 = arith.negf %303 : vector<2x32xf32>
    %305 = math.exp %304 : vector<2x32xf32>
    %cst_77 = arith.constant 1.000000e+00 : f32
    %306 = vector.broadcast %cst_77 : f32 to vector<2x32xf32>
    %307 = arith.addf %306, %305 : vector<2x32xf32>
    %308 = arith.divf %306, %307 : vector<2x32xf32>
    %309 = vector.extract_strided_slice %296 {offsets = [0, 64], sizes = [2, 32], strides = [1, 1]} : vector<2x128xf32> to vector<2x32xf32>
    %310 = math.tanh %309 : vector<2x32xf32>
    %311 = vector.extract_strided_slice %296 {offsets = [0, 96], sizes = [2, 32], strides = [1, 1]} : vector<2x128xf32> to vector<2x32xf32>
    %312 = arith.negf %311 : vector<2x32xf32>
    %313 = math.exp %312 : vector<2x32xf32>
    %cst_78 = arith.constant 1.000000e+00 : f32
    %314 = vector.broadcast %cst_78 : f32 to vector<2x32xf32>
    %315 = arith.addf %314, %313 : vector<2x32xf32>
    %316 = arith.divf %314, %315 : vector<2x32xf32>
    %317 = arith.mulf %308, %261 : vector<2x32xf32>
    %318 = arith.mulf %302, %310 : vector<2x32xf32>
    %319 = arith.addf %317, %318 : vector<2x32xf32>
    %320 = math.tanh %319 : vector<2x32xf32>
    %321 = arith.mulf %316, %320 : vector<2x32xf32>
    %322 = tpu.concatenate %321, %292 in 1 : vector<2x32xf32>, vector<2x32xf32> -> vector<2x64xf32>
    %cst_79 = arith.constant dense<0.000000e+00> : vector<2x128xf32>
    %323 = tpu.matmul %322, %114, %cst_79 {dimension_numbers = #tpu.dot_dimension_numbers<[1], [0], [0], [1], [0, 0, 1, 1], [], []>} : vector<2x64xf32>, vector<64x128xf32>, vector<2x128xf32> -> vector<2x128xf32>
    %324 = vector.broadcast %115 : vector<1x128xf32> to vector<2x128xf32>
    %325 = arith.addf %323, %324 : vector<2x128xf32>
    %326 = vector.extract_strided_slice %325 {offsets = [0, 0], sizes = [2, 32], strides = [1, 1]} : vector<2x128xf32> to vector<2x32xf32>
    %327 = arith.negf %326 : vector<2x32xf32>
    %328 = math.exp %327 : vector<2x32xf32>
    %cst_80 = arith.constant 1.000000e+00 : f32
    %329 = vector.broadcast %cst_80 : f32 to vector<2x32xf32>
    %330 = arith.addf %329, %328 : vector<2x32xf32>
    %331 = arith.divf %329, %330 : vector<2x32xf32>
    %332 = vector.extract_strided_slice %325 {offsets = [0, 32], sizes = [2, 32], strides = [1, 1]} : vector<2x128xf32> to vector<2x32xf32>
    %333 = arith.negf %332 : vector<2x32xf32>
    %334 = math.exp %333 : vector<2x32xf32>
    %cst_81 = arith.constant 1.000000e+00 : f32
    %335 = vector.broadcast %cst_81 : f32 to vector<2x32xf32>
    %336 = arith.addf %335, %334 : vector<2x32xf32>
    %337 = arith.divf %335, %336 : vector<2x32xf32>
    %338 = vector.extract_strided_slice %325 {offsets = [0, 64], sizes = [2, 32], strides = [1, 1]} : vector<2x128xf32> to vector<2x32xf32>
    %339 = math.tanh %338 : vector<2x32xf32>
    %340 = vector.extract_strided_slice %325 {offsets = [0, 96], sizes = [2, 32], strides = [1, 1]} : vector<2x128xf32> to vector<2x32xf32>
    %341 = arith.negf %340 : vector<2x32xf32>
    %342 = math.exp %341 : vector<2x32xf32>
    %cst_82 = arith.constant 1.000000e+00 : f32
    %343 = vector.broadcast %cst_82 : f32 to vector<2x32xf32>
    %344 = arith.addf %343, %342 : vector<2x32xf32>
    %345 = arith.divf %343, %344 : vector<2x32xf32>
    %346 = arith.mulf %337, %290 : vector<2x32xf32>
    %347 = arith.mulf %331, %339 : vector<2x32xf32>
    %348 = arith.addf %346, %347 : vector<2x32xf32>
    %349 = math.tanh %348 : vector<2x32xf32>
    %350 = arith.mulf %345, %349 : vector<2x32xf32>
    %c6 = arith.constant 6 : index
    %c0_83 = arith.constant 0 : index
    %351 = vector.load %arg5[%c6, %c0_83] : memref<16x32xf32, #tpu.memory_space<vmem>>, vector<2x32xf32>
    tpu.vector_store %arg5[%c6, %c0_83], %350 {strides = array<i32>} : memref<16x32xf32, #tpu.memory_space<vmem>>, vector<2x32xf32>,
    %352 = vector.extract_strided_slice %112 {offsets = [8, 0], sizes = [2, 128], strides = [1, 1]} : vector<16x128xf32> to vector<2x128xf32>
    %cst_84 = arith.constant dense<0.000000e+00> : vector<2x128xf32>
    %353 = tpu.matmul %321, %113, %cst_84 {dimension_numbers = #tpu.dot_dimension_numbers<[1], [0], [0], [1], [0, 0, 1, 1], [], []>} : vector<2x32xf32>, vector<32x128xf32>, vector<2x128xf32> -> vector<2x128xf32>
    %354 = arith.addf %352, %353 : vector<2x128xf32>
    %355 = vector.extract_strided_slice %354 {offsets = [0, 0], sizes = [2, 32], strides = [1, 1]} : vector<2x128xf32> to vector<2x32xf32>
    %356 = arith.negf %355 : vector<2x32xf32>
    %357 = math.exp %356 : vector<2x32xf32>
    %cst_85 = arith.constant 1.000000e+00 : f32
    %358 = vector.broadcast %cst_85 : f32 to vector<2x32xf32>
    %359 = arith.addf %358, %357 : vector<2x32xf32>
    %360 = arith.divf %358, %359 : vector<2x32xf32>
    %361 = vector.extract_strided_slice %354 {offsets = [0, 32], sizes = [2, 32], strides = [1, 1]} : vector<2x128xf32> to vector<2x32xf32>
    %362 = arith.negf %361 : vector<2x32xf32>
    %363 = math.exp %362 : vector<2x32xf32>
    %cst_86 = arith.constant 1.000000e+00 : f32
    %364 = vector.broadcast %cst_86 : f32 to vector<2x32xf32>
    %365 = arith.addf %364, %363 : vector<2x32xf32>
    %366 = arith.divf %364, %365 : vector<2x32xf32>
    %367 = vector.extract_strided_slice %354 {offsets = [0, 64], sizes = [2, 32], strides = [1, 1]} : vector<2x128xf32> to vector<2x32xf32>
    %368 = math.tanh %367 : vector<2x32xf32>
    %369 = vector.extract_strided_slice %354 {offsets = [0, 96], sizes = [2, 32], strides = [1, 1]} : vector<2x128xf32> to vector<2x32xf32>
    %370 = arith.negf %369 : vector<2x32xf32>
    %371 = math.exp %370 : vector<2x32xf32>
    %cst_87 = arith.constant 1.000000e+00 : f32
    %372 = vector.broadcast %cst_87 : f32 to vector<2x32xf32>
    %373 = arith.addf %372, %371 : vector<2x32xf32>
    %374 = arith.divf %372, %373 : vector<2x32xf32>
    %375 = arith.mulf %366, %319 : vector<2x32xf32>
    %376 = arith.mulf %360, %368 : vector<2x32xf32>
    %377 = arith.addf %375, %376 : vector<2x32xf32>
    %378 = math.tanh %377 : vector<2x32xf32>
    %379 = arith.mulf %374, %378 : vector<2x32xf32>
    %380 = tpu.concatenate %379, %350 in 1 : vector<2x32xf32>, vector<2x32xf32> -> vector<2x64xf32>
    %cst_88 = arith.constant dense<0.000000e+00> : vector<2x128xf32>
    %381 = tpu.matmul %380, %114, %cst_88 {dimension_numbers = #tpu.dot_dimension_numbers<[1], [0], [0], [1], [0, 0, 1, 1], [], []>} : vector<2x64xf32>, vector<64x128xf32>, vector<2x128xf32> -> vector<2x128xf32>
    %382 = vector.broadcast %115 : vector<1x128xf32> to vector<2x128xf32>
    %383 = arith.addf %381, %382 : vector<2x128xf32>
    %384 = vector.extract_strided_slice %383 {offsets = [0, 0], sizes = [2, 32], strides = [1, 1]} : vector<2x128xf32> to vector<2x32xf32>
    %385 = arith.negf %384 : vector<2x32xf32>
    %386 = math.exp %385 : vector<2x32xf32>
    %cst_89 = arith.constant 1.000000e+00 : f32
    %387 = vector.broadcast %cst_89 : f32 to vector<2x32xf32>
    %388 = arith.addf %387, %386 : vector<2x32xf32>
    %389 = arith.divf %387, %388 : vector<2x32xf32>
    %390 = vector.extract_strided_slice %383 {offsets = [0, 32], sizes = [2, 32], strides = [1, 1]} : vector<2x128xf32> to vector<2x32xf32>
    %391 = arith.negf %390 : vector<2x32xf32>
    %392 = math.exp %391 : vector<2x32xf32>
    %cst_90 = arith.constant 1.000000e+00 : f32
    %393 = vector.broadcast %cst_90 : f32 to vector<2x32xf32>
    %394 = arith.addf %393, %392 : vector<2x32xf32>
    %395 = arith.divf %393, %394 : vector<2x32xf32>
    %396 = vector.extract_strided_slice %383 {offsets = [0, 64], sizes = [2, 32], strides = [1, 1]} : vector<2x128xf32> to vector<2x32xf32>
    %397 = math.tanh %396 : vector<2x32xf32>
    %398 = vector.extract_strided_slice %383 {offsets = [0, 96], sizes = [2, 32], strides = [1, 1]} : vector<2x128xf32> to vector<2x32xf32>
    %399 = arith.negf %398 : vector<2x32xf32>
    %400 = math.exp %399 : vector<2x32xf32>
    %cst_91 = arith.constant 1.000000e+00 : f32
    %401 = vector.broadcast %cst_91 : f32 to vector<2x32xf32>
    %402 = arith.addf %401, %400 : vector<2x32xf32>
    %403 = arith.divf %401, %402 : vector<2x32xf32>
    %404 = arith.mulf %395, %348 : vector<2x32xf32>
    %405 = arith.mulf %389, %397 : vector<2x32xf32>
    %406 = arith.addf %404, %405 : vector<2x32xf32>
    %407 = math.tanh %406 : vector<2x32xf32>
    %408 = arith.mulf %403, %407 : vector<2x32xf32>
    %c8_92 = arith.constant 8 : index
    %c0_93 = arith.constant 0 : index
    %409 = vector.load %arg5[%c8_92, %c0_93] : memref<16x32xf32, #tpu.memory_space<vmem>>, vector<2x32xf32>
    tpu.vector_store %arg5[%c8_92, %c0_93], %408 {strides = array<i32>} : memref<16x32xf32, #tpu.memory_space<vmem>>, vector<2x32xf32>,
    %410 = vector.extract_strided_slice %112 {offsets = [10, 0], sizes = [2, 128], strides = [1, 1]} : vector<16x128xf32> to vector<2x128xf32>
    %cst_94 = arith.constant dense<0.000000e+00> : vector<2x128xf32>
    %411 = tpu.matmul %379, %113, %cst_94 {dimension_numbers = #tpu.dot_dimension_numbers<[1], [0], [0], [1], [0, 0, 1, 1], [], []>} : vector<2x32xf32>, vector<32x128xf32>, vector<2x128xf32> -> vector<2x128xf32>
    %412 = arith.addf %410, %411 : vector<2x128xf32>
    %413 = vector.extract_strided_slice %412 {offsets = [0, 0], sizes = [2, 32], strides = [1, 1]} : vector<2x128xf32> to vector<2x32xf32>
    %414 = arith.negf %413 : vector<2x32xf32>
    %415 = math.exp %414 : vector<2x32xf32>
    %cst_95 = arith.constant 1.000000e+00 : f32
    %416 = vector.broadcast %cst_95 : f32 to vector<2x32xf32>
    %417 = arith.addf %416, %415 : vector<2x32xf32>
    %418 = arith.divf %416, %417 : vector<2x32xf32>
    %419 = vector.extract_strided_slice %412 {offsets = [0, 32], sizes = [2, 32], strides = [1, 1]} : vector<2x128xf32> to vector<2x32xf32>
    %420 = arith.negf %419 : vector<2x32xf32>
    %421 = math.exp %420 : vector<2x32xf32>
    %cst_96 = arith.constant 1.000000e+00 : f32
    %422 = vector.broadcast %cst_96 : f32 to vector<2x32xf32>
    %423 = arith.addf %422, %421 : vector<2x32xf32>
    %424 = arith.divf %422, %423 : vector<2x32xf32>
    %425 = vector.extract_strided_slice %412 {offsets = [0, 64], sizes = [2, 32], strides = [1, 1]} : vector<2x128xf32> to vector<2x32xf32>
    %426 = math.tanh %425 : vector<2x32xf32>
    %427 = vector.extract_strided_slice %412 {offsets = [0, 96], sizes = [2, 32], strides = [1, 1]} : vector<2x128xf32> to vector<2x32xf32>
    %428 = arith.negf %427 : vector<2x32xf32>
    %429 = math.exp %428 : vector<2x32xf32>
    %cst_97 = arith.constant 1.000000e+00 : f32
    %430 = vector.broadcast %cst_97 : f32 to vector<2x32xf32>
    %431 = arith.addf %430, %429 : vector<2x32xf32>
    %432 = arith.divf %430, %431 : vector<2x32xf32>
    %433 = arith.mulf %424, %377 : vector<2x32xf32>
    %434 = arith.mulf %418, %426 : vector<2x32xf32>
    %435 = arith.addf %433, %434 : vector<2x32xf32>
    %436 = math.tanh %435 : vector<2x32xf32>
    %437 = arith.mulf %432, %436 : vector<2x32xf32>
    %438 = tpu.concatenate %437, %408 in 1 : vector<2x32xf32>, vector<2x32xf32> -> vector<2x64xf32>
    %cst_98 = arith.constant dense<0.000000e+00> : vector<2x128xf32>
    %439 = tpu.matmul %438, %114, %cst_98 {dimension_numbers = #tpu.dot_dimension_numbers<[1], [0], [0], [1], [0, 0, 1, 1], [], []>} : vector<2x64xf32>, vector<64x128xf32>, vector<2x128xf32> -> vector<2x128xf32>
    %440 = vector.broadcast %115 : vector<1x128xf32> to vector<2x128xf32>
    %441 = arith.addf %439, %440 : vector<2x128xf32>
    %442 = vector.extract_strided_slice %441 {offsets = [0, 0], sizes = [2, 32], strides = [1, 1]} : vector<2x128xf32> to vector<2x32xf32>
    %443 = arith.negf %442 : vector<2x32xf32>
    %444 = math.exp %443 : vector<2x32xf32>
    %cst_99 = arith.constant 1.000000e+00 : f32
    %445 = vector.broadcast %cst_99 : f32 to vector<2x32xf32>
    %446 = arith.addf %445, %444 : vector<2x32xf32>
    %447 = arith.divf %445, %446 : vector<2x32xf32>
    %448 = vector.extract_strided_slice %441 {offsets = [0, 32], sizes = [2, 32], strides = [1, 1]} : vector<2x128xf32> to vector<2x32xf32>
    %449 = arith.negf %448 : vector<2x32xf32>
    %450 = math.exp %449 : vector<2x32xf32>
    %cst_100 = arith.constant 1.000000e+00 : f32
    %451 = vector.broadcast %cst_100 : f32 to vector<2x32xf32>
    %452 = arith.addf %451, %450 : vector<2x32xf32>
    %453 = arith.divf %451, %452 : vector<2x32xf32>
    %454 = vector.extract_strided_slice %441 {offsets = [0, 64], sizes = [2, 32], strides = [1, 1]} : vector<2x128xf32> to vector<2x32xf32>
    %455 = math.tanh %454 : vector<2x32xf32>
    %456 = vector.extract_strided_slice %441 {offsets = [0, 96], sizes = [2, 32], strides = [1, 1]} : vector<2x128xf32> to vector<2x32xf32>
    %457 = arith.negf %456 : vector<2x32xf32>
    %458 = math.exp %457 : vector<2x32xf32>
    %cst_101 = arith.constant 1.000000e+00 : f32
    %459 = vector.broadcast %cst_101 : f32 to vector<2x32xf32>
    %460 = arith.addf %459, %458 : vector<2x32xf32>
    %461 = arith.divf %459, %460 : vector<2x32xf32>
    %462 = arith.mulf %453, %406 : vector<2x32xf32>
    %463 = arith.mulf %447, %455 : vector<2x32xf32>
    %464 = arith.addf %462, %463 : vector<2x32xf32>
    %465 = math.tanh %464 : vector<2x32xf32>
    %466 = arith.mulf %461, %465 : vector<2x32xf32>
    %c10_102 = arith.constant 10 : index
    %c0_103 = arith.constant 0 : index
    %467 = vector.load %arg5[%c10_102, %c0_103] : memref<16x32xf32, #tpu.memory_space<vmem>>, vector<2x32xf32>
    tpu.vector_store %arg5[%c10_102, %c0_103], %466 {strides = array<i32>} : memref<16x32xf32, #tpu.memory_space<vmem>>, vector<2x32xf32>,
    %468 = vector.extract_strided_slice %112 {offsets = [12, 0], sizes = [2, 128], strides = [1, 1]} : vector<16x128xf32> to vector<2x128xf32>
    %cst_104 = arith.constant dense<0.000000e+00> : vector<2x128xf32>
    %469 = tpu.matmul %437, %113, %cst_104 {dimension_numbers = #tpu.dot_dimension_numbers<[1], [0], [0], [1], [0, 0, 1, 1], [], []>} : vector<2x32xf32>, vector<32x128xf32>, vector<2x128xf32> -> vector<2x128xf32>
    %470 = arith.addf %468, %469 : vector<2x128xf32>
    %471 = vector.extract_strided_slice %470 {offsets = [0, 0], sizes = [2, 32], strides = [1, 1]} : vector<2x128xf32> to vector<2x32xf32>
    %472 = arith.negf %471 : vector<2x32xf32>
    %473 = math.exp %472 : vector<2x32xf32>
    %cst_105 = arith.constant 1.000000e+00 : f32
    %474 = vector.broadcast %cst_105 : f32 to vector<2x32xf32>
    %475 = arith.addf %474, %473 : vector<2x32xf32>
    %476 = arith.divf %474, %475 : vector<2x32xf32>
    %477 = vector.extract_strided_slice %470 {offsets = [0, 32], sizes = [2, 32], strides = [1, 1]} : vector<2x128xf32> to vector<2x32xf32>
    %478 = arith.negf %477 : vector<2x32xf32>
    %479 = math.exp %478 : vector<2x32xf32>
    %cst_106 = arith.constant 1.000000e+00 : f32
    %480 = vector.broadcast %cst_106 : f32 to vector<2x32xf32>
    %481 = arith.addf %480, %479 : vector<2x32xf32>
    %482 = arith.divf %480, %481 : vector<2x32xf32>
    %483 = vector.extract_strided_slice %470 {offsets = [0, 64], sizes = [2, 32], strides = [1, 1]} : vector<2x128xf32> to vector<2x32xf32>
    %484 = math.tanh %483 : vector<2x32xf32>
    %485 = vector.extract_strided_slice %470 {offsets = [0, 96], sizes = [2, 32], strides = [1, 1]} : vector<2x128xf32> to vector<2x32xf32>
    %486 = arith.negf %485 : vector<2x32xf32>
    %487 = math.exp %486 : vector<2x32xf32>
    %cst_107 = arith.constant 1.000000e+00 : f32
    %488 = vector.broadcast %cst_107 : f32 to vector<2x32xf32>
    %489 = arith.addf %488, %487 : vector<2x32xf32>
    %490 = arith.divf %488, %489 : vector<2x32xf32>
    %491 = arith.mulf %482, %435 : vector<2x32xf32>
    %492 = arith.mulf %476, %484 : vector<2x32xf32>
    %493 = arith.addf %491, %492 : vector<2x32xf32>
    %494 = math.tanh %493 : vector<2x32xf32>
    %495 = arith.mulf %490, %494 : vector<2x32xf32>
    %496 = tpu.concatenate %495, %466 in 1 : vector<2x32xf32>, vector<2x32xf32> -> vector<2x64xf32>
    %cst_108 = arith.constant dense<0.000000e+00> : vector<2x128xf32>
    %497 = tpu.matmul %496, %114, %cst_108 {dimension_numbers = #tpu.dot_dimension_numbers<[1], [0], [0], [1], [0, 0, 1, 1], [], []>} : vector<2x64xf32>, vector<64x128xf32>, vector<2x128xf32> -> vector<2x128xf32>
    %498 = vector.broadcast %115 : vector<1x128xf32> to vector<2x128xf32>
    %499 = arith.addf %497, %498 : vector<2x128xf32>
    %500 = vector.extract_strided_slice %499 {offsets = [0, 0], sizes = [2, 32], strides = [1, 1]} : vector<2x128xf32> to vector<2x32xf32>
    %501 = arith.negf %500 : vector<2x32xf32>
    %502 = math.exp %501 : vector<2x32xf32>
    %cst_109 = arith.constant 1.000000e+00 : f32
    %503 = vector.broadcast %cst_109 : f32 to vector<2x32xf32>
    %504 = arith.addf %503, %502 : vector<2x32xf32>
    %505 = arith.divf %503, %504 : vector<2x32xf32>
    %506 = vector.extract_strided_slice %499 {offsets = [0, 32], sizes = [2, 32], strides = [1, 1]} : vector<2x128xf32> to vector<2x32xf32>
    %507 = arith.negf %506 : vector<2x32xf32>
    %508 = math.exp %507 : vector<2x32xf32>
    %cst_110 = arith.constant 1.000000e+00 : f32
    %509 = vector.broadcast %cst_110 : f32 to vector<2x32xf32>
    %510 = arith.addf %509, %508 : vector<2x32xf32>
    %511 = arith.divf %509, %510 : vector<2x32xf32>
    %512 = vector.extract_strided_slice %499 {offsets = [0, 64], sizes = [2, 32], strides = [1, 1]} : vector<2x128xf32> to vector<2x32xf32>
    %513 = math.tanh %512 : vector<2x32xf32>
    %514 = vector.extract_strided_slice %499 {offsets = [0, 96], sizes = [2, 32], strides = [1, 1]} : vector<2x128xf32> to vector<2x32xf32>
    %515 = arith.negf %514 : vector<2x32xf32>
    %516 = math.exp %515 : vector<2x32xf32>
    %cst_111 = arith.constant 1.000000e+00 : f32
    %517 = vector.broadcast %cst_111 : f32 to vector<2x32xf32>
    %518 = arith.addf %517, %516 : vector<2x32xf32>
    %519 = arith.divf %517, %518 : vector<2x32xf32>
    %520 = arith.mulf %511, %464 : vector<2x32xf32>
    %521 = arith.mulf %505, %513 : vector<2x32xf32>
    %522 = arith.addf %520, %521 : vector<2x32xf32>
    %523 = math.tanh %522 : vector<2x32xf32>
    %524 = arith.mulf %519, %523 : vector<2x32xf32>
    %c12 = arith.constant 12 : index
    %c0_112 = arith.constant 0 : index
    %525 = vector.load %arg5[%c12, %c0_112] : memref<16x32xf32, #tpu.memory_space<vmem>>, vector<2x32xf32>
    tpu.vector_store %arg5[%c12, %c0_112], %524 {strides = array<i32>} : memref<16x32xf32, #tpu.memory_space<vmem>>, vector<2x32xf32>,
    %526 = vector.extract_strided_slice %112 {offsets = [14, 0], sizes = [2, 128], strides = [1, 1]} : vector<16x128xf32> to vector<2x128xf32>
    %cst_113 = arith.constant dense<0.000000e+00> : vector<2x128xf32>
    %527 = tpu.matmul %495, %113, %cst_113 {dimension_numbers = #tpu.dot_dimension_numbers<[1], [0], [0], [1], [0, 0, 1, 1], [], []>} : vector<2x32xf32>, vector<32x128xf32>, vector<2x128xf32> -> vector<2x128xf32>
    %528 = arith.addf %526, %527 : vector<2x128xf32>
    %529 = vector.extract_strided_slice %528 {offsets = [0, 0], sizes = [2, 32], strides = [1, 1]} : vector<2x128xf32> to vector<2x32xf32>
    %530 = arith.negf %529 : vector<2x32xf32>
    %531 = math.exp %530 : vector<2x32xf32>
    %cst_114 = arith.constant 1.000000e+00 : f32
    %532 = vector.broadcast %cst_114 : f32 to vector<2x32xf32>
    %533 = arith.addf %532, %531 : vector<2x32xf32>
    %534 = arith.divf %532, %533 : vector<2x32xf32>
    %535 = vector.extract_strided_slice %528 {offsets = [0, 32], sizes = [2, 32], strides = [1, 1]} : vector<2x128xf32> to vector<2x32xf32>
    %536 = arith.negf %535 : vector<2x32xf32>
    %537 = math.exp %536 : vector<2x32xf32>
    %cst_115 = arith.constant 1.000000e+00 : f32
    %538 = vector.broadcast %cst_115 : f32 to vector<2x32xf32>
    %539 = arith.addf %538, %537 : vector<2x32xf32>
    %540 = arith.divf %538, %539 : vector<2x32xf32>
    %541 = vector.extract_strided_slice %528 {offsets = [0, 64], sizes = [2, 32], strides = [1, 1]} : vector<2x128xf32> to vector<2x32xf32>
    %542 = math.tanh %541 : vector<2x32xf32>
    %543 = vector.extract_strided_slice %528 {offsets = [0, 96], sizes = [2, 32], strides = [1, 1]} : vector<2x128xf32> to vector<2x32xf32>
    %544 = arith.negf %543 : vector<2x32xf32>
    %545 = math.exp %544 : vector<2x32xf32>
    %cst_116 = arith.constant 1.000000e+00 : f32
    %546 = vector.broadcast %cst_116 : f32 to vector<2x32xf32>
    %547 = arith.addf %546, %545 : vector<2x32xf32>
    %548 = arith.divf %546, %547 : vector<2x32xf32>
    %549 = arith.mulf %540, %493 : vector<2x32xf32>
    %550 = arith.mulf %534, %542 : vector<2x32xf32>
    %551 = arith.addf %549, %550 : vector<2x32xf32>
    %552 = math.tanh %551 : vector<2x32xf32>
    %553 = arith.mulf %548, %552 : vector<2x32xf32>
    %554 = tpu.concatenate %553, %524 in 1 : vector<2x32xf32>, vector<2x32xf32> -> vector<2x64xf32>
    %cst_117 = arith.constant dense<0.000000e+00> : vector<2x128xf32>
    %555 = tpu.matmul %554, %114, %cst_117 {dimension_numbers = #tpu.dot_dimension_numbers<[1], [0], [0], [1], [0, 0, 1, 1], [], []>} : vector<2x64xf32>, vector<64x128xf32>, vector<2x128xf32> -> vector<2x128xf32>
    %556 = vector.broadcast %115 : vector<1x128xf32> to vector<2x128xf32>
    %557 = arith.addf %555, %556 : vector<2x128xf32>
    %558 = vector.extract_strided_slice %557 {offsets = [0, 0], sizes = [2, 32], strides = [1, 1]} : vector<2x128xf32> to vector<2x32xf32>
    %559 = arith.negf %558 : vector<2x32xf32>
    %560 = math.exp %559 : vector<2x32xf32>
    %cst_118 = arith.constant 1.000000e+00 : f32
    %561 = vector.broadcast %cst_118 : f32 to vector<2x32xf32>
    %562 = arith.addf %561, %560 : vector<2x32xf32>
    %563 = arith.divf %561, %562 : vector<2x32xf32>
    %564 = vector.extract_strided_slice %557 {offsets = [0, 32], sizes = [2, 32], strides = [1, 1]} : vector<2x128xf32> to vector<2x32xf32>
    %565 = arith.negf %564 : vector<2x32xf32>
    %566 = math.exp %565 : vector<2x32xf32>
    %cst_119 = arith.constant 1.000000e+00 : f32
    %567 = vector.broadcast %cst_119 : f32 to vector<2x32xf32>
    %568 = arith.addf %567, %566 : vector<2x32xf32>
    %569 = arith.divf %567, %568 : vector<2x32xf32>
    %570 = vector.extract_strided_slice %557 {offsets = [0, 64], sizes = [2, 32], strides = [1, 1]} : vector<2x128xf32> to vector<2x32xf32>
    %571 = math.tanh %570 : vector<2x32xf32>
    %572 = vector.extract_strided_slice %557 {offsets = [0, 96], sizes = [2, 32], strides = [1, 1]} : vector<2x128xf32> to vector<2x32xf32>
    %573 = arith.negf %572 : vector<2x32xf32>
    %574 = math.exp %573 : vector<2x32xf32>
    %cst_120 = arith.constant 1.000000e+00 : f32
    %575 = vector.broadcast %cst_120 : f32 to vector<2x32xf32>
    %576 = arith.addf %575, %574 : vector<2x32xf32>
    %577 = arith.divf %575, %576 : vector<2x32xf32>
    %578 = arith.mulf %569, %522 : vector<2x32xf32>
    %579 = arith.mulf %563, %571 : vector<2x32xf32>
    %580 = arith.addf %578, %579 : vector<2x32xf32>
    %581 = math.tanh %580 : vector<2x32xf32>
    %582 = arith.mulf %577, %581 : vector<2x32xf32>
    %c14 = arith.constant 14 : index
    %c0_121 = arith.constant 0 : index
    %583 = vector.load %arg5[%c14, %c0_121] : memref<16x32xf32, #tpu.memory_space<vmem>>, vector<2x32xf32>
    tpu.vector_store %arg5[%c14, %c0_121], %582 {strides = array<i32>} : memref<16x32xf32, #tpu.memory_space<vmem>>, vector<2x32xf32>,
    %c0_122 = arith.constant 0 : index
    %c0_123 = arith.constant 0 : index
    %584 = vector.load %arg5[%c0_122, %c0_123] : memref<16x32xf32, #tpu.memory_space<vmem>>, vector<16x32xf32>
    %c88 = arith.constant 88 : index
    %c0_124 = arith.constant 0 : index
    %585 = vector.load %arg1[%c88, %c0_124] : memref<264x32xf32, #tpu.memory_space<vmem>>, vector<32x32xf32>
    %c120 = arith.constant 120 : index
    %c0_125 = arith.constant 0 : index
    %586 = vector.load %arg1[%c120, %c0_125] : memref<264x32xf32, #tpu.memory_space<vmem>>, vector<1x32xf32>
    %cst_126 = arith.constant dense<0.000000e+00> : vector<16x32xf32>
    %587 = tpu.matmul %584, %585, %cst_126 {dimension_numbers = #tpu.dot_dimension_numbers<[1], [0], [0], [1], [0, 0, 1, 1], [], []>} : vector<16x32xf32>, vector<32x32xf32>, vector<16x32xf32> -> vector<16x32xf32>
    %588 = vector.broadcast %586 : vector<1x32xf32> to vector<16x32xf32>
    %589 = arith.addf %587, %588 : vector<16x32xf32>
    %c144 = arith.constant 144 : index
    %c0_127 = arith.constant 0 : index
    %590 = vector.load %arg2[%c144, %c0_127] : memref<312x128xf32, #tpu.memory_space<vmem>>, vector<32x128xf32>
    %c304 = arith.constant 304 : index
    %c0_128 = arith.constant 0 : index
    %591 = vector.load %arg2[%c304, %c0_128] : memref<312x128xf32, #tpu.memory_space<vmem>>, vector<1x128xf32>
    %cst_129 = arith.constant dense<0.000000e+00> : vector<16x128xf32>
    %592 = tpu.matmul %589, %590, %cst_129 {dimension_numbers = #tpu.dot_dimension_numbers<[1], [0], [0], [1], [0, 0, 1, 1], [], []>} : vector<16x32xf32>, vector<32x128xf32>, vector<16x128xf32> -> vector<16x128xf32>
    %593 = vector.broadcast %591 : vector<1x128xf32> to vector<16x128xf32>
    %594 = arith.addf %592, %593 : vector<16x128xf32>
    %cst_130 = arith.constant 2.000000e-01 : f32
    %595 = vector.broadcast %cst_130 : f32 to vector<16x128xf32>
    %596 = arith.mulf %595, %594 : vector<16x128xf32>
    %597 = arith.maximumf %594, %596 : vector<16x128xf32>
    %c176 = arith.constant 176 : index
    %c0_131 = arith.constant 0 : index
    %598 = vector.load %arg2[%c176, %c0_131] : memref<312x128xf32, #tpu.memory_space<vmem>>, vector<128x128xf32>
    %c305 = arith.constant 305 : index
    %c0_132 = arith.constant 0 : index
    %599 = vector.load %arg2[%c305, %c0_132] : memref<312x128xf32, #tpu.memory_space<vmem>>, vector<1x128xf32>
    %cst_133 = arith.constant dense<0.000000e+00> : vector<16x128xf32>
    %600 = tpu.matmul %597, %598, %cst_133 {dimension_numbers = #tpu.dot_dimension_numbers<[1], [0], [0], [1], [0, 0, 1, 1], [], []>} : vector<16x128xf32>, vector<128x128xf32>, vector<16x128xf32> -> vector<16x128xf32>
    %601 = vector.broadcast %599 : vector<1x128xf32> to vector<16x128xf32>
    %602 = arith.addf %600, %601 : vector<16x128xf32>
    %cst_134 = arith.constant 2.000000e-01 : f32
    %603 = vector.broadcast %cst_134 : f32 to vector<16x128xf32>
    %604 = arith.mulf %603, %602 : vector<16x128xf32>
    %605 = arith.maximumf %602, %604 : vector<16x128xf32>
    %c128_135 = arith.constant 128 : index
    %c0_136 = arith.constant 0 : index
    %606 = vector.load %arg1[%c128_135, %c0_136] : memref<264x32xf32, #tpu.memory_space<vmem>>, vector<128x32xf32>
    %c256_137 = arith.constant 256 : index
    %c0_138 = arith.constant 0 : index
    %607 = vector.load %arg1[%c256_137, %c0_138] : memref<264x32xf32, #tpu.memory_space<vmem>>, vector<1x32xf32>
    %cst_139 = arith.constant dense<0.000000e+00> : vector<16x32xf32>
    %608 = tpu.matmul %605, %606, %cst_139 {dimension_numbers = #tpu.dot_dimension_numbers<[1], [0], [0], [1], [0, 0, 1, 1], [], []>} : vector<16x128xf32>, vector<128x32xf32>, vector<16x32xf32> -> vector<16x32xf32>
    %609 = vector.broadcast %607 : vector<1x32xf32> to vector<16x32xf32>
    %610 = arith.addf %608, %609 : vector<16x32xf32>
    %611 = math.tanh %610 : vector<16x32xf32>
    %c0_140 = arith.constant 0 : index
    %c0_141 = arith.constant 0 : index
    %612 = vector.load %arg4[%c0_140, %c0_141] : memref<16x32xf32, #tpu.memory_space<vmem>>, vector<16x32xf32>
    tpu.vector_store %arg4[%c0_140, %c0_141], %611 {strides = array<i32>} : memref<16x32xf32, #tpu.memory_space<vmem>>, vector<16x32xf32>,
    return
  }
}

</mosaic_0001>

<bundles_post_ra>
// kernel: vae_forward.1
= control target key start
LH: loop header
LB: loop body
LE: loop exit
PB: predicated region body
PF: predicated region fallthrough
CT: control target
= control target key end

     0   :  { %vm40_vm0 = vcmask 64512   ;;  %s4421_s7 = smov 16   ;;  %s4422_s8 = smov 8   ;;  %vm514_vm1 = vcmask 130048   ;;  %vm523_vm2 = vcmask 195584   ;;  %vm543_vm3 = vcmask 261120   ;;  %s5626_s1 = inlined_call_operand.vmem [shape: f32[264,32], index: 1, kind: input, shape index: {}]   ;;  %s5627_s0 = inlined_call_operand.vmem [shape: f32[272,8], index: 0, kind: input, shape index: {}]   ;;  %s5628_s3 = inlined_call_operand.vmem [shape: f32[64,16], index: 3, kind: output, shape index: {0}]   ;;  %s5629_s2 = inlined_call_operand.vmem [shape: f32[312,128], index: 2, kind: input, shape index: {}]   ;;  %s5630_s4 = inlined_call_operand.vmem [shape: f32[16,32], index: 4, kind: output, shape index: {1}]  }
   0x1   :  { %v32_v0 = vld [vmem:[%s5626_s1] sm:$0xff]  ;;  %v17_v2 = vld [vmem:[%s5627_s0 + $0x8] sm:$0xff]  ;;  %v18_v3 = vld [vmem:[%s5627_s0 + $0x10] sm:$0xff]  ;;  %s4423_s13 = smov 24   ;;  %s4425_s14 = smov 120   ;;  %vm4427_vm4 = vmmov 0  }
   0x2   :  { %v16_v1 = vld [vmem:[%s5627_s0] sm:$0xff]  ;;  %3607 = vmatprep.subr.mxu0 %v32_v0  ;;  %v19_v4 = vld [vmem:[%s5627_s0 + $0x18] sm:$0xff]  ;;  %v21_v6 = vld [vmem:[%s5627_s0 + $0x28] sm:$0xff]  ;;  %s4428_s22 = smov 32   ;;  %vm1104_vm5 = vcmask 326656   ;;  %s4429_s27 = smov 64  }
   0x3   :  { %3609 = vmatprep.mubr.msk.f32.mxu0 %vm40_vm0, %v16_v1  ;;  %3608 = vmatpush3.msra.mxu0 %v32_v0  ;;  %v20_v5 = vld [vmem:[%s5627_s0 + $0x20] sm:$0xff]  ;;  %v22_v7 = vld [vmem:[%s5627_s0 + $0x30] sm:$0xff]  ;;  %v23_v8 = vld [vmem:[%s5627_s0 + $0x38] sm:$0xff]  ;;  %vm1305_vm6 = vcmask 523264   ;;  %vm1407_vm7 = vcmask 254976  }
   0x4   :  { %3610 = vmatmul.mubr.msk.f32.vlgmr.msra.gmra.mrb[0].mxu0 %vm40_vm0, %v17_v2  ;;  %v24_v9 = vld [vmem:[%s5627_s0 + $0x40] sm:$0xff]  ;;  %v25_v10 = vld [vmem:[%s5627_s0 + $0x48] sm:$0xff]  ;;  %v26_v11 = vld [vmem:[%s5627_s0 + $0x50] sm:$0xff] }
   0x5   :  { %3612 = vmatprep.mubr.msk.f32.mxu0 %vm40_vm0, %v18_v3  ;;  %v27_v12 = vld [vmem:[%s5627_s0 + $0x58] sm:$0xff]  ;;  %v28_v13 = vld [vmem:[%s5627_s0 + $0x60] sm:$0xff]  ;;  %v29_v14 = vld [vmem:[%s5627_s0 + $0x68] sm:$0xff] }
   0x6   :  { %v30_v15 = vld [vmem:[%s5627_s0 + $0x70] sm:$0xff]  ;;  %v31_v16 = vld [vmem:[%s5627_s0 + $0x78] sm:$0xff]  ;;  %v4525_v17 = vld [vmem:[%s5626_s1 + $0x8] ss:$0 sm:$0xff] }
   0x8   :  { %3613 = vmatmul.mubr.msk.f32.gmra.mrb[2].mxu0 %vm40_vm0, %v19_v4 }
   0x9   :  { %3615 = vmatprep.mubr.msk.f32.mxu0 %vm40_vm0, %v20_v5 }
   0xc   :  { %3616 = vmatmul.mubr.msk.f32.gmra.mrb[4].mxu0 %vm40_vm0, %v21_v6 }
   0xd   :  { %3618 = vmatprep.mubr.msk.f32.mxu0 %vm40_vm0, %v22_v7 }
  0x10   :  { %3619 = vmatmul.mubr.msk.f32.gmra.mrb[6].mxu0 %vm40_vm0, %v23_v8 }
  0x11   :  { %3621 = vmatprep.mubr.msk.f32.mxu0 %vm40_vm0, %v24_v9 }
  0x14   :  { %3622 = vmatmul.mubr.msk.f32.gmra.mrb[8].mxu0 %vm40_vm0, %v25_v10 }
  0x15   :  { %3624 = vmatprep.mubr.msk.f32.mxu0 %vm40_vm0, %v26_v11 }
  0x18   :  { %3625 = vmatmul.mubr.msk.f32.gmra.mrb[10].mxu0 %vm40_vm0, %v27_v12 }
  0x19   :  { %3627 = vmatprep.mubr.msk.f32.mxu0 %vm40_vm0, %v28_v13 }
  0x1c   :  { %3628 = vmatmul.mubr.msk.f32.gmra.mrb[12].mxu0 %vm40_vm0, %v29_v14 }
  0x1d   :  { %3630 = vmatprep.mubr.msk.f32.mxu0 %vm40_vm0, %v30_v15 }
  0x20   :  { %3631 = vmatmul.mubr.msk.f32.gmra.mrb[14].mxu0 %vm40_vm0, %v31_v16 }
  0xd7   :  { %v3611_v18 = vpop.f32.mrb[0].mxu0 }
  0xd8   :  { %v4528_v19 = vadd.f32 %v3611_v18, %v4525_v17  ;;  %v155_v20 = vpop.f32.mrb[1].mxu0 }
  0xd9   :  { %v4531_v21 = vadd.f32 %v4525_v17, %v155_v20 }
  0xda   :  { %v235_v22 = vsel %vm40_vm0, %v4528_v19, 0.0  ;;  %v274_v23 = vmul.f32 %v4528_v19, %v4528_v19 }
  0xdb   :  { %v234_v24 = vsel %vm40_vm0, %v4531_v21, 0.0  ;;  %v273_v25 = vmul.f32 %v4531_v21, %v4531_v21  ;;  %v3614_v26 = vpop.f32.mrb[2].mxu0 }
  0xdc   :  { %v290_v27 = vsel %vm40_vm0, %v274_v23, 0.0  ;;  %v236_v28 = vadd.f32 %v235_v22, %v234_v24  ;;  %v4543_v29 = vadd.f32 %v3614_v26, %v4525_v17  ;;  %v165_v30 = vpop.f32.mrb[3].mxu0 }
  0xdd   :  { %v289_v31 = vsel %vm40_vm0, %v273_v25, 0.0  ;;  %v4547_v32 = vadd.f32 %v4525_v17, %v165_v30 }
  0xde   :  { %v291_v33 = vadd.f32 %v290_v27, %v289_v31  ;;  %v276_v34 = vmul.f32 %v4543_v29, %v4543_v29  ;;  %v239_v41 = vsel %vm40_vm0, %v4543_v29, 0.0 }
  0xdf   :  { %v237_v35 = vsel %vm40_vm0, %v4547_v32, 0.0  ;;  %v275_v36 = vmul.f32 %v4547_v32, %v4547_v32  ;;  %v3617_v37 = vpop.f32.mrb[4].mxu0 }
  0xe0   :  { %v238_v38 = vadd.f32 %v237_v35, %v236_v28  ;;  %v4556_v39 = vadd.f32 %v3617_v37, %v4525_v17  ;;  %v175_v40 = vpop.f32.mrb[5].mxu0  ;;  %v294_v46 = vsel %vm40_vm0, %v276_v34, 0.0 }
  0xe1   :  { %v292_v42 = vsel %vm40_vm0, %v275_v36, 0.0  ;;  %v4562_v43 = vadd.f32 %v4525_v17, %v175_v40 }
  0xe2   :  { %v293_v44 = vadd.f32 %v292_v42, %v291_v33  ;;  %v240_v45 = vadd.f32 %v239_v41, %v238_v38  ;;  %v278_v47 = vmul.f32 %v4556_v39, %v4556_v39  ;;  %v243_v55 = vsel %vm40_vm0, %v4556_v39, 0.0 }
  0xe3   :  { %v241_v48 = vsel %vm40_vm0, %v4562_v43, 0.0  ;;  %v277_v49 = vmul.f32 %v4562_v43, %v4562_v43  ;;  %v3620_v50 = vpop.f32.mrb[6].mxu0 }
  0xe4   :  { %v242_v51 = vadd.f32 %v241_v48, %v240_v45  ;;  %v295_v52 = vadd.f32 %v294_v46, %v293_v44  ;;  %v4572_v53 = vadd.f32 %v3620_v50, %v4525_v17  ;;  %v185_v54 = vpop.f32.mrb[7].mxu0  ;;  %v298_v60 = vsel %vm40_vm0, %v278_v47, 0.0 }
  0xe5   :  { %v296_v56 = vsel %vm40_vm0, %v277_v49, 0.0  ;;  %v4578_v57 = vadd.f32 %v4525_v17, %v185_v54 }
  0xe6   :  { %v297_v58 = vadd.f32 %v296_v56, %v295_v52  ;;  %v244_v59 = vadd.f32 %v243_v55, %v242_v51  ;;  %v280_v61 = vmul.f32 %v4572_v53, %v4572_v53  ;;  %v247_v5 = vsel %vm40_vm0, %v4572_v53, 0.0 }
  0xe7   :  { %v245_v62 = vsel %vm40_vm0, %v4578_v57, 0.0  ;;  %v279_v63 = vmul.f32 %v4578_v57, %v4578_v57  ;;  %v3623_v0 = vpop.f32.mrb[8].mxu0 }
  0xe8   :  { %v246_v1 = vadd.f32 %v245_v62, %v244_v59  ;;  %v299_v2 = vadd.f32 %v298_v60, %v297_v58  ;;  %v4588_v3 = vadd.f32 %v3623_v0, %v4525_v17  ;;  %v195_v4 = vpop.f32.mrb[9].mxu0  ;;  %v302_v10 = vsel %vm40_vm0, %v280_v61, 0.0 }
  0xe9   :  { %v300_v6 = vsel %vm40_vm0, %v279_v63, 0.0  ;;  %v4594_v7 = vadd.f32 %v4525_v17, %v195_v4 }
  0xea   :  { %v301_v8 = vadd.f32 %v300_v6, %v299_v2  ;;  %v248_v9 = vadd.f32 %v247_v5, %v246_v1  ;;  %v282_v11 = vmul.f32 %v4588_v3, %v4588_v3  ;;  %v251_v22 = vsel %vm40_vm0, %v4588_v3, 0.0 }
  0xeb   :  { %v249_v12 = vsel %vm40_vm0, %v4594_v7, 0.0  ;;  %v281_v13 = vmul.f32 %v4594_v7, %v4594_v7  ;;  %v3626_v14 = vpop.f32.mrb[10].mxu0 }
  0xec   :  { %v250_v15 = vadd.f32 %v249_v12, %v248_v9  ;;  %v303_v16 = vadd.f32 %v302_v10, %v301_v8  ;;  %v4604_v18 = vadd.f32 %v3626_v14, %v4525_v17  ;;  %v205_v20 = vpop.f32.mrb[11].mxu0  ;;  %v306_v27 = vsel %vm40_vm0, %v282_v11, 0.0 }
  0xed   :  { %v304_v23 = vsel %vm40_vm0, %v281_v13, 0.0  ;;  %v4610_v24 = vadd.f32 %v4525_v17, %v205_v20 }
  0xee   :  { %v305_v25 = vadd.f32 %v304_v23, %v303_v16  ;;  %v252_v26 = vadd.f32 %v251_v22, %v250_v15  ;;  %v284_v28 = vmul.f32 %v4604_v18, %v4604_v18  ;;  %v255_v38 = vsel %vm40_vm0, %v4604_v18, 0.0 }
  0xef   :  { %v253_v30 = vsel %vm40_vm0, %v4610_v24, 0.0  ;;  %v283_v31 = vmul.f32 %v4610_v24, %v4610_v24  ;;  %v3629_v33 = vpop.f32.mrb[12].mxu0 }
  0xf0   :  { %v254_v34 = vadd.f32 %v253_v30, %v252_v26  ;;  %v307_v35 = vadd.f32 %v306_v27, %v305_v25  ;;  %v4620_v36 = vadd.f32 %v3629_v33, %v4525_v17  ;;  %v215_v37 = vpop.f32.mrb[13].mxu0  ;;  %v310_v45 = vsel %vm40_vm0, %v284_v28, 0.0 }
  0xf1   :  { %v308_v40 = vsel %vm40_vm0, %v283_v31, 0.0  ;;  %v4626_v41 = vadd.f32 %v4525_v17, %v215_v37 }
  0xf2   :  { %v309_v42 = vadd.f32 %v308_v40, %v307_v35  ;;  %v256_v44 = vadd.f32 %v255_v38, %v254_v34  ;;  %v286_v46 = vmul.f32 %v4620_v36, %v4620_v36  ;;  %v259_v55 = vsel %vm40_vm0, %v4620_v36, 0.0 }
  0xf3   :  { %v257_v47 = vsel %vm40_vm0, %v4626_v41, 0.0  ;;  %v285_v48 = vmul.f32 %v4626_v41, %v4626_v41  ;;  %v3632_v49 = vpop.f32.mrb[14].mxu0 }
  0xf4   :  { %v258_v50 = vadd.f32 %v257_v47, %v256_v44  ;;  %v311_v51 = vadd.f32 %v310_v45, %v309_v42  ;;  %v4636_v52 = vadd.f32 %v3632_v49, %v4525_v17  ;;  %v225_v54 = vpop.f32.mrb[15].mxu0  ;;  %v314_v61 = vsel %vm40_vm0, %v286_v46, 0.0 }
  0xf5   :  { %v312_v56 = vsel %vm40_vm0, %v285_v48, 0.0  ;;  %v226_v58 = vadd.f32 %v4525_v17, %v225_v54 }
  0xf6   :  { %v313_v59 = vadd.f32 %v312_v56, %v311_v51  ;;  %v260_v60 = vadd.f32 %v259_v55, %v258_v50  ;;  %v288_v62 = vmul.f32 %v4636_v52, %v4636_v52  ;;  %v263_v4 = vsel %vm40_vm0, %v4636_v52, 0.0  ;;  %v4701_v50 = vld [vmem:[%s5626_s1 + $0xa] ss:$0 sm:$0xff] }
  0xf7   :  { %v261_v63 = vsel %vm40_vm0, %v226_v58, 0.0  ;;  %v287_v0 = vmul.f32 %v226_v58, %v226_v58 }
  0xf8   :  { %v262_v1 = vadd.f32 %v261_v63, %v260_v60  ;;  %v315_v2 = vadd.f32 %v314_v61, %v313_v59  ;;  %v318_v17 = vsel %vm40_vm0, %v288_v62, 0.0 }
  0xf9   :  { %v316_v5 = vsel %vm40_vm0, %v287_v0, 0.0 }
  0xfa   :  { %v264_v6 = vadd.f32 %v263_v4, %v262_v1  ;;  %v317_v8 = vadd.f32 %v316_v5, %v315_v2 }
  0xfc   :  { %v265_v9 = vrot.slane %v264_v6, 4  ;;  %v319_v10 = vadd.f32 %v318_v17, %v317_v8 }
  0xfe   :  { %v266_v11 = vadd.f32 %v265_v9, %v264_v6  ;;  %v320_v12 = vrot.slane %v319_v10, 4 }
 0x100   :  { %v267_v13 = vrot.slane %v266_v11, 2  ;;  %v321_v14 = vadd.f32 %v320_v12, %v319_v10 }
 0x102   :  { %v268_v15 = vadd.f32 %v267_v13, %v266_v11  ;;  %v322_v16 = vrot.slane %v321_v14, 2 }
 0x104   :  { %v269_v20 = vrot.slane %v268_v15, 1  ;;  %v323_v22 = vadd.f32 %v322_v16, %v321_v14 }
 0x106   :  { %v270_v23 = vadd.f32 %v269_v20, %v268_v15  ;;  %v324_v25 = vrot.slane %v323_v22, 1 }
 0x108   :  { %v4650_v26 = vmul.f32 0.0078125, %v270_v23  ;;  %v325_v27 = vadd.f32 %v324_v25, %v323_v22  ;;  %v534_v22 = vld [vmem:[%s5626_s1 + $0x20] sm:$0xff]  ;;  %v535_v23 = vld [vmem:[%s5626_s1 + $0x28] sm:$0xff] }
 0x10a   :  { %v326_v28 = vmul.f32 0.0078125, %v325_v27  ;;  %v327_v30 = vmul.f32 %v4650_v26, %v4650_v26  ;;  %v344_v31 = vsub.f32 %v226_v58, %v4650_v26  ;;  %v338_v33 = vsub.f32 %v4594_v7, %v4650_v26 }
 0x10b   :  { %v330_v34 = vsub.f32 %v4531_v21, %v4650_v26  ;;  %v339_v35 = vsub.f32 %v4588_v3, %v4650_v26  ;;  %v331_v37 = vsub.f32 %v4528_v19, %v4650_v26  ;;  %v333_v38 = vsub.f32 %v4543_v29, %v4650_v26 }
 0x10c   :  { %v328_v40 = vsub.f32 %v326_v28, %v327_v30  ;;  %v332_v42 = vsub.f32 %v4547_v32, %v4650_v26  ;;  %v341_v44 = vsub.f32 %v4604_v18, %v4650_v26  ;;  %v340_v7 = vsub.f32 %v4610_v24, %v4650_v26 }
 0x10d   :  { %v335_v21 = vsub.f32 %v4556_v39, %v4650_v26  ;;  %v334_v3 = vsub.f32 %v4562_v43, %v4650_v26  ;;  %v343_v19 = vsub.f32 %v4620_v36, %v4650_v26  ;;  %v342_v29 = vsub.f32 %v4626_v41, %v4650_v26  ;;  %v532_v43 = vld [vmem:[%s5626_s1 + $0x10] sm:$0xff]  ;;  %v533_v36 = vld [vmem:[%s5626_s1 + $0x18] sm:$0xff] }
 0x10e   :  { %v329_v45 = vmax.f32 %v328_v40, 0.0  ;;  %v337_v32 = vsub.f32 %v4572_v53, %v4650_v26  ;;  %v336_v18 = vsub.f32 %v4578_v57, %v4650_v26  ;;  %v345_v24 = vsub.f32 %v4636_v52, %v4650_v26  ;;  %v4694_v53 = vld [vmem:[%s5626_s1 + $0x9] ss:$0 sm:$0xff] }
 0x10f   :  { %v4016_v41 = vpack.c.bf16 %v533_v36, %v532_v43  ;;  %v4020_v30 = vpack.c.bf16 %v535_v23, %v534_v22 }
 0x110   :  { %v346_v39 = vadd.f32 1e-05, %v329_v45 }
 0x111   :  { %4017 = vmatprep.subr.bf16.mxu1 %v4016_v41 }
 0x112   :  { %4269 = vrsqrt.f32 %v346_v39  ;;  %4019 = vmatpush3.bf16.msra.mxu1 %v4016_v41 }
 0x113   :  { %4021 = vmatprep.subr.bf16.mxu1 %v4020_v30 }
 0x116   :  { %4023 = vmatpush3.bf16.msra.mxu1 %v4020_v30 }
 0x11c   :  { %v4270_v46 = vpop.eup %4269 }
 0x11d   :  { %v4696_v57 = vmul.f32 %v4270_v46, %v344_v31  ;;  %v356_v47 = vmul.f32 %v4270_v46, %v338_v33  ;;  %v348_v48 = vmul.f32 %v4270_v46, %v330_v34  ;;  %v357_v49 = vmul.f32 %v4270_v46, %v339_v35 }
 0x11e   :  { %v349_v51 = vmul.f32 %v4270_v46, %v331_v37  ;;  %v351_v52 = vmul.f32 %v4270_v46, %v333_v38  ;;  %v350_v54 = vmul.f32 %v4270_v46, %v332_v42  ;;  %v359_v55 = vmul.f32 %v4270_v46, %v341_v44 }
 0x11f   :  { %v376_v56 = vmul.f32 %v4694_v53, %v356_v47  ;;  %v368_v58 = vmul.f32 %v4694_v53, %v348_v48  ;;  %v377_v59 = vmul.f32 %v4694_v53, %v357_v49  ;;  %v358_v60 = vmul.f32 %v4270_v46, %v340_v7 }
 0x120   :  { %v369_v61 = vmul.f32 %v4694_v53, %v349_v51  ;;  %v371_v0 = vmul.f32 %v4694_v53, %v351_v52  ;;  %v370_v1 = vmul.f32 %v4694_v53, %v350_v54  ;;  %v353_v8 = vmul.f32 %v4270_v46, %v335_v21  ;;  %v781_v54 = vld [vmem:[%s5627_s0 + $0x90] sm:$0xff] }
 0x121   :  { %v4708_v62 = vadd.f32 %v4701_v50, %v376_v56  ;;  %v388_v63 = vadd.f32 %v4701_v50, %v368_v58  ;;  %v4715_v5 = vadd.f32 %v4701_v50, %v377_v59  ;;  %v352_v17 = vmul.f32 %v4270_v46, %v334_v3  ;;  %v783_v56 = vld [vmem:[%s5627_s0 + $0xa0] sm:$0xff]  ;;  %v784_v58 = vld [vmem:[%s5627_s0 + $0xa8] sm:$0xff]  ;;  %v785_v59 = vld [vmem:[%s5627_s0 + $0xb0] sm:$0xff] }
 0x122   :  { %v389_v6 = vadd.f32 %v4701_v50, %v369_v61  ;;  %v361_v9 = vmul.f32 %v4270_v46, %v343_v19  ;;  %v360_v10 = vmul.f32 %v4270_v46, %v342_v29  ;;  %v355_v11 = vmul.f32 %v4270_v46, %v337_v32 }
 0x123   :  { %v412_v2 = vmax.f32 %v4708_v62, 0.0  ;;  %v404_v4 = vmax.f32 %v388_v63, 0.0  ;;  %v354_v12 = vmul.f32 %v4270_v46, %v336_v18  ;;  %v363_v13 = vmul.f32 %v4270_v46, %v345_v24 }
 0x124   :  { %v413_v14 = vmax.f32 %v4715_v5, 0.0  ;;  %v405_v15 = vmax.f32 %v389_v6, 0.0  ;;  %v391_v16 = vadd.f32 %v4701_v50, %v371_v0  ;;  %v390_v20 = vadd.f32 %v4701_v50, %v370_v1 }
 0x125   :  { %460 = vrot.lane.b32.xlu1 %v412_v2, %s4421_s7  ;;  %428 = vrot.lane.b32.xlu0 %v404_v4, %s4422_s8  ;;  %v379_v27 = vmul.f32 %v4694_v53, %v359_v55  ;;  %v378_v28 = vmul.f32 %v4694_v53, %v358_v60  ;;  %v373_v34 = vmul.f32 %v4694_v53, %v353_v8  ;;  %v782_v55 = vld [vmem:[%s5627_s0 + $0x98] sm:$0xff] }
 0x126   :  { %v407_v25 = vmax.f32 %v391_v16, 0.0  ;;  %v406_v26 = vmax.f32 %v390_v20, 0.0  ;;  %v372_v35 = vmul.f32 %v4694_v53, %v352_v17  ;;  %v381_v21 = vmul.f32 %v4694_v53, %v361_v9  ;;  %v786_v60 = vld [vmem:[%s5627_s0 + $0xb8] sm:$0xff] }
 0x127   :  { %v4740_v31 = vadd.f32 %v4701_v50, %v379_v27  ;;  %v4743_v33 = vadd.f32 %v4701_v50, %v378_v28  ;;  %v393_v40 = vadd.f32 %v4701_v50, %v373_v34  ;;  %v380_v3 = vmul.f32 %v4694_v53, %v360_v10 }
 0x128   :  { %v392_v42 = vadd.f32 %v4701_v50, %v372_v35  ;;  %v4764_v19 = vadd.f32 %v4701_v50, %v381_v21  ;;  %v375_v45 = vmul.f32 %v4694_v53, %v355_v11  ;;  %v374_v32 = vmul.f32 %v4694_v53, %v354_v12 }
 0x129   :  { %462 = vrot.lane.b32.xlu1 %v413_v14, %s4421_s7  ;;  %430 = vrot.lane.b32.xlu0 %v405_v15, %s4422_s8  ;;  %v415_v37 = vmax.f32 %v4740_v31, 0.0  ;;  %v414_v38 = vmax.f32 %v4743_v33, 0.0  ;;  %v409_v44 = vmax.f32 %v393_v40, 0.0  ;;  %v4767_v29 = vadd.f32 %v4701_v50, %v380_v3 }
 0x12a   :  { %v408_v7 = vmax.f32 %v392_v42, 0.0  ;;  %v417_v18 = vmax.f32 %v4764_v19, 0.0  ;;  %v395_v39 = vadd.f32 %v4701_v50, %v375_v45  ;;  %v394_v43 = vadd.f32 %v4701_v50, %v374_v32  ;;  %v827_v19 = vld [vmem:[%s5626_s1 + $0x38] sm:$0xff] }
 0x12b   :  { %v416_v24 = vmax.f32 %v4767_v29, 0.0  ;;  %v383_v46 = vmul.f32 %v4694_v53, %v363_v13  ;;  %v382_v47 = vmul.f32 %v4694_v53, %v4696_v57  ;;  %v779_v53 = vld [vmem:[%s5627_s0 + $0x80] sm:$0xff]  ;;  %v4424_v57 = vmov 0.0  }
 0x12c   :  { %v411_v36 = vmax.f32 %v395_v39, 0.0  ;;  %v410_v41 = vmax.f32 %v394_v43, 0.0  ;;  %v828_v29 = vld [vmem:[%s5626_s1 + $0x40] sm:$0xff] }
 0x12d   :  { %487 = vrot.lane.b32.xlu1 %v407_v25, %s4423_s13  ;;  %485 = vrot.lane.b32.xlu0 %v406_v26, %s4423_s13  ;;  %v403_v48 = vadd.f32 %v4701_v50, %v383_v46  ;;  %v402_v49 = vadd.f32 %v4701_v50, %v382_v47  ;;  %v780_v50 = vld [vmem:[%s5627_s0 + $0x88] sm:$0xff] }
 0x12f   :  { %v419_v51 = vmax.f32 %v403_v48, 0.0  ;;  %v418_v52 = vmax.f32 %v402_v49, 0.0  ;;  %v3337_v48 = vld [vmem:[%s5626_s1 + $0x30] ss:$0 sm:$0xff] }
 0x131   :  { %434 = vrot.lane.b32.xlu1 %v407_v25, %s4422_s8  ;;  %432 = vrot.lane.b32.xlu0 %v406_v26, %s4422_s8 }
 0x135   :  { %466 = vrot.lane.b32.xlu1 %v415_v37, %s4421_s7  ;;  %464 = vrot.lane.b32.xlu0 %v414_v38, %s4421_s7 }
 0x139   :  { %491 = vrot.lane.b32.xlu1 %v409_v44, %s4423_s13  ;;  %489 = vrot.lane.b32.xlu0 %v408_v7, %s4423_s13 }
 0x13d   :  { %438 = vrot.lane.b32.xlu1 %v409_v44, %s4422_s8  ;;  %436 = vrot.lane.b32.xlu0 %v408_v7, %s4422_s8 }
 0x141   :  { %470 = vrot.lane.b32.xlu1 %v417_v18, %s4421_s7  ;;  %468 = vrot.lane.b32.xlu0 %v416_v24, %s4421_s7 }
 0x145   :  { %495 = vrot.lane.b32.xlu1 %v411_v36, %s4423_s13  ;;  %493 = vrot.lane.b32.xlu0 %v410_v41, %s4423_s13 }
 0x149   :  { %442 = vrot.lane.b32.xlu1 %v411_v36, %s4422_s8  ;;  %440 = vrot.lane.b32.xlu0 %v410_v41, %s4422_s8 }
 0x14d   :  { %474 = vrot.lane.b32.xlu1 %v419_v51, %s4421_s7  ;;  %472 = vrot.lane.b32.xlu0 %v418_v52, %s4421_s7 }
 0x151   :  { %497 = vrot.lane.b32.xlu0 %v4424_v57, %s4423_s13  ;;  %795 = vrot.lane.b32.xlu1 %v779_v53, %s4421_s7 }
 0x155   :  { %797 = vrot.lane.b32.xlu0 %v780_v50, %s4421_s7  ;;  %799 = vrot.lane.b32.xlu1 %v781_v54, %s4421_s7 }
 0x159   :  { %801 = vrot.lane.b32.xlu0 %v782_v55, %s4421_s7  ;;  %803 = vrot.lane.b32.xlu1 %v783_v56, %s4421_s7 }
 0x15d   :  { %805 = vrot.lane.b32.xlu0 %v784_v58, %s4421_s7  ;;  %807 = vrot.lane.b32.xlu1 %v785_v59, %s4421_s7 }
 0x161   :  { %809 = vrot.lane.b32.xlu0 %v786_v60, %s4421_s7 }
 0x197   :  { %v461_v61 = vpop.permute.xlu1 %460  ;;  %v429_v63 = vpop.permute.xlu0 %428 }
 0x198   :  { %v506_v4 = vsel %vm40_vm0, 0.0, %v429_v63 }
 0x199   :  { %v515_v10 = vsel %vm514_vm1, %v506_v4, %v461_v61 }
 0x19b   :  { %v463_v0 = vpop.permute.xlu1 %462  ;;  %v431_v1 = vpop.permute.xlu0 %430 }
 0x19c   :  { %v507_v6 = vsel %vm40_vm0, 0.0, %v431_v1 }
 0x19d   :  { %v516_v17 = vsel %vm514_vm1, %v507_v6, %v463_v0 }
 0x19f   :  { %v488_v8 = vpop.permute.xlu1 %487  ;;  %v486_v9 = vpop.permute.xlu0 %485 }
 0x1a0   :  { %v525_v11 = vsel %vm523_vm2, %v516_v17, %v488_v8  ;;  %v524_v12 = vsel %vm523_vm2, %v515_v10, %v486_v9 }
 0x1a1   :  { %3641 = vmatprep.mubr.msk.f32.mxu1 %vm543_vm3, %v524_v12 }
 0x1a2   :  { %3642 = vmatmul.mubr.msk.f32.vlgmr.msra.gmra.mrb[0].mxu1 %vm543_vm3, %v525_v11 }
 0x1a3   :  { %v435_v13 = vpop.permute.xlu1 %434  ;;  %v433_v15 = vpop.permute.xlu0 %432 }
 0x1a4   :  { %v509_v22 = vsel %vm40_vm0, %v413_v14, %v435_v13  ;;  %v508_v23 = vsel %vm40_vm0, %v412_v2, %v433_v15 }
 0x1a7   :  { %v467_v16 = vpop.permute.xlu1 %466  ;;  %v465_v20 = vpop.permute.xlu0 %464 }
 0x1a8   :  { %v518_v25 = vsel %vm514_vm1, %v509_v22, %v467_v16  ;;  %v517_v26 = vsel %vm514_vm1, %v508_v23, %v465_v20 }
 0x1ab   :  { %v492_v27 = vpop.permute.xlu1 %491  ;;  %v490_v28 = vpop.permute.xlu0 %489 }
 0x1ac   :  { %v527_v30 = vsel %vm523_vm2, %v518_v25, %v492_v27  ;;  %v526_v34 = vsel %vm523_vm2, %v517_v26, %v490_v28 }
 0x1ad   :  { %3644 = vmatprep.mubr.msk.f32.mxu1 %vm543_vm3, %v526_v34 }
 0x1ae   :  { %3645 = vmatmul.mubr.msk.f32.gmra.mrb[2].mxu1 %vm543_vm3, %v527_v30 }
 0x1af   :  { %v439_v5 = vpop.permute.xlu1 %438  ;;  %v437_v14 = vpop.permute.xlu0 %436 }
 0x1b0   :  { %v511_v2 = vsel %vm40_vm0, %v415_v37, %v439_v5  ;;  %v510_v40 = vsel %vm40_vm0, %v414_v38, %v437_v14 }
 0x1b3   :  { %v471_v35 = vpop.permute.xlu1 %470  ;;  %v469_v62 = vpop.permute.xlu0 %468 }
 0x1b4   :  { %v520_v42 = vsel %vm514_vm1, %v511_v2, %v471_v35  ;;  %v519_v44 = vsel %vm514_vm1, %v510_v40, %v469_v62 }
 0x1b7   :  { %v496_v7 = vpop.permute.xlu1 %495  ;;  %v494_v21 = vpop.permute.xlu0 %493 }
 0x1b8   :  { %v529_v3 = vsel %vm523_vm2, %v520_v42, %v496_v7  ;;  %v528_v45 = vsel %vm523_vm2, %v519_v44, %v494_v21 }
 0x1b9   :  { %3647 = vmatprep.mubr.msk.f32.mxu1 %vm543_vm3, %v528_v45 }
 0x1ba   :  { %3648 = vmatmul.mubr.msk.f32.gmra.mrb[4].mxu1 %vm543_vm3, %v529_v3 }
 0x1bb   :  { %v443_v31 = vpop.permute.xlu1 %442  ;;  %v441_v37 = vpop.permute.xlu0 %440 }
 0x1bc   :  { %v513_v38 = vsel %vm40_vm0, %v417_v18, %v443_v31  ;;  %v512_v39 = vsel %vm40_vm0, %v416_v24, %v441_v37  ;;  %v4024_v18 = vpack.c.bf16 %v828_v29, %v827_v19  ;;  %v829_v24 = vld [vmem:[%s5626_s1 + $0x48] sm:$0xff] }
 0x1be   :  { %4025 = vmatprep.subr.bf16.mxu1 %v4024_v18 }
 0x1bf   :  { %v473_v32 = vpop.permute.xlu0 %472  ;;  %v475_v33 = vpop.permute.xlu1 %474  ;;  %4027 = vmatpush3.bf16.msra.mxu1 %v4024_v18 }
 0x1c0   :  { %v522_v43 = vsel %vm514_vm1, %v513_v38, %v475_v33  ;;  %v521_v36 = vsel %vm514_vm1, %v512_v39, %v473_v32  ;;  %3657 = vmatprep.subr.mxu1 %v829_v24 }
 0x1c3   :  { %v498_v41 = vpop.permute.xlu0 %497  ;;  %3658 = vmatpush3.msra.mxu1 %v829_v24 }
 0x1c4   :  { %v530_v46 = vsel %vm523_vm2, %v521_v36, %v498_v41  ;;  %v531_v47 = vsel %vm523_vm2, %v522_v43, %v498_v41 }
 0x1c5   :  { %3650 = vmatprep.mubr.msk.f32.mxu1 %vm543_vm3, %v530_v46 }
 0x1c6   :  { %3651 = vmatmul.mubr.msk.f32.gmra.mrb[6].mxu1 %vm543_vm3, %v531_v47 }
 0x275   :  { %v3643_v49 = vpop.f32.mrb[0].mxu1 }
 0x276   :  { %v4884_v51 = vadd.f32 %v3643_v49, %v3337_v48  ;;  %v634_v52 = vpop.f32.mrb[1].mxu1 }
 0x277   :  { %v4886_v53 = vadd.f32 %v3337_v48, %v634_v52 }
 0x278   :  { %v674_v50 = vsel %vm514_vm1, %v4884_v51, 0.0  ;;  %v697_v54 = vmul.f32 %v4884_v51, %v4884_v51 }
 0x279   :  { %v673_v55 = vsel %vm514_vm1, %v4886_v53, 0.0  ;;  %v696_v56 = vmul.f32 %v4886_v53, %v4886_v53 }
 0x27a   :  { %v705_v58 = vsel %vm514_vm1, %v697_v54, 0.0  ;;  %v675_v59 = vadd.f32 %v674_v50, %v673_v55 }
 0x27b   :  { %v704_v60 = vsel %vm514_vm1, %v696_v56, 0.0 }
 0x27c   :  { %v706_v61 = vadd.f32 %v705_v58, %v704_v60 }
 0x281   :  { %v3646_v63 = vpop.f32.mrb[2].mxu1 }
 0x282   :  { %v4898_v0 = vadd.f32 %v3646_v63, %v3337_v48  ;;  %v644_v1 = vpop.f32.mrb[3].mxu1 }
 0x283   :  { %v4900_v4 = vadd.f32 %v3337_v48, %v644_v1 }
 0x284   :  { %v699_v6 = vmul.f32 %v4898_v0, %v4898_v0  ;;  %v678_v10 = vsel %vm514_vm1, %v4898_v0, 0.0 }
 0x285   :  { %v676_v8 = vsel %vm514_vm1, %v4900_v4, 0.0  ;;  %v698_v17 = vmul.f32 %v4900_v4, %v4900_v4 }
 0x286   :  { %v677_v9 = vadd.f32 %v676_v8, %v675_v59  ;;  %v709_v15 = vsel %vm514_vm1, %v699_v6, 0.0 }
 0x287   :  { %v707_v11 = vsel %vm514_vm1, %v698_v17, 0.0 }
 0x288   :  { %v708_v12 = vadd.f32 %v707_v11, %v706_v61  ;;  %v679_v13 = vadd.f32 %v678_v10, %v677_v9  ;;  %v796_v11 = vpop.permute.xlu1 %795 }
 0x28a   :  { %v710_v16 = vadd.f32 %v709_v15, %v708_v12  ;;  %v798_v15 = vpop.permute.xlu0 %797 }
 0x28d   :  { %v3649_v20 = vpop.f32.mrb[4].mxu1 }
 0x28e   :  { %v4912_v22 = vadd.f32 %v3649_v20, %v3337_v48  ;;  %v654_v23 = vpop.f32.mrb[5].mxu1 }
 0x28f   :  { %v4914_v25 = vadd.f32 %v3337_v48, %v654_v23 }
 0x290   :  { %v701_v26 = vmul.f32 %v4912_v22, %v4912_v22  ;;  %v682_v34 = vsel %vm514_vm1, %v4912_v22, 0.0 }
 0x291   :  { %v680_v27 = vsel %vm514_vm1, %v4914_v25, 0.0  ;;  %v700_v28 = vmul.f32 %v4914_v25, %v4914_v25 }
 0x292   :  { %v681_v30 = vadd.f32 %v680_v27, %v679_v13  ;;  %v713_v62 = vsel %vm514_vm1, %v701_v26, 0.0 }
 0x293   :  { %v711_v5 = vsel %vm514_vm1, %v700_v28, 0.0 }
 0x294   :  { %v712_v14 = vadd.f32 %v711_v5, %v710_v16  ;;  %v683_v35 = vadd.f32 %v682_v34, %v681_v30  ;;  %v3347_v16 = vld [vmem:[%s5626_s1 + $0x32] ss:$0 sm:$0xff]  ;;  %v800_v30 = vpop.permute.xlu1 %799 }
 0x296   :  { %v714_v2 = vadd.f32 %v713_v62, %v712_v14 }
 0x299   :  { %v3652_v40 = vpop.f32.mrb[6].mxu1 }
 0x29a   :  { %v670_v42 = vadd.f32 %v3652_v40, %v3337_v48  ;;  %v664_v44 = vpop.f32.mrb[7].mxu1 }
 0x29b   :  { %v665_v7 = vadd.f32 %v3337_v48, %v664_v44 }
 0x29c   :  { %v703_v21 = vmul.f32 %v670_v42, %v670_v42  ;;  %v686_v37 = vsel %vm514_vm1, %v670_v42, 0.0 }
 0x29d   :  { %v684_v3 = vsel %vm514_vm1, %v665_v7, 0.0  ;;  %v702_v45 = vmul.f32 %v665_v7, %v665_v7 }
 0x29e   :  { %v685_v31 = vadd.f32 %v684_v3, %v683_v35  ;;  %v717_v39 = vsel %vm514_vm1, %v703_v21, 0.0  ;;  %v802_v3 = vpop.permute.xlu0 %801 }
 0x29f   :  { %v715_v32 = vsel %vm514_vm1, %v702_v45, 0.0 }
 0x2a0   :  { %v687_v33 = vadd.f32 %v686_v37, %v685_v31  ;;  %v716_v38 = vadd.f32 %v715_v32, %v714_v2 }
 0x2a2   :  { %v688_v43 = vrot.slane %v687_v33, 4  ;;  %v718_v36 = vadd.f32 %v717_v39, %v716_v38 }
 0x2a4   :  { %v689_v41 = vadd.f32 %v688_v43, %v687_v33  ;;  %v719_v46 = vrot.slane %v718_v36, 4  ;;  %v804_v33 = vpop.permute.xlu1 %803 }
 0x2a6   :  { %v690_v47 = vrot.slane %v689_v41, 2  ;;  %v720_v19 = vadd.f32 %v719_v46, %v718_v36  ;;  %v806_v46 = vpop.permute.xlu0 %805 }
 0x2a8   :  { %v691_v29 = vadd.f32 %v690_v47, %v689_v41  ;;  %v721_v18 = vrot.slane %v720_v19, 2 }
 0x2aa   :  { %v692_v24 = vrot.slane %v691_v29, 1  ;;  %v722_v48 = vadd.f32 %v721_v18, %v720_v19 }
 0x2ac   :  { %v693_v49 = vadd.f32 %v692_v24, %v691_v29  ;;  %v723_v52 = vrot.slane %v722_v48, 1 }
 0x2ae   :  { %v695_v50 = vmul.f32 0.015625, %v693_v49  ;;  %v724_v54 = vadd.f32 %v723_v52, %v722_v48  ;;  %v808_v48 = vpop.permute.xlu1 %807 }
 0x2b0   :  { %v725_v55 = vmul.f32 0.015625, %v724_v54  ;;  %v726_v56 = vmul.f32 %v695_v50, %v695_v50  ;;  %v735_v58 = vsub.f32 %v665_v7, %v695_v50  ;;  %v729_v59 = vsub.f32 %v4886_v53, %v695_v50  ;;  %v3346_v53 = vld [vmem:[%s5626_s1 + $0x31] ss:$0 sm:$0xff]  ;;  %v810_v54 = vpop.permute.xlu0 %809 }
 0x2b1   :  { %v730_v60 = vsub.f32 %v4884_v51, %v695_v50  ;;  %v731_v61 = vsub.f32 %v4900_v4, %v695_v50  ;;  %v732_v63 = vsub.f32 %v4898_v0, %v695_v50  ;;  %v733_v1 = vsub.f32 %v4914_v25, %v695_v50 }
 0x2b2   :  { %v727_v6 = vsub.f32 %v725_v55, %v726_v56  ;;  %v734_v8 = vsub.f32 %v4912_v22, %v695_v50  ;;  %v736_v17 = vsub.f32 %v670_v42, %v695_v50  ;;  %v3348_v56 = vld [vmem:[%s5626_s1 + $0x50] ss:$0 sm:$0xff] }
 0x2b4   :  { %v728_v9 = vmax.f32 %v727_v6, 0.0 }
 0x2b6   :  { %v737_v10 = vadd.f32 1e-05, %v728_v9 }
 0x2b8   :  { %4271 = vrsqrt.f32 %v737_v10 }
 0x2c2   :  { %v4272_v12 = vpop.eup %4271 }
 0x2c3   :  { %v745_v51 = vmul.f32 %v4272_v12, %v735_v58  ;;  %v739_v13 = vmul.f32 %v4272_v12, %v729_v59  ;;  %v740_v4 = vmul.f32 %v4272_v12, %v730_v60  ;;  %v741_v0 = vmul.f32 %v4272_v12, %v731_v61 }
 0x2c4   :  { %v742_v20 = vmul.f32 %v4272_v12, %v732_v63  ;;  %v743_v22 = vmul.f32 %v4272_v12, %v733_v1  ;;  %v744_v23 = vmul.f32 %v4272_v12, %v734_v8  ;;  %v746_v25 = vmul.f32 %v4272_v12, %v736_v17 }
 0x2c5   :  { %v751_v26 = vmul.f32 %v3346_v53, %v739_v13  ;;  %v752_v27 = vmul.f32 %v3346_v53, %v740_v4  ;;  %v753_v28 = vmul.f32 %v3346_v53, %v741_v0  ;;  %v757_v42 = vmul.f32 %v3346_v53, %v745_v51 }
 0x2c6   :  { %v754_v34 = vmul.f32 %v3346_v53, %v742_v20  ;;  %v755_v5 = vmul.f32 %v3346_v53, %v743_v22  ;;  %v756_v40 = vmul.f32 %v3346_v53, %v744_v23  ;;  %v758_v39 = vmul.f32 %v3346_v53, %v746_v25 }
 0x2c7   :  { %v763_v14 = vadd.f32 %v3347_v16, %v751_v26  ;;  %v764_v35 = vadd.f32 %v3347_v16, %v752_v27  ;;  %v765_v62 = vadd.f32 %v3347_v16, %v753_v28  ;;  %v769_v41 = vadd.f32 %v3347_v16, %v757_v42 }
 0x2c8   :  { %v766_v2 = vadd.f32 %v3347_v16, %v754_v34  ;;  %v767_v45 = vadd.f32 %v3347_v16, %v755_v5  ;;  %v768_v38 = vadd.f32 %v3347_v16, %v756_v40  ;;  %v770_v29 = vadd.f32 %v3347_v16, %v758_v39  ;;  %v1186_v39 = vld [vmem:[%s5629_s2 + $0x28] sm:$0xff] }
 0x2c9   :  { %v771_v44 = vmax.f32 %v763_v14, 0.0  ;;  %v772_v7 = vmax.f32 %v764_v35, 0.0  ;;  %v773_v21 = vmax.f32 %v765_v62, 0.0  ;;  %v777_v24 = vmax.f32 %v769_v41, 0.0 }
 0x2ca   :  { %v774_v32 = vmax.f32 %v766_v2, 0.0  ;;  %v775_v36 = vmax.f32 %v767_v45, 0.0  ;;  %v776_v19 = vmax.f32 %v768_v38, 0.0  ;;  %v778_v52 = vmax.f32 %v770_v29, 0.0  ;;  %v1097_v45 = vld [vmem:[%s5629_s2 + $0x18] sm:$0xff] }
 0x2cb   :  { %v819_v31 = vsel %vm514_vm1, %v771_v44, %v796_v11  ;;  %v820_v37 = vsel %vm514_vm1, %v772_v7, %v798_v15  ;;  %v821_v43 = vsel %vm514_vm1, %v773_v21, %v800_v30  ;;  %v825_v50 = vsel %vm514_vm1, %v777_v24, %v808_v48  ;;  %v1094_v44 = vld [vmem:[%s5629_s2] sm:$0xff]  ;;  %v1095_v7 = vld [vmem:[%s5629_s2 + $0x8] sm:$0xff]  ;;  %v1096_v21 = vld [vmem:[%s5629_s2 + $0x10] sm:$0xff] }
 0x2cc   :  { %3659 = vmatprep.mubr.msk.f32.mxu1 %vm523_vm2, %v819_v31  ;;  %v822_v47 = vsel %vm514_vm1, %v774_v32, %v802_v3  ;;  %v823_v18 = vsel %vm514_vm1, %v775_v36, %v804_v33  ;;  %v824_v49 = vsel %vm514_vm1, %v776_v19, %v806_v46  ;;  %v826_v55 = vsel %vm514_vm1, %v778_v52, %v810_v54  ;;  %v1098_v46 = vld [vmem:[%s5629_s2 + $0x20] sm:$0xff]  ;;  %v974_v19 = vld [vmem:[%s5627_s0 + $0xd0] sm:$0xff]  ;;  %v1188_v48 = vld [vmem:[%s5629_s2 + $0x38] sm:$0xff] }
 0x2cd   :  { %3660 = vmatmul.mubr.msk.f32.vlgmr.msra.gmra.mrb[8].mxu1 %vm523_vm2, %v820_v37  ;;  %v4028_v3 = vpack.c.bf16 %v1095_v7, %v1094_v44  ;;  %v4032_v37 = vpack.c.bf16 %v1097_v45, %v1096_v21  ;;  %v4426_v36 = vmov 0.0|0.0  }
 0x2ce   :  { %3662 = vmatprep.mubr.msk.f32.mxu1 %vm523_vm2, %v821_v43  ;;  %v1187_v43 = vld [vmem:[%s5629_s2 + $0x30] sm:$0xff]  ;;  %4036 = vmatprep.subr.bf16.mxu1 %v4426_v36 }
 0x2cf   :  { %4029 = vmatprep.subr.bf16.mxu0 %v4028_v3  ;;  %v5044_v41 = vpack.c.bf16 %v1187_v43, %v1186_v39 }
 0x2d0   :  { %4031 = vmatpush3.bf16.msra.mxu0 %v4028_v3 }
 0x2d1   :  { %3663 = vmatmul.mubr.msk.f32.gmra.mrb[10].mxu1 %vm523_vm2, %v822_v47  ;;  %4033 = vmatprep.subr.bf16.mxu0 %v4032_v37  ;;  %v975_v47 = vld [vmem:[%s5627_s0 + $0xd8] sm:$0xff] }
 0x2d2   :  { %3665 = vmatprep.mubr.msk.f32.mxu1 %vm523_vm2, %v823_v18  ;;  %4038 = vmatpush3.bf16.msra.mxu1 %v5044_v41 }
 0x2d3   :  { %4039 = vmatprep.subr.bf16.mxu1 %v4426_v36 }
 0x2d4   :  { %4035 = vmatpush3.bf16.msra.mxu0 %v4032_v37 }
 0x2d5   :  { %3666 = vmatmul.mubr.msk.f32.gmra.mrb[12].mxu1 %vm523_vm2, %v824_v49  ;;  %3679 = vmatprep.subr.mxu0 %v1098_v46  ;;  %v1189_v49 = vld [vmem:[%s5629_s2 + $0x40] sm:$0xff] }
 0x2d6   :  { %3668 = vmatprep.mubr.msk.f32.mxu1 %vm523_vm2, %v825_v50  ;;  %v977_v50 = vld [vmem:[%s5627_s0 + $0xe8] sm:$0xff]  ;;  %v5067_v54 = vpack.c.bf16 %v1189_v49, %v1188_v48 }
 0x2d8   :  { %3680 = vmatpush3.msra.mxu0 %v1098_v46  ;;  %4041 = vmatpush3.bf16.msra.mxu1 %v5067_v54 }
 0x2d9   :  { %3669 = vmatmul.mubr.msk.f32.gmra.mrb[14].mxu1 %vm523_vm2, %v826_v55  ;;  %4042 = vmatprep.subr.bf16.mxu0 %v4426_v36 }
 0x2da   :  { %4054 = vmatprep.subr.bf16.mxu1 %v4426_v36  ;;  %3692 = vmatprep.mubr.msk.f32.mxu1 %vm4427_vm4, %v4424_v57 }
 0x2dd   :  { %3693 = vmatmul.mubr.f32.vlgmr.msra.gmra.mrb[16].mxu1 %v4424_v57 }
 0x2de   :  { %4056 = vmatpush3.bf16.msra.mxu1 %v5044_v41  ;;  %3722 = vmatprep.mubr.msk.f32.mxu1 %vm4427_vm4, %v4424_v57 }
 0x2df   :  { %4057 = vmatprep.subr.bf16.mxu1 %v4426_v36 }
 0x2e2   :  { %4059 = vmatpush3.bf16.msra.mxu1 %v5067_v54 }
 0x2e3   :  { %4060 = vmatprep.subr.bf16.mxu1 %v4426_v36 }
 0x3a0   :  { %v3661_v58 = vpop.f32.mrb[8].mxu1 }
 0x3a1   :  { %v4961_v59 = vadd.f32 %v3661_v58, %v3348_v56  ;;  %v925_v60 = vpop.f32.mrb[9].mxu1 }
 0x3a2   :  { %v4963_v61 = vadd.f32 %v3348_v56, %v925_v60 }
 0x3a3   :  { %965 = vst.msk [vmem:[%s5628_s3 + $0x8] sm:$0xff] %vm514_vm1, %v4961_v59  ;;  %v981_v26 = vmul.f32 0.5, %v4961_v59 }
 0x3a4   :  { %964 = vst.msk [vmem:[%s5628_s3] sm:$0xff] %vm514_vm1, %v4963_v61  ;;  %v3664_v63 = vpop.f32.mrb[10].mxu1  ;;  %v980_v28 = vmul.f32 0.5, %v4963_v61 }
 0x3a5   :  { %v4975_v1 = vadd.f32 %v3664_v63, %v3348_v56  ;;  %v935_v6 = vpop.f32.mrb[11].mxu1  ;;  %v990_v14 = vmul.f32 1.442695, %v981_v26  ;;  %v973_v26 = vld [vmem:[%s5627_s0 + $0xc8] sm:$0xff] }
 0x3a6   :  { %v4977_v8 = vadd.f32 %v3348_v56, %v935_v6  ;;  %v988_v35 = vmul.f32 1.442695, %v980_v28 }
 0x3a7   :  { %967 = vst.msk [vmem:[%s5628_s3 + $0x18] sm:$0xff] %vm514_vm1, %v4975_v1  ;;  %v983_v17 = vmul.f32 0.5, %v4975_v1 }
 0x3a8   :  { %966 = vst.msk [vmem:[%s5628_s3 + $0x10] sm:$0xff] %vm514_vm1, %v4977_v8  ;;  %v982_v9 = vmul.f32 0.5, %v4977_v8  ;;  %v3667_v10 = vpop.f32.mrb[12].mxu1 }
 0x3a9   :  { %v994_v11 = vmul.f32 1.442695, %v983_v17  ;;  %v4991_v12 = vadd.f32 %v3667_v10, %v3348_v56  ;;  %v945_v53 = vpop.f32.mrb[13].mxu1 }
 0x3aa   :  { %v992_v51 = vmul.f32 1.442695, %v982_v9  ;;  %v4993_v13 = vadd.f32 %v3348_v56, %v945_v53 }
 0x3ab   :  { %4273 = vpow2.f32 %v994_v11  ;;  %969 = vst.msk [vmem:[%s5628_s3 + $0x28] sm:$0xff] %vm514_vm1, %v4991_v12  ;;  %v985_v4 = vmul.f32 0.5, %v4991_v12 }
 0x3ac   :  { %4275 = vpow2.f32 %v992_v51  ;;  %968 = vst.msk [vmem:[%s5628_s3 + $0x20] sm:$0xff] %vm514_vm1, %v4993_v13  ;;  %v984_v15 = vmul.f32 0.5, %v4993_v13  ;;  %v3670_v0 = vpop.f32.mrb[14].mxu1 }
 0x3ad   :  { %v998_v16 = vmul.f32 1.442695, %v985_v4  ;;  %v5007_v20 = vadd.f32 %v3670_v0, %v3348_v56  ;;  %v955_v22 = vpop.f32.mrb[15].mxu1  ;;  %v1052_v0 = vld [vmem:[%s5627_s0 + $0x100] sm:$0xff] }
 0x3ae   :  { %v996_v23 = vmul.f32 1.442695, %v984_v15  ;;  %v5009_v25 = vadd.f32 %v3348_v56, %v955_v22  ;;  %v976_v56 = vld [vmem:[%s5627_s0 + $0xe0] sm:$0xff]  ;;  %v1053_v15 = vld [vmem:[%s5627_s0 + $0x108] sm:$0xff] }
 0x3af   :  { %4277 = vpow2.f32 %v998_v16  ;;  %971 = vst.msk [vmem:[%s5628_s3 + $0x38] sm:$0xff] %vm514_vm1, %v5007_v20  ;;  %v987_v27 = vmul.f32 0.5, %v5007_v20 }
 0x3b0   :  { %4279 = vpow2.f32 %v996_v23  ;;  %970 = vst.msk [vmem:[%s5628_s3 + $0x30] sm:$0xff] %vm514_vm1, %v5009_v25  ;;  %v986_v30 = vmul.f32 0.5, %v5009_v25 }
 0x3b1   :  { %v1002_v34 = vmul.f32 1.442695, %v987_v27 }
 0x3b2   :  { %v1000_v5 = vmul.f32 1.442695, %v986_v30 }
 0x3b3   :  { %4281 = vpow2.f32 %v1002_v34 }
 0x3b4   :  { %4283 = vpow2.f32 %v1000_v5 }
 0x3b5   :  { %v4274_v62 = vpop.eup %4273  ;;  %4285 = vpow2.f32 %v990_v14 }
 0x3b6   :  { %v4276_v2 = vpop.eup %4275  ;;  %1018 = vrot.lane.b32.xlu0 %v4274_v62, %s4425_s14  ;;  %4287 = vpow2.f32 %v988_v35 }
 0x3b7   :  { %1016 = vrot.lane.b32.xlu1 %v4276_v2, %s4425_s14 }
 0x3b9   :  { %v4278_v40 = vpop.eup %4277 }
 0x3ba   :  { %v4280_v42 = vpop.eup %4279  ;;  %1022 = vrot.lane.b32.xlu0 %v4278_v40, %s4425_s14 }
 0x3bb   :  { %1020 = vrot.lane.b32.xlu1 %v4280_v42, %s4425_s14 }
 0x3bd   :  { %v4282_v31 = vpop.eup %4281 }
 0x3be   :  { %v4284_v32 = vpop.eup %4283  ;;  %1026 = vrot.lane.b32.xlu0 %v4282_v31, %s4425_s14 }
 0x3bf   :  { %1024 = vrot.lane.b32.xlu1 %v4284_v32, %s4425_s14  ;;  %v4286_v33 = vpop.eup %4285  ;;  %v3357_v32 = vld [vmem:[%s5629_s2 + $0x88] ss:$0 sm:$0xff] }
 0x3c0   :  { %v4288_v38 = vpop.eup %4287 }
 0x3c2   :  { %1014 = vrot.lane.b32.xlu0 %v4286_v33, %s4425_s14 }
 0x3c3   :  { %1012 = vrot.lane.b32.xlu1 %v4288_v38, %s4425_s14 }
 0x428   :  { %v1019_v29 = vpop.permute.xlu0 %1018 }
 0x429   :  { %v1039_v18 = vmul.f32 %v1019_v29, %v975_v47  ;;  %v1017_v24 = vpop.permute.xlu1 %1016 }
 0x42a   :  { %v1038_v52 = vmul.f32 %v1017_v24, %v974_v19 }
 0x42b   :  { %v1047_v55 = vadd.f32 %v1039_v18, %v4975_v1  ;;  %v979_v1 = vld [vmem:[%s5627_s0 + $0xf8] sm:$0xff] }
 0x42c   :  { %v1046_v58 = vadd.f32 %v1038_v52, %v4977_v8  ;;  %v1023_v60 = vpop.permute.xlu0 %1022  ;;  %v978_v8 = vld [vmem:[%s5627_s0 + $0xf0] sm:$0xff] }
 0x42d   :  { %v1041_v63 = vmul.f32 %v1023_v60, %v977_v50  ;;  %v1021_v6 = vpop.permute.xlu1 %1020  ;;  %1058 = vrot.lane.b32.xlu0 %v1047_v55, %s4422_s8  ;;  %v1192_v60 = vld [vmem:[%s5629_s2 + $0x58] sm:$0xff] }
 0x42e   :  { %v1040_v17 = vmul.f32 %v1021_v6, %v976_v56  ;;  %1056 = vrot.lane.b32.xlu1 %v1046_v58, %s4422_s8  ;;  %v1190_v56 = vld [vmem:[%s5629_s2 + $0x48] sm:$0xff]  ;;  %v1191_v58 = vld [vmem:[%s5629_s2 + $0x50] sm:$0xff]  ;;  %v1193_v6 = vld [vmem:[%s5629_s2 + $0x60] sm:$0xff] }
 0x42f   :  { %v1049_v9 = vadd.f32 %v1041_v63, %v4991_v12  ;;  %v5149_v63 = vpack.c.bf16 %v1191_v58, %v1190_v56 }
 0x430   :  { %v1048_v10 = vadd.f32 %v1040_v17, %v4993_v13  ;;  %v1027_v11 = vpop.permute.xlu0 %1026  ;;  %v5155_v17 = vpack.c.bf16 %v1193_v6, %v1192_v60 }
 0x431   :  { %v1043_v53 = vmul.f32 %v1027_v11, %v979_v1  ;;  %v1025_v51 = vpop.permute.xlu1 %1024  ;;  %1066 = vrot.lane.b32.xlu0 %v1049_v9, %s4421_s7  ;;  %v1194_v1 = vld [vmem:[%s5629_s2 + $0x68] sm:$0xff]  ;;  %v1195_v9 = vld [vmem:[%s5629_s2 + $0x70] sm:$0xff]  ;;  %v1197_v11 = vld [vmem:[%s5629_s2 + $0x80] sm:$0xff] }
 0x432   :  { %v1042_v4 = vmul.f32 %v1025_v51, %v978_v8  ;;  %1064 = vrot.lane.b32.xlu1 %v1048_v10, %s4421_s7  ;;  %v5165_v8 = vpack.c.bf16 %v1195_v9, %v1194_v1  ;;  %v1196_v10 = vld [vmem:[%s5629_s2 + $0x78] sm:$0xff] }
 0x433   :  { %v1051_v12 = vadd.f32 %v1043_v53, %v5007_v20  ;;  %v5176_v51 = vpack.c.bf16 %v1197_v11, %v1196_v10 }
 0x434   :  { %v1050_v13 = vadd.f32 %v1042_v4, %v5009_v25  ;;  %v1015_v16 = vpop.permute.xlu0 %1014  ;;  %v972_v25 = vld [vmem:[%s5627_s0 + $0xc0] sm:$0xff] }
 0x435   :  { %1074 = vrot.lane.b32.xlu0 %v1051_v12, %s4423_s13  ;;  %v1013_v20 = vpop.permute.xlu1 %1012  ;;  %v1037_v34 = vmul.f32 %v1015_v16, %v973_v26 }
 0x436   :  { %1072 = vrot.lane.b32.xlu1 %v1050_v13, %s4423_s13  ;;  %v1036_v28 = vmul.f32 %v1013_v20, %v972_v25 }
 0x437   :  { %v1045_v62 = vadd.f32 %v1037_v34, %v4961_v59  ;;  %v1267_v59 = vpop.f32.mrb[16].mxu1 }
 0x438   :  { %v1044_v14 = vadd.f32 %v1036_v28, %v4963_v61  ;;  %v3694_v37 = vpop.f32.mrb[17].mxu1 }
 0x439   :  { %1082 = vrot.lane.b32.xlu0 %v1053_v15, %s4428_s22 }
 0x43a   :  { %1080 = vrot.lane.b32.xlu1 %v1052_v0, %s4428_s22  ;;  %v5204_v0 = vld [vmem:[%s5629_s2 + $0x89] ss:$0 sm:$0xff] }
 0x49f   :  { %v1059_v22 = vpop.permute.xlu0 %1058 }
 0x4a0   :  { %v1057_v23 = vpop.permute.xlu1 %1056  ;;  %v1087_v40 = vsel %vm40_vm0, %v1045_v62, %v1059_v22 }
 0x4a1   :  { %v1086_v2 = vsel %vm40_vm0, %v1044_v14, %v1057_v23 }
 0x4a3   :  { %v1067_v27 = vpop.permute.xlu0 %1066 }
 0x4a4   :  { %v1065_v30 = vpop.permute.xlu1 %1064  ;;  %v1089_v7 = vsel %vm514_vm1, %v1087_v40, %v1067_v27 }
 0x4a5   :  { %v1088_v42 = vsel %vm514_vm1, %v1086_v2, %v1065_v30 }
 0x4a7   :  { %v1075_v5 = vpop.permute.xlu0 %1074 }
 0x4a8   :  { %v1073_v35 = vpop.permute.xlu1 %1072  ;;  %v1091_v45 = vsel %vm523_vm2, %v1089_v7, %v1075_v5 }
 0x4a9   :  { %v1090_v21 = vsel %vm523_vm2, %v1088_v42, %v1073_v35 }
 0x4ab   :  { %v1083_v44 = vpop.permute.xlu0 %1082 }
 0x4ac   :  { %v1081_v3 = vpop.permute.xlu1 %1080  ;;  %v1093_v31 = vsel %vm543_vm3, %v1091_v45, %v1083_v44 }
 0x4ad   :  { %v1092_v61 = vsel %vm543_vm3, %v1090_v21, %v1081_v3 }
 0x4ae   :  { %3681 = vmatprep.mubr.msk.f32.mxu0 %vm1104_vm5, %v1092_v61 }
 0x4af   :  { %3682 = vmatmul.mubr.msk.f32.vlgmr.msra.gmra.mrb[16].mxu0 %vm1104_vm5, %v1093_v31 }
 0x4b0   :  { %3711 = vmatprep.mubr.msk.f32.mxu0 %vm4427_vm4, %v4424_v57  ;;  %4044 = vmatpush3.bf16.msra.mxu0 %v5149_v63 }
 0x4b1   :  { %4045 = vmatprep.subr.bf16.mxu0 %v4426_v36 }
 0x4b4   :  { %4047 = vmatpush3.bf16.msra.mxu0 %v5155_v17 }
 0x4b5   :  { %4048 = vmatprep.subr.bf16.mxu0 %v4426_v36 }
 0x4b8   :  { %4050 = vmatpush3.bf16.msra.mxu0 %v5165_v8 }
 0x4b9   :  { %4051 = vmatprep.subr.bf16.mxu0 %v4426_v36 }
 0x4bc   :  { %4053 = vmatpush3.bf16.msra.mxu0 %v5176_v51 }
 0x4bd   :  { %4072 = vmatprep.subr.bf16.mxu0 %v4426_v36 }
 0x582   :  { %v3683_v33 = vpop.f32.mrb[16].mxu0 }
 0x583   :  { %v5130_v38 = vadd.f32 %v3683_v33, %v3357_v32  ;;  %v1177_v39 = vpop.f32.mrb[17].mxu0 }
 0x584   :  { %v5132_v43 = vadd.f32 %v3357_v32, %v1177_v39 }
 0x586   :  { %v1271_v46 = vadd.f32 %v1267_v59, %v5132_v43 }
 0x588   :  { %4289 = vtanh.f32 %v1271_v46  ;;  %v3360_v19 = vmul.f32 -1.442695, %v1271_v46 }
 0x58a   :  { %4291 = vpow2.f32 %v3360_v19 }
 0x592   :  { %v4290_v47 = vpop.eup %4289 }
 0x593   :  { %1281 = vrot.lane.b32.xlu1 %v4290_v47, %s4429_s27 }
 0x594   :  { %v4292_v29 = vpop.eup %4291 }
 0x595   :  { %v1275_v18 = vadd.f32 1.0, %v4292_v29 }
 0x597   :  { %4293 = vrcp.f32 %v1275_v18 }
 0x5a1   :  { %v4294_v24 = vpop.eup %4293 }
 0x5a2   :  { %v1279_v52 = vmul.f32 0.0, %v4294_v24 }
 0x605   :  { %v1282_v48 = vpop.permute.xlu1 %1281 }
 0x606   :  { %v1284_v49 = vmul.f32 %v4294_v24, %v1282_v48 }
 0x608   :  { %1286 = vrot.lane.b32.xlu0 %v1284_v49, %s4428_s22 }
 0x67a   :  { %v1287_v50 = vpop.permute.xlu0 %1286 }
 0x67b   :  { %v5137_v55 = vadd.f32 %v1287_v50, %v1279_v52 }
 0x67d   :  { %4295 = vtanh.f32 %v5137_v55  ;;  %v1493_v45 = vrot.slane %v5137_v55, 6 }
 0x687   :  { %v4296_v53 = vpop.eup %4295 }
 0x688   :  { %1292 = vrot.lane.b32.xlu1 %v4296_v53, %s4429_s27 }
 0x6fa   :  { %v1293_v4 = vpop.permute.xlu1 %1292 }
 0x6fb   :  { %v1295_v12 = vmul.f32 %v4294_v24, %v1293_v4 }
 0x6fd   :  { %1297 = vrot.lane.b32.xlu0 %v1295_v12, %s4428_s22 }
 0x76f   :  { %v1298_v13 = vpop.permute.xlu0 %1297 }
 0x770   :  { %v1300_v15 = vsel %vm543_vm3, %v1298_v13, 0.0  ;;  %3723 = vmatmul.mubr.msk.f32.vlgmr.msra.gmra.mrb[18].mxu1 %vm543_vm3, %v1298_v13 }
 0x771   :  { %3712 = vmatmul.mubr.msk.f32.vlgmr.msra.gmra.mrb[18].mxu0 %vm1305_vm6, %v1300_v15  ;;  %4062 = vmatpush3.bf16.msra.mxu1 %v5149_v63 }
 0x772   :  { %4063 = vmatprep.subr.bf16.mxu1 %v4426_v36  ;;  %4074 = vmatpush3.bf16.msra.mxu0 %v5044_v41 }
 0x773   :  { %4075 = vmatprep.subr.bf16.mxu0 %v4426_v36  ;;  %3741 = vmatprep.mubr.msk.f32.mxu1 %vm4427_vm4, %v4424_v57 }
 0x774   :  { %3752 = vmatprep.mubr.msk.f32.mxu0 %vm4427_vm4, %v4424_v57 }
 0x775   :  { %4065 = vmatpush3.bf16.msra.mxu1 %v5155_v17 }
 0x776   :  { %4066 = vmatprep.subr.bf16.mxu1 %v4426_v36  ;;  %4077 = vmatpush3.bf16.msra.mxu0 %v5067_v54 }
 0x777   :  { %4078 = vmatprep.subr.bf16.mxu0 %v4426_v36 }
 0x779   :  { %4068 = vmatpush3.bf16.msra.mxu1 %v5165_v8 }
 0x77a   :  { %4069 = vmatprep.subr.bf16.mxu1 %v4426_v36 }
 0x77d   :  { %4071 = vmatpush3.bf16.msra.mxu1 %v5176_v51 }
 0x77e   :  { %4090 = vmatprep.subr.bf16.mxu1 %v4426_v36 }
 0x843   :  { %v1477_v16 = vpop.f32.mrb[18].mxu1 }
 0x844   :  { %v1482_v20 = vrot.slane %v1477_v16, 6  ;;  %v1375_v22 = vpop.f32.mrb[18].mxu0  ;;  %v3724_v23 = vpop.f32.mrb[19].mxu1 }
 0x845   :  { %v1376_v25 = vadd.f32 %v5204_v0, %v1375_v22  ;;  %v3713_v26 = vpop.f32.mrb[19].mxu0 }
 0x846   :  { %v1484_v27 = vadd.f32 %v1482_v20, %v5132_v43 }
 0x847   :  { %4297 = vtanh.f32 %v1376_v25  ;;  %v3363_v34 = vmul.f32 -1.442695, %v1376_v25 }
 0x848   :  { %4299 = vtanh.f32 %v1484_v27  ;;  %v3365_v5 = vmul.f32 -1.442695, %v1484_v27 }
 0x849   :  { %4301 = vpow2.f32 %v3363_v34 }
 0x84a   :  { %4303 = vpow2.f32 %v3365_v5 }
 0x851   :  { %v4298_v28 = vpop.eup %4297 }
 0x852   :  { %v4300_v30 = vpop.eup %4299  ;;  %1388 = vrot.lane.b32.xlu1 %v4298_v28, %s4429_s27 }
 0x853   :  { %1497 = vrot.lane.b32.xlu0 %v4300_v30, %s4429_s27  ;;  %v4302_v14 = vpop.eup %4301 }
 0x854   :  { %v4304_v35 = vpop.eup %4303  ;;  %v1382_v62 = vadd.f32 1.0, %v4302_v14 }
 0x855   :  { %v1488_v2 = vadd.f32 1.0, %v4304_v35 }
 0x856   :  { %4305 = vrcp.f32 %v1382_v62 }
 0x857   :  { %4307 = vrcp.f32 %v1488_v2 }
 0x860   :  { %v4306_v40 = vpop.eup %4305 }
 0x861   :  { %v4308_v44 = vpop.eup %4307  ;;  %v1386_v61 = vmul.f32 0.0, %v4306_v40 }
 0x862   :  { %v1495_v59 = vmul.f32 %v4308_v44, %v1493_v45 }
 0x8c4   :  { %v1389_v42 = vpop.permute.xlu1 %1388 }
 0x8c5   :  { %v1391_v7 = vmul.f32 %v4306_v40, %v1389_v42  ;;  %v1498_v21 = vpop.permute.xlu0 %1497 }
 0x8c6   :  { %v1500_v3 = vmul.f32 %v4308_v44, %v1498_v21 }
 0x8c7   :  { %1393 = vrot.lane.b32.xlu1 %v1391_v7, %s4428_s22 }
 0x8c8   :  { %1502 = vrot.lane.b32.xlu0 %v1500_v3, %s4428_s22 }
 0x939   :  { %v1394_v31 = vpop.permute.xlu1 %1393 }
 0x93a   :  { %v5213_v37 = vadd.f32 %v1394_v31, %v1386_v61  ;;  %v1503_v32 = vpop.permute.xlu0 %1502 }
 0x93b   :  { %v5215_v33 = vadd.f32 %v1503_v32, %v1495_v59 }
 0x93c   :  { %4309 = vtanh.f32 %v5213_v37 }
 0x93d   :  { %4311 = vtanh.f32 %v5215_v33  ;;  %v1711_v5 = vrot.slane %v5215_v33, 6 }
 0x946   :  { %v4310_v39 = vpop.eup %4309 }
 0x947   :  { %v4312_v46 = vpop.eup %4311  ;;  %1399 = vrot.lane.b32.xlu1 %v4310_v39, %s4429_s27 }
 0x948   :  { %1508 = vrot.lane.b32.xlu0 %v4312_v46, %s4429_s27 }
 0x9b9   :  { %v1400_v47 = vpop.permute.xlu1 %1399 }
 0x9ba   :  { %v5221_v19 = vmul.f32 %v4306_v40, %v1400_v47  ;;  %v1509_v29 = vpop.permute.xlu0 %1508 }
 0x9bb   :  { %v1511_v18 = vmul.f32 %v4308_v44, %v1509_v29 }
 0x9bc   :  { %v1516_v24 = vrot.slane %v5221_v19, 6 }
 0x9bd   :  { %1513 = vrot.lane.b32.xlu1 %v1511_v18, %s4428_s22  ;;  %v1624_v48 = vrot.slane %v1511_v18, 2 }
 0x9be   :  { %1517 = vrot.lane.b32.xlu0 %v1516_v24, %s4429_s27 }
 0x9c1   :  { %1625 = vrot.lane.b32.xlu1 %v1624_v48, %s4428_s22 }
 0xa2f   :  { %v1514_v49 = vpop.permute.xlu1 %1513 }
 0xa30   :  { %v1518_v52 = vpop.permute.xlu0 %1517 }
 0xa31   :  { %v1520_v50 = vsel %vm543_vm3, %v1514_v49, %v1518_v52 }
 0xa32   :  { %v1522_v55 = vrot.slane %v1520_v50, 2 }
 0xa33   :  { %v1626_v56 = vpop.permute.xlu1 %1625 }
 0xa34   :  { %3742 = vmatmul.mubr.msk.f32.vlgmr.msra.gmra.mrb[20].mxu1 %vm1305_vm6, %v1522_v55  ;;  %3753 = vmatmul.mubr.msk.f32.vlgmr.msra.gmra.mrb[20].mxu0 %vm543_vm3, %v1626_v56 }
 0xa35   :  { %4080 = vmatpush3.bf16.msra.mxu0 %v5149_v63  ;;  %4092 = vmatpush3.bf16.msra.mxu1 %v5044_v41 }
 0xa36   :  { %4081 = vmatprep.subr.bf16.mxu0 %v4426_v36  ;;  %4093 = vmatprep.subr.bf16.mxu1 %v4426_v36 }
 0xa37   :  { %3771 = vmatprep.mubr.msk.f32.mxu0 %vm4427_vm4, %v4424_v57  ;;  %3782 = vmatprep.mubr.msk.f32.mxu1 %vm4427_vm4, %v4424_v57 }
 0xa39   :  { %4083 = vmatpush3.bf16.msra.mxu0 %v5155_v17  ;;  %4095 = vmatpush3.bf16.msra.mxu1 %v5067_v54 }
 0xa3a   :  { %4084 = vmatprep.subr.bf16.mxu0 %v4426_v36  ;;  %4096 = vmatprep.subr.bf16.mxu1 %v4426_v36 }
 0xa3d   :  { %4086 = vmatpush3.bf16.msra.mxu0 %v5165_v8 }
 0xa3e   :  { %4087 = vmatprep.subr.bf16.mxu0 %v4426_v36 }
 0xa41   :  { %4089 = vmatpush3.bf16.msra.mxu0 %v5176_v51 }
 0xa42   :  { %4108 = vmatprep.subr.bf16.mxu0 %v4426_v36 }
 0xb07   :  { %v1591_v58 = vpop.f32.mrb[20].mxu1  ;;  %v1695_v60 = vpop.f32.mrb[20].mxu0 }
 0xb08   :  { %v1592_v6 = vadd.f32 %v5204_v0, %v1591_v58  ;;  %v1700_v1 = vrot.slane %v1695_v60, 4  ;;  %v3743_v9 = vpop.f32.mrb[21].mxu1  ;;  %v3754_v10 = vpop.f32.mrb[21].mxu0 }
 0xb0a   :  { %4313 = vtanh.f32 %v1592_v6  ;;  %v1702_v11 = vadd.f32 %v1700_v1, %v5132_v43  ;;  %v3367_v12 = vmul.f32 -1.442695, %v1592_v6 }
 0xb0c   :  { %4315 = vtanh.f32 %v1702_v11  ;;  %v3369_v13 = vmul.f32 -1.442695, %v1702_v11 }
 0xb0d   :  { %4317 = vpow2.f32 %v3367_v12 }
 0xb0e   :  { %4319 = vpow2.f32 %v3369_v13 }
 0xb14   :  { %v4314_v53 = vpop.eup %4313 }
 0xb15   :  { %1604 = vrot.lane.b32.xlu0 %v4314_v53, %s4429_s27 }
 0xb16   :  { %v4316_v4 = vpop.eup %4315 }
 0xb17   :  { %1715 = vrot.lane.b32.xlu1 %v4316_v4, %s4429_s27  ;;  %v4318_v15 = vpop.eup %4317 }
 0xb18   :  { %v4320_v16 = vpop.eup %4319  ;;  %v1598_v20 = vadd.f32 1.0, %v4318_v15 }
 0xb19   :  { %v1706_v22 = vadd.f32 1.0, %v4320_v16 }
 0xb1a   :  { %4321 = vrcp.f32 %v1598_v20 }
 0xb1b   :  { %4323 = vrcp.f32 %v1706_v22 }
 0xb24   :  { %v4322_v23 = vpop.eup %4321 }
 0xb25   :  { %v4324_v27 = vpop.eup %4323  ;;  %v1602_v34 = vmul.f32 %v4322_v23, %v5213_v37 }
 0xb26   :  { %v1713_v62 = vmul.f32 %v4324_v27, %v1711_v5 }
 0xb87   :  { %v1605_v25 = vpop.permute.xlu0 %1604 }
 0xb88   :  { %v1607_v26 = vmul.f32 %v4322_v23, %v1605_v25 }
 0xb89   :  { %v1716_v28 = vpop.permute.xlu1 %1715 }
 0xb8a   :  { %1609 = vrot.lane.b32.xlu0 %v1607_v26, %s4428_s22  ;;  %v1718_v30 = vmul.f32 %v4324_v27, %v1716_v28 }
 0xb8c   :  { %1720 = vrot.lane.b32.xlu1 %v1718_v30, %s4428_s22 }
 0xbfc   :  { %v1610_v14 = vpop.permute.xlu0 %1609 }
 0xbfd   :  { %v5254_v35 = vadd.f32 %v1610_v14, %v1602_v34 }
 0xbfe   :  { %v1721_v2 = vpop.permute.xlu1 %1720 }
 0xbff   :  { %4325 = vtanh.f32 %v5254_v35  ;;  %v5257_v40 = vadd.f32 %v1721_v2, %v1713_v62 }
 0xc01   :  { %4327 = vtanh.f32 %v5257_v40  ;;  %v1929_v13 = vrot.slane %v5257_v40, 6 }
 0xc09   :  { %v4326_v42 = vpop.eup %4325 }
 0xc0a   :  { %1615 = vrot.lane.b32.xlu0 %v4326_v42, %s4429_s27 }
 0xc0b   :  { %v4328_v44 = vpop.eup %4327 }
 0xc0c   :  { %1726 = vrot.lane.b32.xlu1 %v4328_v44, %s4429_s27 }
 0xc7c   :  { %v1616_v7 = vpop.permute.xlu0 %1615 }
 0xc7d   :  { %v5262_v21 = vmul.f32 %v4322_v23, %v1616_v7 }
 0xc7e   :  { %v1727_v45 = vpop.permute.xlu1 %1726 }
 0xc7f   :  { %v1734_v3 = vrot.slane %v5262_v21, 4  ;;  %v1729_v61 = vmul.f32 %v4324_v27, %v1727_v45 }
 0xc81   :  { %1735 = vrot.lane.b32.xlu1 %v1734_v3, %s4429_s27  ;;  %1731 = vrot.lane.b32.xlu0 %v1729_v61, %s4428_s22  ;;  %v1842_v31 = vrot.slane %v1729_v61, 4 }
 0xc85   :  { %1843 = vrot.lane.b32.xlu0 %v1842_v31, %s4428_s22 }
 0xcf3   :  { %v1736_v59 = vpop.permute.xlu1 %1735  ;;  %v1732_v37 = vpop.permute.xlu0 %1731 }
 0xcf4   :  { %v1738_v32 = vsel %vm543_vm3, %v1732_v37, %v1736_v59 }
 0xcf5   :  { %v1740_v33 = vrot.slane %v1738_v32, 4 }
 0xcf7   :  { %v1844_v39 = vpop.permute.xlu0 %1843  ;;  %3772 = vmatmul.mubr.msk.f32.vlgmr.msra.gmra.mrb[22].mxu0 %vm1305_vm6, %v1740_v33 }
 0xcf8   :  { %3783 = vmatmul.mubr.msk.f32.vlgmr.msra.gmra.mrb[22].mxu1 %vm543_vm3, %v1844_v39  ;;  %4110 = vmatpush3.bf16.msra.mxu0 %v5044_v41 }
 0xcf9   :  { %4098 = vmatpush3.bf16.msra.mxu1 %v5149_v63  ;;  %4111 = vmatprep.subr.bf16.mxu0 %v4426_v36 }
 0xcfa   :  { %4099 = vmatprep.subr.bf16.mxu1 %v4426_v36  ;;  %3801 = vmatprep.mubr.msk.f32.mxu1 %vm4427_vm4, %v4424_v57 }
 0xcfb   :  { %3812 = vmatprep.mubr.msk.f32.mxu0 %vm4427_vm4, %v4424_v57 }
 0xcfc   :  { %4113 = vmatpush3.bf16.msra.mxu0 %v5067_v54 }
 0xcfd   :  { %4101 = vmatpush3.bf16.msra.mxu1 %v5155_v17  ;;  %4114 = vmatprep.subr.bf16.mxu0 %v4426_v36 }
 0xcfe   :  { %4102 = vmatprep.subr.bf16.mxu1 %v4426_v36 }
 0xd01   :  { %4104 = vmatpush3.bf16.msra.mxu1 %v5165_v8 }
 0xd02   :  { %4105 = vmatprep.subr.bf16.mxu1 %v4426_v36 }
 0xd05   :  { %4107 = vmatpush3.bf16.msra.mxu1 %v5176_v51 }
 0xd06   :  { %4126 = vmatprep.subr.bf16.mxu1 %v4426_v36 }
 0xdca   :  { %v1809_v46 = vpop.f32.mrb[22].mxu0 }
 0xdcb   :  { %v1810_v47 = vadd.f32 %v5204_v0, %v1809_v46  ;;  %v3773_v29 = vpop.f32.mrb[23].mxu0  ;;  %v1913_v18 = vpop.f32.mrb[22].mxu1 }
 0xdcc   :  { %v1918_v24 = vrot.slane %v1913_v18, 2  ;;  %v3784_v48 = vpop.f32.mrb[23].mxu1 }
 0xdcd   :  { %4329 = vtanh.f32 %v1810_v47  ;;  %v3371_v55 = vmul.f32 -1.442695, %v1810_v47 }
 0xdce   :  { %v1920_v49 = vadd.f32 %v1918_v24, %v5132_v43 }
 0xdd0   :  { %4331 = vtanh.f32 %v1920_v49  ;;  %v3373_v56 = vmul.f32 -1.442695, %v1920_v49 }
 0xdd1   :  { %4333 = vpow2.f32 %v3371_v55 }
 0xdd2   :  { %4335 = vpow2.f32 %v3373_v56 }
 0xdd7   :  { %v4330_v52 = vpop.eup %4329 }
 0xdd8   :  { %1822 = vrot.lane.b32.xlu1 %v4330_v52, %s4429_s27 }
 0xdda   :  { %v4332_v50 = vpop.eup %4331 }
 0xddb   :  { %1933 = vrot.lane.b32.xlu0 %v4332_v50, %s4429_s27  ;;  %v4334_v58 = vpop.eup %4333 }
 0xddc   :  { %v4336_v60 = vpop.eup %4335  ;;  %v1816_v6 = vadd.f32 1.0, %v4334_v58 }
 0xddd   :  { %v1924_v1 = vadd.f32 1.0, %v4336_v60 }
 0xdde   :  { %4337 = vrcp.f32 %v1816_v6 }
 0xddf   :  { %4339 = vrcp.f32 %v1924_v1 }
 0xde8   :  { %v4338_v9 = vpop.eup %4337 }
 0xde9   :  { %v4340_v11 = vpop.eup %4339  ;;  %v1820_v12 = vmul.f32 %v4338_v9, %v5254_v35 }
 0xdea   :  { %v1931_v20 = vmul.f32 %v4340_v11, %v1929_v13 }
 0xe4a   :  { %v1823_v10 = vpop.permute.xlu1 %1822 }
 0xe4b   :  { %v1825_v43 = vmul.f32 %v4338_v9, %v1823_v10 }
 0xe4d   :  { %v1934_v53 = vpop.permute.xlu0 %1933  ;;  %1827 = vrot.lane.b32.xlu1 %v1825_v43, %s4428_s22 }
 0xe4e   :  { %v1936_v4 = vmul.f32 %v4340_v11, %v1934_v53 }
 0xe50   :  { %1938 = vrot.lane.b32.xlu0 %v1936_v4, %s4428_s22 }
 0xebf   :  { %v1828_v15 = vpop.permute.xlu1 %1827 }
 0xec0   :  { %v5295_v16 = vadd.f32 %v1828_v15, %v1820_v12 }
 0xec2   :  { %4341 = vtanh.f32 %v5295_v16  ;;  %v1939_v22 = vpop.permute.xlu0 %1938 }
 0xec3   :  { %v5298_v23 = vadd.f32 %v1939_v22, %v1931_v20 }
 0xec5   :  { %4343 = vtanh.f32 %v5298_v23  ;;  %v2144_v55 = vrot.slane %v5298_v23, 6 }
 0xecc   :  { %v4342_v25 = vpop.eup %4341 }
 0xecd   :  { %1833 = vrot.lane.b32.xlu1 %v4342_v25, %s4429_s27 }
 0xecf   :  { %v4344_v26 = vpop.eup %4343 }
 0xed0   :  { %1944 = vrot.lane.b32.xlu0 %v4344_v26, %s4429_s27 }
 0xf3f   :  { %v1834_v27 = vpop.permute.xlu1 %1833 }
 0xf40   :  { %v5303_v28 = vmul.f32 %v4338_v9, %v1834_v27 }
 0xf42   :  { %v1952_v30 = vrot.slane %v5303_v28, 2  ;;  %v1945_v34 = vpop.permute.xlu0 %1944 }
 0xf43   :  { %v1947_v5 = vmul.f32 %v4340_v11, %v1945_v34 }
 0xf44   :  { %1953 = vrot.lane.b32.xlu0 %v1952_v30, %s4429_s27 }
 0xf45   :  { %1949 = vrot.lane.b32.xlu1 %v1947_v5, %s4428_s22  ;;  %v2060_v14 = vrot.slane %v1947_v5, 6 }
 0xf49   :  { %2061 = vrot.lane.b32.xlu1 %v2060_v14, %s4428_s22 }
 0xfb6   :  { %v1954_v35 = vpop.permute.xlu0 %1953 }
 0xfb7   :  { %v1950_v62 = vpop.permute.xlu1 %1949 }
 0xfb8   :  { %v1956_v2 = vsel %vm543_vm3, %v1950_v62, %v1954_v35 }
 0xfb9   :  { %v1958_v40 = vrot.slane %v1956_v2, 6 }
 0xfbb   :  { %3802 = vmatmul.mubr.msk.f32.vlgmr.msra.gmra.mrb[24].mxu1 %vm1305_vm6, %v1958_v40  ;;  %v2062_v42 = vpop.permute.xlu1 %2061 }
 0xfbc   :  { %3813 = vmatmul.mubr.msk.f32.vlgmr.msra.gmra.mrb[24].mxu0 %vm543_vm3, %v2062_v42  ;;  %4128 = vmatpush3.bf16.msra.mxu1 %v5044_v41 }
 0xfbd   :  { %4116 = vmatpush3.bf16.msra.mxu0 %v5149_v63  ;;  %4129 = vmatprep.subr.bf16.mxu1 %v4426_v36 }
 0xfbe   :  { %4117 = vmatprep.subr.bf16.mxu0 %v4426_v36  ;;  %3842 = vmatprep.mubr.msk.f32.mxu1 %vm4427_vm4, %v4424_v57 }
 0xfbf   :  { %3831 = vmatprep.mubr.msk.f32.mxu0 %vm4427_vm4, %v4424_v57 }
 0xfc0   :  { %4131 = vmatpush3.bf16.msra.mxu1 %v5067_v54 }
 0xfc1   :  { %4119 = vmatpush3.bf16.msra.mxu0 %v5155_v17  ;;  %4132 = vmatprep.subr.bf16.mxu1 %v4426_v36 }
 0xfc2   :  { %4120 = vmatprep.subr.bf16.mxu0 %v4426_v36 }
 0xfc5   :  { %4122 = vmatpush3.bf16.msra.mxu0 %v5165_v8 }
 0xfc6   :  { %4123 = vmatprep.subr.bf16.mxu0 %v4426_v36 }
 0xfc9   :  { %4125 = vmatpush3.bf16.msra.mxu0 %v5176_v51 }
 0xfca   :  { %4144 = vmatprep.subr.bf16.mxu0 %v4426_v36 }
0x108e   :  { %v2027_v44 = vpop.f32.mrb[24].mxu1 }
0x108f   :  { %v2028_v7 = vadd.f32 %v5204_v0, %v2027_v44  ;;  %v3803_v3 = vpop.f32.mrb[25].mxu1  ;;  %v2131_v45 = vpop.f32.mrb[24].mxu0 }
0x1090   :  { %v2135_v61 = vadd.f32 %v2131_v45, %v5130_v38  ;;  %v3814_v31 = vpop.f32.mrb[25].mxu0 }
0x1091   :  { %4345 = vtanh.f32 %v2028_v7  ;;  %v3375_v32 = vmul.f32 -1.442695, %v2028_v7 }
0x1092   :  { %4347 = vtanh.f32 %v2135_v61  ;;  %v3377_v33 = vmul.f32 -1.442695, %v2135_v61 }
0x1093   :  { %4349 = vpow2.f32 %v3375_v32 }
0x1094   :  { %4351 = vpow2.f32 %v3377_v33 }
0x109b   :  { %v4346_v59 = vpop.eup %4345 }
0x109c   :  { %v4348_v37 = vpop.eup %4347  ;;  %2040 = vrot.lane.b32.xlu0 %v4346_v59, %s4429_s27 }
0x109d   :  { %2148 = vrot.lane.b32.xlu1 %v4348_v37, %s4429_s27  ;;  %v4350_v39 = vpop.eup %4349 }
0x109e   :  { %v4352_v46 = vpop.eup %4351  ;;  %v2034_v47 = vadd.f32 1.0, %v4350_v39 }
0x109f   :  { %v2139_v29 = vadd.f32 1.0, %v4352_v46 }
0x10a0   :  { %4353 = vrcp.f32 %v2034_v47 }
0x10a1   :  { %4355 = vrcp.f32 %v2139_v29 }
0x10aa   :  { %v4354_v18 = vpop.eup %4353 }
0x10ab   :  { %v4356_v48 = vpop.eup %4355  ;;  %v2038_v56 = vmul.f32 %v4354_v18, %v5295_v16 }
0x10ac   :  { %v2146_v60 = vmul.f32 %v4356_v48, %v2144_v55 }
0x110e   :  { %v2041_v24 = vpop.permute.xlu0 %2040 }
0x110f   :  { %v2043_v49 = vmul.f32 %v4354_v18, %v2041_v24  ;;  %v2149_v52 = vpop.permute.xlu1 %2148 }
0x1110   :  { %v2151_v50 = vmul.f32 %v4356_v48, %v2149_v52 }
0x1111   :  { %2045 = vrot.lane.b32.xlu0 %v2043_v49, %s4428_s22 }
0x1112   :  { %2153 = vrot.lane.b32.xlu1 %v2151_v50, %s4428_s22 }
0x1183   :  { %v2046_v58 = vpop.permute.xlu0 %2045 }
0x1184   :  { %v5336_v6 = vadd.f32 %v2046_v58, %v2038_v56  ;;  %v2154_v1 = vpop.permute.xlu1 %2153 }
0x1185   :  { %v5338_v9 = vadd.f32 %v2154_v1, %v2146_v60 }
0x1186   :  { %4357 = vtanh.f32 %v5336_v6 }
0x1187   :  { %4359 = vtanh.f32 %v5338_v9  ;;  %v2357_v59 = vrot.slane %v5338_v9, 6 }
0x1190   :  { %v4358_v10 = vpop.eup %4357 }
0x1191   :  { %v4360_v43 = vpop.eup %4359  ;;  %2051 = vrot.lane.b32.xlu0 %v4358_v10, %s4429_s27 }
0x1192   :  { %2159 = vrot.lane.b32.xlu1 %v4360_v43, %s4429_s27 }
0x1203   :  { %v2052_v11 = vpop.permute.xlu0 %2051 }
0x1204   :  { %v5344_v53 = vmul.f32 %v4354_v18, %v2052_v11  ;;  %v2160_v4 = vpop.permute.xlu1 %2159 }
0x1205   :  { %v2162_v12 = vmul.f32 %v4356_v48, %v2160_v4 }
0x1206   :  { %2167 = vrot.lane.b32.xlu1 %v5344_v53, %s4429_s27 }
0x1207   :  { %2164 = vrot.lane.b32.xlu0 %v2162_v12, %s4428_s22 }
0x1278   :  { %v2168_v13 = vpop.permute.xlu1 %2167 }
0x1279   :  { %v2165_v15 = vpop.permute.xlu0 %2164 }
0x127a   :  { %v2170_v16 = vsel %vm543_vm3, %v2165_v15, %v2168_v13  ;;  %3843 = vmatmul.mubr.msk.f32.vlgmr.msra.gmra.mrb[26].mxu1 %vm543_vm3, %v2165_v15 }
0x127b   :  { %3832 = vmatmul.mubr.msk.f32.vlgmr.msra.gmra.mrb[26].mxu0 %vm1305_vm6, %v2170_v16  ;;  %4134 = vmatpush3.bf16.msra.mxu1 %v5149_v63 }
0x127c   :  { %4135 = vmatprep.subr.bf16.mxu1 %v4426_v36  ;;  %4146 = vmatpush3.bf16.msra.mxu0 %v5044_v41 }
0x127d   :  { %4147 = vmatprep.subr.bf16.mxu0 %v4426_v36  ;;  %3861 = vmatprep.mubr.msk.f32.mxu1 %vm4427_vm4, %v4424_v57 }
0x127e   :  { %3872 = vmatprep.mubr.msk.f32.mxu0 %vm4427_vm4, %v4424_v57 }
0x127f   :  { %4137 = vmatpush3.bf16.msra.mxu1 %v5155_v17 }
0x1280   :  { %4138 = vmatprep.subr.bf16.mxu1 %v4426_v36  ;;  %4149 = vmatpush3.bf16.msra.mxu0 %v5067_v54 }
0x1281   :  { %4150 = vmatprep.subr.bf16.mxu0 %v4426_v36 }
0x1283   :  { %4140 = vmatpush3.bf16.msra.mxu1 %v5165_v8 }
0x1284   :  { %4141 = vmatprep.subr.bf16.mxu1 %v4426_v36 }
0x1287   :  { %4143 = vmatpush3.bf16.msra.mxu1 %v5176_v51 }
0x1288   :  { %4162 = vmatprep.subr.bf16.mxu1 %v4426_v36 }
0x134d   :  { %v2341_v20 = vpop.f32.mrb[26].mxu1 }
0x134e   :  { %v2346_v22 = vrot.slane %v2341_v20, 6  ;;  %v2240_v23 = vpop.f32.mrb[26].mxu0  ;;  %v3844_v25 = vpop.f32.mrb[27].mxu1 }
0x134f   :  { %v2241_v26 = vadd.f32 %v5204_v0, %v2240_v23  ;;  %v3833_v27 = vpop.f32.mrb[27].mxu0 }
0x1350   :  { %v2348_v30 = vadd.f32 %v2346_v22, %v5130_v38 }
0x1351   :  { %4361 = vtanh.f32 %v2241_v26  ;;  %v3379_v14 = vmul.f32 -1.442695, %v2241_v26 }
0x1352   :  { %4363 = vtanh.f32 %v2348_v30  ;;  %v3381_v35 = vmul.f32 -1.442695, %v2348_v30 }
0x1353   :  { %4365 = vpow2.f32 %v3379_v14 }
0x1354   :  { %4367 = vpow2.f32 %v3381_v35 }
0x135b   :  { %v4362_v34 = vpop.eup %4361 }
0x135c   :  { %v4364_v5 = vpop.eup %4363  ;;  %2253 = vrot.lane.b32.xlu0 %v4362_v34, %s4429_s27 }
0x135d   :  { %2361 = vrot.lane.b32.xlu1 %v4364_v5, %s4429_s27  ;;  %v4366_v62 = vpop.eup %4365 }
0x135e   :  { %v4368_v2 = vpop.eup %4367  ;;  %v2247_v40 = vadd.f32 1.0, %v4366_v62 }
0x135f   :  { %v2352_v42 = vadd.f32 1.0, %v4368_v2 }
0x1360   :  { %4369 = vrcp.f32 %v2247_v40 }
0x1361   :  { %4371 = vrcp.f32 %v2352_v42 }
0x136a   :  { %v4370_v44 = vpop.eup %4369 }
0x136b   :  { %v4372_v3 = vpop.eup %4371  ;;  %v2251_v37 = vmul.f32 %v4370_v44, %v5336_v6 }
0x136c   :  { %v2359_v33 = vmul.f32 %v4372_v3, %v2357_v59 }
0x13ce   :  { %v2254_v7 = vpop.permute.xlu0 %2253 }
0x13cf   :  { %v2256_v45 = vmul.f32 %v4370_v44, %v2254_v7  ;;  %v2362_v61 = vpop.permute.xlu1 %2361 }
0x13d0   :  { %v2364_v31 = vmul.f32 %v4372_v3, %v2362_v61 }
0x13d1   :  { %2258 = vrot.lane.b32.xlu0 %v2256_v45, %s4428_s22 }
0x13d2   :  { %2366 = vrot.lane.b32.xlu1 %v2364_v31, %s4428_s22 }
0x1443   :  { %v2259_v32 = vpop.permute.xlu0 %2258 }
0x1444   :  { %v5376_v39 = vadd.f32 %v2259_v32, %v2251_v37  ;;  %v2367_v46 = vpop.permute.xlu1 %2366 }
0x1445   :  { %v5378_v47 = vadd.f32 %v2367_v46, %v2359_v33 }
0x1446   :  { %4373 = vtanh.f32 %v5376_v39 }
0x1447   :  { %4375 = vtanh.f32 %v5378_v47  ;;  %v2575_v62 = vrot.slane %v5378_v47, 6 }
0x1450   :  { %v4374_v29 = vpop.eup %4373 }
0x1451   :  { %v4376_v18 = vpop.eup %4375  ;;  %2264 = vrot.lane.b32.xlu0 %v4374_v29, %s4429_s27 }
0x1452   :  { %2372 = vrot.lane.b32.xlu1 %v4376_v18, %s4429_s27 }
0x14c3   :  { %v2265_v24 = vpop.permute.xlu0 %2264 }
0x14c4   :  { %v5384_v48 = vmul.f32 %v4370_v44, %v2265_v24  ;;  %v2373_v49 = vpop.permute.xlu1 %2372 }
0x14c5   :  { %v2375_v52 = vmul.f32 %v4372_v3, %v2373_v49 }
0x14c6   :  { %v2380_v50 = vrot.slane %v5384_v48, 6 }
0x14c7   :  { %2377 = vrot.lane.b32.xlu0 %v2375_v52, %s4428_s22  ;;  %v2488_v55 = vrot.slane %v2375_v52, 2 }
0x14c8   :  { %2381 = vrot.lane.b32.xlu1 %v2380_v50, %s4429_s27 }
0x14cb   :  { %2489 = vrot.lane.b32.xlu0 %v2488_v55, %s4428_s22 }
0x1539   :  { %v2378_v56 = vpop.permute.xlu0 %2377 }
0x153a   :  { %v2382_v58 = vpop.permute.xlu1 %2381 }
0x153b   :  { %v2384_v60 = vsel %vm543_vm3, %v2378_v56, %v2382_v58 }
0x153c   :  { %v2386_v6 = vrot.slane %v2384_v60, 2 }
0x153d   :  { %v2490_v1 = vpop.permute.xlu0 %2489 }
0x153e   :  { %3862 = vmatmul.mubr.msk.f32.vlgmr.msra.gmra.mrb[28].mxu1 %vm1305_vm6, %v2386_v6  ;;  %3873 = vmatmul.mubr.msk.f32.vlgmr.msra.gmra.mrb[28].mxu0 %vm543_vm3, %v2490_v1 }
0x153f   :  { %4152 = vmatpush3.bf16.msra.mxu0 %v5149_v63  ;;  %4164 = vmatpush3.bf16.msra.mxu1 %v5044_v41 }
0x1540   :  { %4153 = vmatprep.subr.bf16.mxu0 %v4426_v36  ;;  %4165 = vmatprep.subr.bf16.mxu1 %v4426_v36 }
0x1541   :  { %3891 = vmatprep.mubr.msk.f32.mxu0 %vm4427_vm4, %v4424_v57  ;;  %3902 = vmatprep.mubr.msk.f32.mxu1 %vm4427_vm4, %v4424_v57 }
0x1543   :  { %4155 = vmatpush3.bf16.msra.mxu0 %v5155_v17  ;;  %4167 = vmatpush3.bf16.msra.mxu1 %v5067_v54 }
0x1544   :  { %4156 = vmatprep.subr.bf16.mxu0 %v4426_v36  ;;  %4168 = vmatprep.subr.bf16.mxu1 %v4426_v36 }
0x1547   :  { %4158 = vmatpush3.bf16.msra.mxu0 %v5165_v8 }
0x1548   :  { %4159 = vmatprep.subr.bf16.mxu0 %v4426_v36 }
0x154b   :  { %4161 = vmatpush3.bf16.msra.mxu0 %v5176_v51 }
0x1611   :  { %v2455_v41 = vpop.f32.mrb[28].mxu1  ;;  %v2559_v9 = vpop.f32.mrb[28].mxu0 }
0x1612   :  { %v2456_v10 = vadd.f32 %v5204_v0, %v2455_v41  ;;  %v2564_v43 = vrot.slane %v2559_v9, 4  ;;  %v3863_v11 = vpop.f32.mrb[29].mxu1  ;;  %v3874_v4 = vpop.f32.mrb[29].mxu0 }
0x1614   :  { %4377 = vtanh.f32 %v2456_v10  ;;  %v2566_v54 = vadd.f32 %v2564_v43, %v5130_v38  ;;  %v3383_v15 = vmul.f32 -1.442695, %v2456_v10 }
0x1616   :  { %4379 = vtanh.f32 %v2566_v54  ;;  %v3385_v16 = vmul.f32 -1.442695, %v2566_v54 }
0x1617   :  { %4381 = vpow2.f32 %v3383_v15 }
0x1618   :  { %4383 = vpow2.f32 %v3385_v16 }
0x161e   :  { %v4378_v12 = vpop.eup %4377 }
0x161f   :  { %2468 = vrot.lane.b32.xlu1 %v4378_v12, %s4429_s27 }
0x1620   :  { %v4380_v13 = vpop.eup %4379 }
0x1621   :  { %2579 = vrot.lane.b32.xlu0 %v4380_v13, %s4429_s27  ;;  %v4382_v20 = vpop.eup %4381 }
0x1622   :  { %v4384_v22 = vpop.eup %4383  ;;  %v2462_v23 = vadd.f32 1.0, %v4382_v20 }
0x1623   :  { %v2570_v25 = vadd.f32 1.0, %v4384_v22 }
0x1624   :  { %4385 = vrcp.f32 %v2462_v23 }
0x1625   :  { %4387 = vrcp.f32 %v2570_v25 }
0x162e   :  { %v4386_v26 = vpop.eup %4385 }
0x162f   :  { %v4388_v34 = vpop.eup %4387  ;;  %v2466_v35 = vmul.f32 %v4386_v26, %v5376_v39 }
0x1630   :  { %v2577_v42 = vmul.f32 %v4388_v34, %v2575_v62 }
0x1691   :  { %v2469_v27 = vpop.permute.xlu1 %2468 }
0x1692   :  { %v2471_v30 = vmul.f32 %v4386_v26, %v2469_v27 }
0x1693   :  { %v2580_v5 = vpop.permute.xlu0 %2579 }
0x1694   :  { %2473 = vrot.lane.b32.xlu1 %v2471_v30, %s4428_s22  ;;  %v2582_v14 = vmul.f32 %v4388_v34, %v2580_v5 }
0x1696   :  { %2584 = vrot.lane.b32.xlu0 %v2582_v14, %s4428_s22 }
0x1706   :  { %v2474_v2 = vpop.permute.xlu1 %2473 }
0x1707   :  { %v5416_v40 = vadd.f32 %v2474_v2, %v2466_v35 }
0x1708   :  { %v2585_v44 = vpop.permute.xlu0 %2584 }
0x1709   :  { %4389 = vtanh.f32 %v5416_v40  ;;  %v5419_v7 = vadd.f32 %v2585_v44, %v2577_v42 }
0x170b   :  { %4391 = vtanh.f32 %v5419_v7  ;;  %v2793_v4 = vrot.slane %v5419_v7, 6 }
0x1713   :  { %v4390_v3 = vpop.eup %4389 }
0x1714   :  { %2479 = vrot.lane.b32.xlu1 %v4390_v3, %s4429_s27 }
0x1715   :  { %v4392_v45 = vpop.eup %4391 }
0x1716   :  { %2590 = vrot.lane.b32.xlu0 %v4392_v45, %s4429_s27 }
0x1786   :  { %v2480_v61 = vpop.permute.xlu1 %2479 }
0x1787   :  { %v5424_v31 = vmul.f32 %v4386_v26, %v2480_v61 }
0x1788   :  { %v2591_v37 = vpop.permute.xlu0 %2590 }
0x1789   :  { %v2598_v59 = vrot.slane %v5424_v31, 4  ;;  %v2593_v32 = vmul.f32 %v4388_v34, %v2591_v37 }
0x178b   :  { %2599 = vrot.lane.b32.xlu0 %v2598_v59, %s4429_s27  ;;  %2595 = vrot.lane.b32.xlu1 %v2593_v32, %s4428_s22  ;;  %v2706_v33 = vrot.slane %v2593_v32, 4 }
0x178f   :  { %2707 = vrot.lane.b32.xlu1 %v2706_v33, %s4428_s22 }
0x17fd   :  { %v2600_v39 = vpop.permute.xlu0 %2599  ;;  %v2596_v46 = vpop.permute.xlu1 %2595 }
0x17fe   :  { %v2602_v47 = vsel %vm543_vm3, %v2596_v46, %v2600_v39 }
0x17ff   :  { %v2604_v29 = vrot.slane %v2602_v47, 4  ;;  %v2927_v47 = vld [vmem:[%s5626_s1 + $0x60] sm:$0xff] }
0x1801   :  { %v2708_v18 = vpop.permute.xlu1 %2707  ;;  %3892 = vmatmul.mubr.msk.f32.vlgmr.msra.gmra.mrb[30].mxu0 %vm1305_vm6, %v2604_v29  ;;  %v2928_v29 = vld [vmem:[%s5626_s1 + $0x68] sm:$0xff] }
0x1802   :  { %3903 = vmatmul.mubr.msk.f32.vlgmr.msra.gmra.mrb[30].mxu1 %vm543_vm3, %v2708_v18 }
0x1803   :  { %4170 = vmatpush3.bf16.msra.mxu1 %v5149_v63  ;;  %3921 = vmatprep.mubr.msk.f32.mxu1 %vm4427_vm4, %v4424_v57 }
0x1804   :  { %4171 = vmatprep.subr.bf16.mxu1 %v4426_v36 }
0x1807   :  { %4173 = vmatpush3.bf16.msra.mxu1 %v5155_v17 }
0x1808   :  { %4174 = vmatprep.subr.bf16.mxu1 %v4426_v36 }
0x180b   :  { %4176 = vmatpush3.bf16.msra.mxu1 %v5165_v8 }
0x180c   :  { %4177 = vmatprep.subr.bf16.mxu1 %v4426_v36 }
0x180f   :  { %4179 = vmatpush3.bf16.msra.mxu1 %v5176_v51 }
0x18d4   :  { %v2673_v24 = vpop.f32.mrb[30].mxu0 }
0x18d5   :  { %v2674_v49 = vadd.f32 %v5204_v0, %v2673_v24  ;;  %v3893_v52 = vpop.f32.mrb[31].mxu0  ;;  %v2777_v63 = vpop.f32.mrb[30].mxu1  ;;  %v3017_v24 = vld [vmem:[%s5629_s2 + $0x98] sm:$0xff] }
0x18d6   :  { %v2782_v50 = vrot.slane %v2777_v63, 2  ;;  %v3904_v55 = vpop.f32.mrb[31].mxu1 }
0x18d7   :  { %4393 = vtanh.f32 %v2674_v49  ;;  %v3387_v36 = vmul.f32 -1.442695, %v2674_v49 }
0x18d8   :  { %v2784_v57 = vadd.f32 %v2782_v50, %v5130_v38 }
0x18da   :  { %4395 = vtanh.f32 %v2784_v57  ;;  %v3389_v8 = vmul.f32 -1.442695, %v2784_v57 }
0x18db   :  { %4397 = vpow2.f32 %v3387_v36 }
0x18dc   :  { %4399 = vpow2.f32 %v3389_v8  ;;  %v3018_v8 = vld [vmem:[%s5629_s2 + $0xa0] sm:$0xff] }
0x18e1   :  { %v4394_v17 = vpop.eup %4393 }
0x18e2   :  { %2686 = vrot.lane.b32.xlu0 %v4394_v17, %s4429_s27 }
0x18e4   :  { %v4396_v56 = vpop.eup %4395 }
0x18e5   :  { %2797 = vrot.lane.b32.xlu1 %v4396_v56, %s4429_s27  ;;  %v4398_v51 = vpop.eup %4397 }
0x18e6   :  { %v4400_v58 = vpop.eup %4399  ;;  %v2680_v60 = vadd.f32 1.0, %v4398_v51  ;;  %v3019_v51 = vld [vmem:[%s5629_s2 + $0xa8] sm:$0xff] }
0x18e7   :  { %v2788_v6 = vadd.f32 1.0, %v4400_v58  ;;  %v4192_v58 = vpack.c.bf16 %v3019_v51, %v3018_v8  ;;  %v3398_v51 = vld [vmem:[%s5629_s2 + $0x131] ss:$0 sm:$0xff] }
0x18e8   :  { %4401 = vrcp.f32 %v2680_v60  ;;  %v3110_v60 = vld [vmem:[%s5629_s2 + $0xb0] sm:$0xff] }
0x18e9   :  { %4403 = vrcp.f32 %v2788_v6  ;;  %v3111_v6 = vld [vmem:[%s5629_s2 + $0xb8] sm:$0xff] }
0x18f2   :  { %v4402_v1 = vpop.eup %4401 }
0x18f3   :  { %v4404_v9 = vpop.eup %4403  ;;  %v2684_v11 = vmul.f32 %v4402_v1, %v5416_v40 }
0x18f4   :  { %v2795_v13 = vmul.f32 %v4404_v9, %v2793_v4  ;;  %v3116_v4 = vld [vmem:[%s5629_s2 + $0xe0] sm:$0xff] }
0x1954   :  { %v2687_v41 = vpop.permute.xlu0 %2686 }
0x1955   :  { %v2689_v38 = vmul.f32 %v4402_v1, %v2687_v41  ;;  %v4196_v41 = vpack.c.bf16 %v3111_v6, %v3110_v60 }
0x1957   :  { %v2798_v10 = vpop.permute.xlu1 %2797  ;;  %2691 = vrot.lane.b32.xlu0 %v2689_v38, %s4428_s22  ;;  %v3113_v38 = vld [vmem:[%s5629_s2 + $0xc8] sm:$0xff]  ;;  %4197 = vmatprep.subr.bf16.mxu1 %v4196_v41 }
0x1958   :  { %v2800_v43 = vmul.f32 %v4404_v9, %v2798_v10  ;;  %v3114_v10 = vld [vmem:[%s5629_s2 + $0xd0] sm:$0xff] }
0x195a   :  { %2802 = vrot.lane.b32.xlu1 %v2800_v43, %s4428_s22  ;;  %v3115_v43 = vld [vmem:[%s5629_s2 + $0xd8] sm:$0xff] }
0x19c9   :  { %v2692_v54 = vpop.permute.xlu0 %2691 }
0x19ca   :  { %v2694_v12 = vadd.f32 %v2692_v54, %v2684_v11  ;;  %v4204_v11 = vpack.c.bf16 %v3115_v43, %v3114_v10  ;;  %v3117_v54 = vld [vmem:[%s5629_s2 + $0xe8] sm:$0xff]  ;;  %v3399_v43 = vld [vmem:[%s5626_s1 + $0x100] ss:$0 sm:$0xff] }
0x19cc   :  { %4405 = vtanh.f32 %v2694_v12  ;;  %v2803_v15 = vpop.permute.xlu1 %2802 }
0x19cd   :  { %v2805_v16 = vadd.f32 %v2803_v15, %v2795_v13  ;;  %v3118_v13 = vld [vmem:[%s5629_s2 + $0xf0] sm:$0xff]  ;;  %v3119_v15 = vld [vmem:[%s5629_s2 + $0xf8] sm:$0xff] }
0x19cf   :  { %4407 = vtanh.f32 %v2805_v16  ;;  %v4212_v16 = vpack.c.bf16 %v3119_v15, %v3118_v13 }
0x19d6   :  { %v4406_v20 = vpop.eup %4405 }
0x19d7   :  { %2697 = vrot.lane.b32.xlu0 %v4406_v20, %s4429_s27  ;;  %v3120_v20 = vld [vmem:[%s5629_s2 + $0x100] sm:$0xff] }
0x19d9   :  { %v4408_v22 = vpop.eup %4407 }
0x19da   :  { %2808 = vrot.lane.b32.xlu1 %v4408_v22, %s4429_s27  ;;  %v3121_v22 = vld [vmem:[%s5629_s2 + $0x108] sm:$0xff] }
0x1a49   :  { %v2698_v23 = vpop.permute.xlu0 %2697 }
0x1a4a   :  { %v2700_v25 = vmul.f32 %v4402_v1, %v2698_v23  ;;  %v3112_v1 = vld [vmem:[%s5629_s2 + $0xc0] sm:$0xff]  ;;  %v4216_v23 = vpack.c.bf16 %v3121_v22, %v3120_v20 }
0x1a4c   :  { %v2816_v26 = vrot.slane %v2700_v25, 2  ;;  %v2809_v27 = vpop.permute.xlu1 %2808 }
0x1a4d   :  { %v2811_v30 = vmul.f32 %v4404_v9, %v2809_v27  ;;  %v4200_v9 = vpack.c.bf16 %v3113_v38, %v3112_v1 }
0x1a4e   :  { %2817 = vrot.lane.b32.xlu1 %v2816_v26, %s4429_s27 }
0x1a4f   :  { %2813 = vrot.lane.b32.xlu0 %v2811_v30, %s4428_s22 }
0x1ac0   :  { %v2818_v34 = vpop.permute.xlu1 %2817 }
0x1ac1   :  { %v2814_v5 = vpop.permute.xlu0 %2813 }
0x1ac2   :  { %v2820_v14 = vsel %vm543_vm3, %v2814_v5, %v2818_v34  ;;  %v3122_v5 = vld [vmem:[%s5629_s2 + $0x110] sm:$0xff] }
0x1ac3   :  { %v2822_v35 = vrot.slane %v2820_v14, 6  ;;  %v3123_v14 = vld [vmem:[%s5629_s2 + $0x118] sm:$0xff] }
0x1ac5   :  { %3922 = vmatmul.mubr.msk.f32.vlgmr.msra.gmra.mrb[32].mxu1 %vm1305_vm6, %v2822_v35  ;;  %v3124_v35 = vld [vmem:[%s5629_s2 + $0x120] sm:$0xff] }
0x1ac6   :  { %4199 = vmatpush3.bf16.msra.mxu1 %v4196_v41 }
0x1ac7   :  { %4201 = vmatprep.subr.bf16.mxu1 %v4200_v9 }
0x1aca   :  { %4203 = vmatpush3.bf16.msra.mxu1 %v4200_v9 }
0x1acb   :  { %4205 = vmatprep.subr.bf16.mxu1 %v4204_v11 }
0x1ace   :  { %4207 = vmatpush3.bf16.msra.mxu1 %v4204_v11 }
0x1b98   :  { %v2891_v62 = vpop.f32.mrb[32].mxu1 }
0x1b99   :  { %v2892_v2 = vadd.f32 %v5204_v0, %v2891_v62  ;;  %v3923_v40 = vpop.f32.mrb[33].mxu1  ;;  %v4220_v62 = vpack.c.bf16 %v3123_v14, %v3122_v5 }
0x1b9b   :  { %4409 = vtanh.f32 %v2892_v2  ;;  %v3391_v44 = vmul.f32 -1.442695, %v2892_v2  ;;  %v3125_v2 = vld [vmem:[%s5629_s2 + $0x128] sm:$0xff] }
0x1b9c   :  { %v4224_v40 = vpack.c.bf16 %v3125_v2, %v3124_v35 }
0x1b9d   :  { %4411 = vpow2.f32 %v3391_v44  ;;  %v3211_v44 = vld [vmem:[%s5626_s1 + $0x88] sm:$0xff] }
0x1ba5   :  { %v4410_v42 = vpop.eup %4409 }
0x1ba6   :  { %2904 = vrot.lane.b32.xlu0 %v4410_v42, %s4429_s27  ;;  %v3210_v42 = vld [vmem:[%s5626_s1 + $0x80] sm:$0xff] }
0x1ba7   :  { %v4412_v7 = vpop.eup %4411 }
0x1ba8   :  { %v2898_v3 = vadd.f32 1.0, %v4412_v7  ;;  %v3212_v7 = vld [vmem:[%s5626_s1 + $0x90] sm:$0xff] }
0x1baa   :  { %4413 = vrcp.f32 %v2898_v3  ;;  %v4228_v3 = vpack.c.bf16 %v3211_v44, %v3210_v42 }
0x1bb4   :  { %v4414_v45 = vpop.eup %4413 }
0x1bb5   :  { %v2902_v0 = vmul.f32 %v4414_v45, %v2694_v12  ;;  %v4208_v12 = vpack.c.bf16 %v3117_v54, %v3116_v4 }
0x1bb7   :  { %4209 = vmatprep.subr.bf16.mxu1 %v4208_v12 }
0x1bb8   :  { %4211 = vmatpush3.bf16.msra.mxu1 %v4208_v12 }
0x1bb9   :  { %4213 = vmatprep.subr.bf16.mxu1 %v4212_v16 }
0x1bbc   :  { %4215 = vmatpush3.bf16.msra.mxu1 %v4212_v16 }
0x1bbd   :  { %4217 = vmatprep.subr.bf16.mxu1 %v4216_v23 }
0x1bc0   :  { %4219 = vmatpush3.bf16.msra.mxu1 %v4216_v23 }
0x1bc1   :  { %4221 = vmatprep.subr.bf16.mxu1 %v4220_v62 }
0x1bc4   :  { %4223 = vmatpush3.bf16.msra.mxu1 %v4220_v62 }
0x1bc5   :  { %4225 = vmatprep.subr.bf16.mxu1 %v4224_v40 }
0x1bc8   :  { %4227 = vmatpush3.bf16.msra.mxu1 %v4224_v40 }
0x1c18   :  { %v2905_v61 = vpop.permute.xlu0 %2904 }
0x1c19   :  { %v2907_v59 = vmul.f32 %v4414_v45, %v2905_v61 }
0x1c1b   :  { %2909 = vrot.lane.b32.xlu1 %v2907_v59, %s4428_s22  ;;  %v3214_v59 = vld [vmem:[%s5626_s1 + $0xa0] sm:$0xff] }
0x1c1f   :  { %1404 = vrot.lane.b32.xlu1 %v5221_v19, %s4428_s22 }
0x1c23   :  { %1838 = vrot.lane.b32.xlu1 %v5303_v28, %s4428_s22 }
0x1c27   :  { %2269 = vrot.lane.b32.xlu1 %v5384_v48, %s4428_s22  ;;  %v2926_v48 = vld [vmem:[%s5626_s1 + $0x58] sm:$0xff] }
0x1c28   :  { %v4180_v18 = vpack.c.bf16 %v2927_v47, %v2926_v48  ;;  %v3220_v48 = vld [vmem:[%s5626_s1 + $0xd0] sm:$0xff]  ;;  %v3221_v47 = vld [vmem:[%s5626_s1 + $0xd8] sm:$0xff] }
0x1c2a   :  { %4181 = vmatprep.subr.bf16.mxu0 %v4180_v18 }
0x1c2b   :  { %2702 = vrot.lane.b32.xlu1 %v2700_v25, %s4428_s22  ;;  %4183 = vmatpush3.bf16.msra.mxu0 %v4180_v18  ;;  %v3392_v25 = vld [vmem:[%s5626_s1 + $0x78] ss:$0 sm:$0xff]  ;;  %v3395_v18 = vld [vmem:[%s5629_s2 + $0x130] ss:$0 sm:$0xff] }
0x1c8d   :  { %v2910_v37 = vpop.permute.xlu1 %2909 }
0x1c8e   :  { %v2912_v32 = vadd.f32 %v2910_v37, %v2902_v0  ;;  %v3215_v0 = vld [vmem:[%s5626_s1 + $0xa8] sm:$0xff] }
0x1c8f   :  { %v4236_v37 = vpack.c.bf16 %v3215_v0, %v3214_v59 }
0x1c90   :  { %4415 = vtanh.f32 %v2912_v32  ;;  %v3216_v32 = vld [vmem:[%s5626_s1 + $0xb0] sm:$0xff] }
0x1c91   :  { %v1405_v33 = vpop.permute.xlu1 %1404 }
0x1c92   :  { %1408 = vst.msk [vmem:[#allocation2] sm:$0x3] %vm1407_vm7, %v1405_v33  ;;  %v3217_v33 = vld [vmem:[%s5626_s1 + $0xb8] sm:$0xff] }
0x1c95   :  { %v1839_v39 = vpop.permute.xlu1 %1838 }
0x1c96   :  { %1841 = vst.msk [vmem:[#allocation2 + $0x4] sm:$0x3] %vm1407_vm7, %v1839_v39  ;;  %v4240_v39 = vpack.c.bf16 %v3217_v33, %v3216_v32 }
0x1c99   :  { %v2270_v19 = vpop.permute.xlu1 %2269 }
0x1c9a   :  { %v4416_v46 = vpop.eup %4415  ;;  %2272 = vst.msk [vmem:[#allocation2 + $0x8] sm:$0x3] %vm1407_vm7, %v2270_v19  ;;  %v3218_v19 = vld [vmem:[%s5626_s1 + $0xc0] sm:$0xff] }
0x1c9b   :  { %2915 = vrot.lane.b32.xlu0 %v4416_v46, %s4429_s27  ;;  %v3219_v46 = vld [vmem:[%s5626_s1 + $0xc8] sm:$0xff] }
0x1c9d   :  { %v2703_v28 = vpop.permute.xlu1 %2702 }
0x1c9e   :  { %2705 = vst.msk [vmem:[#allocation2 + $0xc] sm:$0x3] %vm1407_vm7, %v2703_v28  ;;  %v4244_v28 = vpack.c.bf16 %v3219_v46, %v3218_v19 }
0x1c9f   :  { %1620 = vrot.lane.b32.xlu0 %v5262_v21, %s4428_s22  ;;  %v2929_v21 = vld [vmem:[%s5626_s1 + $0x70] sm:$0xff] }
0x1ca3   :  { %2056 = vrot.lane.b32.xlu0 %v5344_v53, %s4428_s22  ;;  %v4184_v53 = vpack.c.bf16 %v2929_v21, %v2928_v29  ;;  %v4248_v29 = vpack.c.bf16 %v3221_v47, %v3220_v48 }
0x1ca5   :  { %4185 = vmatprep.subr.bf16.mxu0 %v4184_v53 }
0x1ca6   :  { %4187 = vmatpush3.bf16.msra.mxu0 %v4184_v53 }
0x1ca7   :  { %2484 = vrot.lane.b32.xlu0 %v5424_v31, %s4428_s22  ;;  %v3016_v31 = vld [vmem:[%s5629_s2 + $0x90] sm:$0xff] }
0x1ca8   :  { %v4188_v49 = vpack.c.bf16 %v3017_v24, %v3016_v31 }
0x1caa   :  { %4189 = vmatprep.subr.bf16.mxu0 %v4188_v49 }
0x1d0d   :  { %v2916_v52 = vpop.permute.xlu0 %2915 }
0x1d0e   :  { %v2918_v63 = vmul.f32 %v4414_v45, %v2916_v52  ;;  %v3213_v45 = vld [vmem:[%s5626_s1 + $0x98] sm:$0xff] }
0x1d0f   :  { %v4232_v61 = vpack.c.bf16 %v3213_v45, %v3212_v7 }
0x1d10   :  { %2920 = vrot.lane.b32.xlu0 %v2918_v63, %s4428_s22 }
0x1d11   :  { %v1621_v50 = vpop.permute.xlu0 %1620 }
0x1d12   :  { %1623 = vst.msk [vmem:[#allocation2 + $0x2] sm:$0x3] %vm1407_vm7, %v1621_v50 }
0x1d15   :  { %v2057_v55 = vpop.permute.xlu0 %2056 }
0x1d16   :  { %2059 = vst.msk [vmem:[#allocation2 + $0x6] sm:$0x3] %vm1407_vm7, %v2057_v55  ;;  %v3222_v55 = vld [vmem:[%s5626_s1 + $0xe0] sm:$0xff] }
0x1d19   :  { %v2485_v57 = vpop.permute.xlu0 %2484 }
0x1d1a   :  { %2487 = vst.msk [vmem:[#allocation2 + $0xa] sm:$0x3] %vm1407_vm7, %v2485_v57  ;;  %v3223_v57 = vld [vmem:[%s5626_s1 + $0xe8] sm:$0xff] }
0x1d1d   :  { %v2924_v17 = vld [vmem:[#allocation2] sm:$0xff] }
0x1d1e   :  { %3932 = vmatprep.mubr.msk.f32.mxu0 %vm543_vm3, %v2924_v17  ;;  %v3224_v17 = vld [vmem:[%s5626_s1 + $0xf0] sm:$0xff] }
0x1d82   :  { %v2921_v56 = vpop.permute.xlu0 %2920 }
0x1d83   :  { %2923 = vst.msk [vmem:[#allocation2 + $0xe] sm:$0x3] %vm1407_vm7, %v2921_v56  ;;  %v4252_v56 = vpack.c.bf16 %v3223_v57, %v3222_v55 }
0x1d8a   :  { %v2925_v36 = vld [vmem:[#allocation2 + $0x8] sm:$0xff] }
0x1d8b   :  { %3933 = vmatmul.mubr.msk.f32.vlgmr.msra.gmra.mrb[32].mxu0 %vm543_vm3, %v2925_v36  ;;  %v3225_v36 = vld [vmem:[%s5626_s1 + $0xf8] sm:$0xff] }
0x1d8c   :  { %4191 = vmatpush3.bf16.msra.mxu0 %v4188_v49  ;;  %v4256_v8 = vpack.c.bf16 %v3225_v36, %v3224_v17 }
0x1d8d   :  { %4193 = vmatprep.subr.bf16.mxu0 %v4192_v58 }
0x1d90   :  { %4195 = vmatpush3.bf16.msra.mxu0 %v4192_v58 }
0x1d91   :  { %4229 = vmatprep.subr.bf16.mxu0 %v4228_v3 }
0x1e5e   :  { %v3934_v26 = vpop.f32.mrb[32].mxu0 }
0x1e5f   :  { %v3007_v27 = vpop.f32.mrb[33].mxu0  ;;  %v3013_v34 = vadd.f32 %v3934_v26, %v3392_v25 }
0x1e60   :  { %v3008_v30 = vadd.f32 %v3392_v25, %v3007_v27 }
0x1e62   :  { %3943 = vmatprep.mubr.msk.f32.mxu0 %vm543_vm3, %v3008_v30 }
0x1e63   :  { %3944 = vmatmul.mubr.msk.f32.vlgmr.msra.gmra.mrb[34].mxu0 %vm543_vm3, %v3013_v34 }
0x1e64   :  { %4231 = vmatpush3.bf16.msra.mxu0 %v4228_v3 }
0x1e65   :  { %4233 = vmatprep.subr.bf16.mxu0 %v4232_v61 }
0x1e68   :  { %4235 = vmatpush3.bf16.msra.mxu0 %v4232_v61 }
0x1e69   :  { %4237 = vmatprep.subr.bf16.mxu0 %v4236_v37 }
0x1e6c   :  { %4239 = vmatpush3.bf16.msra.mxu0 %v4236_v37 }
0x1e6d   :  { %4241 = vmatprep.subr.bf16.mxu0 %v4240_v39 }
0x1e70   :  { %4243 = vmatpush3.bf16.msra.mxu0 %v4240_v39 }
0x1e71   :  { %4245 = vmatprep.subr.bf16.mxu0 %v4244_v28 }
0x1e74   :  { %4247 = vmatpush3.bf16.msra.mxu0 %v4244_v28 }
0x1e75   :  { %4249 = vmatprep.subr.bf16.mxu0 %v4248_v29 }
0x1e78   :  { %4251 = vmatpush3.bf16.msra.mxu0 %v4248_v29 }
0x1e79   :  { %4253 = vmatprep.subr.bf16.mxu0 %v4252_v56 }
0x1e7c   :  { %4255 = vmatpush3.bf16.msra.mxu0 %v4252_v56 }
0x1e7d   :  { %4257 = vmatprep.subr.bf16.mxu0 %v4256_v8 }
0x1e80   :  { %4259 = vmatpush3.bf16.msra.mxu0 %v4256_v8 }
0x1f36   :  { %v3945_v21 = vpop.f32.mrb[34].mxu0 }
0x1f37   :  { %v3103_v53 = vadd.f32 %v3945_v21, %v3395_v18  ;;  %v3097_v31 = vpop.f32.mrb[35].mxu0 }
0x1f38   :  { %v3098_v24 = vadd.f32 %v3395_v18, %v3097_v31 }
0x1f39   :  { %v3107_v49 = vmul.f32 0.2, %v3103_v53 }
0x1f3a   :  { %v3106_v52 = vmul.f32 0.2, %v3098_v24 }
0x1f3b   :  { %v3109_v50 = vmax.f32 %v3103_v53, %v3107_v49 }
0x1f3c   :  { %v3108_v63 = vmax.f32 %v3098_v24, %v3106_v52 }
0x1f3e   :  { %3978 = vmatprep.mubr.f32.mxu1 %v3108_v63 }
0x1f3f   :  { %3979 = vmatmul.mubr.f32.vlgmr.msra.gmra.mrb[34].mxu1 %v3109_v50 }
0x2012   :  { %v3980_v58 = vpop.f32.mrb[34].mxu1 }
0x2013   :  { %v3203_v60 = vadd.f32 %v3980_v58, %v3398_v51  ;;  %v3197_v6 = vpop.f32.mrb[35].mxu1 }
0x2014   :  { %v3198_v1 = vadd.f32 %v3398_v51, %v3197_v6 }
0x2015   :  { %v3207_v41 = vmul.f32 0.2, %v3203_v60 }
0x2016   :  { %v3206_v38 = vmul.f32 0.2, %v3198_v1 }
0x2017   :  { %v3209_v10 = vmax.f32 %v3203_v60, %v3207_v41 }
0x2018   :  { %v3208_v9 = vmax.f32 %v3198_v1, %v3206_v38 }
0x201a   :  { %4013 = vmatprep.mubr.f32.mxu0 %v3208_v9 }
0x201b   :  { %4014 = vmatmul.mubr.f32.vlgmr.msra.gmra.mrb[36].mxu0 %v3209_v10 }
0x20ee   :  { %v4015_v11 = vpop.f32.mrb[36].mxu0 }
0x20ef   :  { %v3303_v4 = vadd.f32 %v4015_v11, %v3399_v43  ;;  %v3297_v54 = vpop.f32.mrb[37].mxu0 }
0x20f0   :  { %v3298_v12 = vadd.f32 %v3399_v43, %v3297_v54 }
0x20f1   :  { %4417 = vtanh.f32 %v3303_v4 }
0x20f2   :  { %4419 = vtanh.f32 %v3298_v12 }
0x20fb   :  { %v4418_v13 = vpop.eup %4417 }
0x20fc   :  { %v4420_v15 = vpop.eup %4419  ;;  %3309 = vst.msk [vmem:[%s5630_s4 + $0x8] sm:$0xff] %vm543_vm3, %v4418_v13 }
0x20fd   :  { %3308 = vst.msk [vmem:[%s5630_s4] sm:$0xff] %vm543_vm3, %v4420_v15 }

</bundles_post_ra>
